<compile_context>
chip_gen: v5e
topology: v5e:2x2
jax: 0.10.0
libtpu: 0.0.40
codegen_flags: <defaults>
</compile_context>

<pallas_src>
import jax
import jax.numpy as jnp
from jax.experimental import pallas as pl
from jax.experimental.pallas import tpu as pltpu


def mlp_kernel(x_ref,
               w1_ref, b1_ref,
               w2_ref, b2_ref,
               w3_ref, b3_ref,
               w4_ref, b4_ref,
               o_ref):
    """One batch tile of the fused 3-hidden-layer MLP + output head.

    Matmuls run on the MXU with f32 accumulation; bias add + ReLU happen on the
    VPU in f32; activations are cast back to the (bf16) weight dtype between
    layers so every MXU pass sees bf16 operands.  Dropout layers are identity
    (inference / model.eval() semantics).
    """
    h = x_ref[...]

    # hidden1 -> dropout1 (identity, eval) -> relu
    h = jnp.dot(h, w1_ref[...], preferred_element_type=jnp.float32) + b1_ref[...]
    h = jnp.maximum(h, 0.0).astype(w2_ref.dtype)

    # hidden2 -> dropout2 (identity, eval) -> relu
    h = jnp.dot(h, w2_ref[...], preferred_element_type=jnp.float32) + b2_ref[...]
    h = jnp.maximum(h, 0.0).astype(w3_ref.dtype)

    # hidden3 -> dropout3 (identity, eval) -> relu
    h = jnp.dot(h, w3_ref[...], preferred_element_type=jnp.float32) + b3_ref[...]
    h = jnp.maximum(h, 0.0).astype(w4_ref.dtype)

    # output head (no activation); width is lane-dense padded
    out = jnp.dot(h, w4_ref[...], preferred_element_type=jnp.float32) + b4_ref[...]
    o_ref[...] = out.astype(o_ref.dtype)


def _choose_batch_tile(batch, batch_tile, mult):
    """Pick the batch tile: big, multiple of `mult`, and >= 2 grid steps when
    the batch is large enough (so v7x's two TensorCores both get work)."""
    tb = min(batch_tile, batch)
    tb = max(mult, (tb // mult) * mult)
    if pl.cdiv(batch, tb) < 2 and batch >= 2 * mult:
        tb = max(mult, ((batch // 2) // mult) * mult)
    return tb


def mydnn_forward(x, params, *, batch_tile=256, compute_dtype=jnp.bfloat16):
    """MyDNN forward (eval mode) as a single fused Pallas kernel.

    x:      (B, inputs) float32
    params: PyTorch-convention shapes:
            w1 (h0, in), b1 (h0,), w2 (h1, h0), b2 (h1,),
            w3 (h2, h1), b3 (h2,), w4 (out, h2), b4 (out,)
    """
    B, in_dim = x.shape
    out_dim = params["w4"].shape[0]

    # Weights -> (in, out) in bf16 (MXU-native); biases stay f32 (added to the
    # f32 accumulator inside the kernel).
    w1 = params["w1"].T.astype(compute_dtype)
    w2 = params["w2"].T.astype(compute_dtype)
    w3 = params["w3"].T.astype(compute_dtype)
    w4 = params["w4"].T.astype(compute_dtype)
    b1 = params["b1"].reshape(1, -1).astype(jnp.float32)
    b2 = params["b2"].reshape(1, -1).astype(jnp.float32)
    b3 = params["b3"].reshape(1, -1).astype(jnp.float32)
    b4 = params["b4"].reshape(1, -1).astype(jnp.float32)

    # Lane-dense output head: zero-pad N=out_dim up to a multiple of 128 so the
    # output writeback is unmasked full-lane stores; slice the pad off outside.
    n_pad = max(128, pl.cdiv(out_dim, 128) * 128)
    if n_pad != out_dim:
        w4 = jnp.pad(w4, ((0, 0), (0, n_pad - out_dim)))
        b4 = jnp.pad(b4, ((0, 0), (0, n_pad - out_dim)))

    # Batch tiling: fill the MXU M dim; multiple of 16 for bf16 sublane packing.
    mult = 16 if compute_dtype == jnp.bfloat16 else 8
    tb = _choose_batch_tile(B, batch_tile, mult)
    b_pad = pl.cdiv(B, tb) * tb
    xk = x.astype(compute_dtype)
    if b_pad != B:
        xk = jnp.pad(xk, ((0, b_pad - B), (0, 0)))

    grid = (b_pad // tb,)

    # Grid-invariant weights/biases: whole array resident in VMEM for the whole
    # kernel (no per-step pipeline double-buffering).
    resident = pl.BlockSpec(memory_space=pltpu.MemorySpace.VMEM)

    out = pl.pallas_call(
        mlp_kernel,
        out_shape=jax.ShapeDtypeStruct((b_pad, n_pad), jnp.float32),
        grid_spec=pltpu.PrefetchScalarGridSpec(
            num_scalar_prefetch=0,
            grid=grid,
            in_specs=[
                pl.BlockSpec((tb, in_dim), lambda i: (i, 0)),
                resident, resident,   # w1, b1
                resident, resident,   # w2, b2
                resident, resident,   # w3, b3
                resident, resident,   # w4, b4
            ],
            out_specs=pl.BlockSpec((tb, n_pad), lambda i: (i, 0)),
        ),
        compiler_params=pltpu.CompilerParams(
            dimension_semantics=("parallel",)),
    )(xk, w1, b1, w2, b2, w3, b3, w4, b4)

    return out[:B, :out_dim]


def init_params(key, inputs, hidden_units, outputs, reg):
    """Deterministic PyTorch-style (uniform +/- 1/sqrt(fan_in)) init."""
    h0, h1, h2 = hidden_units
    out_dim = 1 if reg else outputs
    dims = [(h0, inputs), (h1, h0), (h2, h1), (out_dim, h2)]
    params = {}
    for idx, (fan_out, fan_in) in enumerate(dims, start=1):
        key, kw, kb = jax.random.split(key, 3)
        bound = 1.0 / jnp.sqrt(jnp.float32(fan_in))
        params[f"w{idx}"] = jax.random.uniform(
            kw, (fan_out, fan_in), jnp.float32, -bound, bound)
        params[f"b{idx}"] = jax.random.uniform(
            kb, (fan_out,), jnp.float32, -bound, bound)
    return params


if __name__ == "__main__":
    key = jax.random.PRNGKey(0)

    inputs = 32
    hidden_units = [128, 256, 512]
    outputs = 2
    reg = False
    batch = 512   # small overall, but fills the MXU M dim and gives 2 grid steps

    kx, kp = jax.random.split(key)
    x = jax.random.normal(kx, (batch, inputs), jnp.float32)
    params = init_params(kp, inputs, hidden_units, outputs, reg)

    out = mydnn_forward(x, params, batch_tile=256)
    out = jax.block_until_ready(out)
    assert out.shape == (batch, outputs)

    # Reference 1: mirrors kernel precision (bf16 operands, f32 accumulation).
    def ref_mirror(x, p, dt=jnp.bfloat16):
        h = x.astype(dt)
        for i in (1, 2, 3):
            h = jnp.dot(h, p[f"w{i}"].T.astype(dt),
                        preferred_element_type=jnp.float32) + p[f"b{i}"]
            h = jnp.maximum(h, 0.0).astype(dt)
        return jnp.dot(h, p["w4"].T.astype(dt),
                       preferred_element_type=jnp.float32) + p["b4"]

    # Reference 2: plain f32 PyTorch semantics (eval-mode dropout == identity).
    def ref_f32(x, p):
        h = jnp.maximum(x @ p["w1"].T + p["b1"], 0.0)
        h = jnp.maximum(h @ p["w2"].T + p["b2"], 0.0)
        h = jnp.maximum(h @ p["w3"].T + p["b3"], 0.0)
        return h @ p["w4"].T + p["b4"]

    assert jnp.allclose(out, ref_mirror(x, params), atol=1e-2, rtol=1e-2)
    assert jnp.allclose(out, ref_f32(x, params), atol=8e-2, rtol=8e-2)

    # TODO(synk): training-mode dropout masks (pltpu.prng_random_bits) not
    # implemented; kernel reproduces eval-mode forward semantics.
    print("KERNEL_OK")
</pallas_src>

<mosaic_0001>
module attributes {stable_mosaic.version = 11 : i64} {
  func.func @mlp_kernel(%arg0: i32, %arg1: memref<256x32xbf16, #tpu.memory_space<vmem>>, %arg2: memref<32x128xbf16, #tpu.memory_space<vmem>>, %arg3: memref<1x128xf32, #tpu.memory_space<vmem>>, %arg4: memref<128x256xbf16, #tpu.memory_space<vmem>>, %arg5: memref<1x256xf32, #tpu.memory_space<vmem>>, %arg6: memref<256x512xbf16, #tpu.memory_space<vmem>>, %arg7: memref<1x512xf32, #tpu.memory_space<vmem>>, %arg8: memref<512x128xbf16, #tpu.memory_space<vmem>>, %arg9: memref<1x128xf32, #tpu.memory_space<vmem>>, %arg10: memref<256x128xf32, #tpu.memory_space<vmem>>) attributes {dimension_semantics = [#tpu.dimension_semantics<parallel>], iteration_bounds = array<i64: 2>, scalar_prefetch = 0 : i64, scratch_operands = 0 : i64, tpu.core_type = #tpu.core_type<tc>, window_params = [{transform_indices = @transform_0, window_bounds = array<i64: 256, 32>}, {pipeline_mode = #tpu.pipeline_mode<synchronous>, transform_indices = @transform_1, window_bounds = array<i64: 32, 128>}, {pipeline_mode = #tpu.pipeline_mode<synchronous>, transform_indices = @transform_2, window_bounds = array<i64: 1, 128>}, {pipeline_mode = #tpu.pipeline_mode<synchronous>, transform_indices = @transform_3, window_bounds = array<i64: 128, 256>}, {pipeline_mode = #tpu.pipeline_mode<synchronous>, transform_indices = @transform_4, window_bounds = array<i64: 1, 256>}, {pipeline_mode = #tpu.pipeline_mode<synchronous>, transform_indices = @transform_5, window_bounds = array<i64: 256, 512>}, {pipeline_mode = #tpu.pipeline_mode<synchronous>, transform_indices = @transform_6, window_bounds = array<i64: 1, 512>}, {pipeline_mode = #tpu.pipeline_mode<synchronous>, transform_indices = @transform_7, window_bounds = array<i64: 512, 128>}, {pipeline_mode = #tpu.pipeline_mode<synchronous>, transform_indices = @transform_8, window_bounds = array<i64: 1, 128>}, {transform_indices = @transform_9, window_bounds = array<i64: 256, 128>}]} {
    %c0 = arith.constant 0 : index
    %c0_0 = arith.constant 0 : index
    %0 = vector.load %arg1[%c0, %c0_0] : memref<256x32xbf16, #tpu.memory_space<vmem>>, vector<256x32xbf16>
    %c0_1 = arith.constant 0 : index
    %c0_2 = arith.constant 0 : index
    %1 = vector.load %arg2[%c0_1, %c0_2] : memref<32x128xbf16, #tpu.memory_space<vmem>>, vector<32x128xbf16>
    %cst = arith.constant dense<0.000000e+00> : vector<256x128xf32>
    %2 = tpu.matmul %0, %1, %cst {dimension_numbers = #tpu.dot_dimension_numbers<[1], [0], [0], [1], [0, 0, 1, 1], [], []>} : vector<256x32xbf16>, vector<32x128xbf16>, vector<256x128xf32> -> vector<256x128xf32>
    %c0_3 = arith.constant 0 : index
    %c0_4 = arith.constant 0 : index
    %3 = vector.load %arg3[%c0_3, %c0_4] : memref<1x128xf32, #tpu.memory_space<vmem>>, vector<1x128xf32>
    %4 = vector.broadcast %3 : vector<1x128xf32> to vector<256x128xf32>
    %5 = arith.addf %2, %4 : vector<256x128xf32>
    %cst_5 = arith.constant 0.000000e+00 : f32
    %6 = vector.broadcast %cst_5 : f32 to vector<256x128xf32>
    %7 = arith.maximumf %5, %6 : vector<256x128xf32>
    %8 = arith.truncf %7 : vector<256x128xf32> to vector<256x128xbf16>
    %c0_6 = arith.constant 0 : index
    %c0_7 = arith.constant 0 : index
    %9 = vector.load %arg4[%c0_6, %c0_7] : memref<128x256xbf16, #tpu.memory_space<vmem>>, vector<128x256xbf16>
    %cst_8 = arith.constant dense<0.000000e+00> : vector<256x256xf32>
    %10 = tpu.matmul %8, %9, %cst_8 {dimension_numbers = #tpu.dot_dimension_numbers<[1], [0], [0], [1], [0, 0, 1, 1], [], []>} : vector<256x128xbf16>, vector<128x256xbf16>, vector<256x256xf32> -> vector<256x256xf32>
    %c0_9 = arith.constant 0 : index
    %c0_10 = arith.constant 0 : index
    %11 = vector.load %arg5[%c0_9, %c0_10] : memref<1x256xf32, #tpu.memory_space<vmem>>, vector<1x256xf32>
    %12 = vector.broadcast %11 : vector<1x256xf32> to vector<256x256xf32>
    %13 = arith.addf %10, %12 : vector<256x256xf32>
    %cst_11 = arith.constant 0.000000e+00 : f32
    %14 = vector.broadcast %cst_11 : f32 to vector<256x256xf32>
    %15 = arith.maximumf %13, %14 : vector<256x256xf32>
    %16 = arith.truncf %15 : vector<256x256xf32> to vector<256x256xbf16>
    %c0_12 = arith.constant 0 : index
    %c0_13 = arith.constant 0 : index
    %17 = vector.load %arg6[%c0_12, %c0_13] : memref<256x512xbf16, #tpu.memory_space<vmem>>, vector<256x512xbf16>
    %cst_14 = arith.constant dense<0.000000e+00> : vector<256x512xf32>
    %18 = tpu.matmul %16, %17, %cst_14 {dimension_numbers = #tpu.dot_dimension_numbers<[1], [0], [0], [1], [0, 0, 1, 1], [], []>} : vector<256x256xbf16>, vector<256x512xbf16>, vector<256x512xf32> -> vector<256x512xf32>
    %c0_15 = arith.constant 0 : index
    %c0_16 = arith.constant 0 : index
    %19 = vector.load %arg7[%c0_15, %c0_16] : memref<1x512xf32, #tpu.memory_space<vmem>>, vector<1x512xf32>
    %20 = vector.broadcast %19 : vector<1x512xf32> to vector<256x512xf32>
    %21 = arith.addf %18, %20 : vector<256x512xf32>
    %cst_17 = arith.constant 0.000000e+00 : f32
    %22 = vector.broadcast %cst_17 : f32 to vector<256x512xf32>
    %23 = arith.maximumf %21, %22 : vector<256x512xf32>
    %24 = arith.truncf %23 : vector<256x512xf32> to vector<256x512xbf16>
    %c0_18 = arith.constant 0 : index
    %c0_19 = arith.constant 0 : index
    %25 = vector.load %arg8[%c0_18, %c0_19] : memref<512x128xbf16, #tpu.memory_space<vmem>>, vector<512x128xbf16>
    %cst_20 = arith.constant dense<0.000000e+00> : vector<256x128xf32>
    %26 = tpu.matmul %24, %25, %cst_20 {dimension_numbers = #tpu.dot_dimension_numbers<[1], [0], [0], [1], [0, 0, 1, 1], [], []>} : vector<256x512xbf16>, vector<512x128xbf16>, vector<256x128xf32> -> vector<256x128xf32>
    %c0_21 = arith.constant 0 : index
    %c0_22 = arith.constant 0 : index
    %27 = vector.load %arg9[%c0_21, %c0_22] : memref<1x128xf32, #tpu.memory_space<vmem>>, vector<1x128xf32>
    %28 = vector.broadcast %27 : vector<1x128xf32> to vector<256x128xf32>
    %29 = arith.addf %26, %28 : vector<256x128xf32>
    %c0_23 = arith.constant 0 : index
    %c0_24 = arith.constant 0 : index
    %30 = vector.load %arg10[%c0_23, %c0_24] : memref<256x128xf32, #tpu.memory_space<vmem>>, vector<256x128xf32>
    tpu.vector_store %arg10[%c0_23, %c0_24], %29 {strides = array<i32>} : memref<256x128xf32, #tpu.memory_space<vmem>>, vector<256x128xf32>,
    return
  }
  func.func @transform_0(%arg0: i32) -> (i32, i32) {
    %c0_i32 = arith.constant 0 : i32
    %c0_i32_0 = arith.constant 0 : i32
    return %arg0, %c0_i32 : i32, i32
  }
  func.func @transform_1(%arg0: i32) -> (i32, i32) {
    %c0_i32 = arith.constant 0 : i32
    %c0_i32_0 = arith.constant 0 : i32
    %c0_i32_1 = arith.constant 0 : i32
    return %c0_i32, %c0_i32_0 : i32, i32
  }
  func.func @transform_2(%arg0: i32) -> (i32, i32) {
    %c0_i32 = arith.constant 0 : i32
    %c0_i32_0 = arith.constant 0 : i32
    %c0_i32_1 = arith.constant 0 : i32
    return %c0_i32, %c0_i32_0 : i32, i32
  }
  func.func @transform_3(%arg0: i32) -> (i32, i32) {
    %c0_i32 = arith.constant 0 : i32
    %c0_i32_0 = arith.constant 0 : i32
    %c0_i32_1 = arith.constant 0 : i32
    return %c0_i32, %c0_i32_0 : i32, i32
  }
  func.func @transform_4(%arg0: i32) -> (i32, i32) {
    %c0_i32 = arith.constant 0 : i32
    %c0_i32_0 = arith.constant 0 : i32
    %c0_i32_1 = arith.constant 0 : i32
    return %c0_i32, %c0_i32_0 : i32, i32
  }
  func.func @transform_5(%arg0: i32) -> (i32, i32) {
    %c0_i32 = arith.constant 0 : i32
    %c0_i32_0 = arith.constant 0 : i32
    %c0_i32_1 = arith.constant 0 : i32
    return %c0_i32, %c0_i32_0 : i32, i32
  }
  func.func @transform_6(%arg0: i32) -> (i32, i32) {
    %c0_i32 = arith.constant 0 : i32
    %c0_i32_0 = arith.constant 0 : i32
    %c0_i32_1 = arith.constant 0 : i32
    return %c0_i32, %c0_i32_0 : i32, i32
  }
  func.func @transform_7(%arg0: i32) -> (i32, i32) {
    %c0_i32 = arith.constant 0 : i32
    %c0_i32_0 = arith.constant 0 : i32
    %c0_i32_1 = arith.constant 0 : i32
    return %c0_i32, %c0_i32_0 : i32, i32
  }
  func.func @transform_8(%arg0: i32) -> (i32, i32) {
    %c0_i32 = arith.constant 0 : i32
    %c0_i32_0 = arith.constant 0 : i32
    %c0_i32_1 = arith.constant 0 : i32
    return %c0_i32, %c0_i32_0 : i32, i32
  }
  func.func @transform_9(%arg0: i32) -> (i32, i32) {
    %c0_i32 = arith.constant 0 : i32
    %c0_i32_0 = arith.constant 0 : i32
    return %arg0, %c0_i32 : i32, i32
  }
}

</mosaic_0001>

<bundles_post_ra>
// kernel: tpu_custom_call.1
= control target key start
LH: loop header
LB: loop body
LE: loop exit
PB: predicated region body
PF: predicated region fallthrough
CT: control target
= control target key end

     0   :  { %s5504_s0 = inlined_call_operand.vmem [shape: bf16[512,32], index: 0, kind: input, shape index: {}]   ;;  %s5505_s1 = inlined_call_operand.vmem [shape: bf16[32,128], index: 1, kind: input, shape index: {}]   ;;  %s5506_s2 = inlined_call_operand.vmem [shape: f32[1,128], index: 2, kind: input, shape index: {}]   ;;  %s5507_s3 = inlined_call_operand.hbm [shape: bf16[128,256], index: 3, kind: input, shape index: {}]   ;;  %s5508_s4 = inlined_call_operand.vmem [shape: f32[1,256], index: 4, kind: input, shape index: {}]   ;;  %s5509_s5 = inlined_call_operand.hbm [shape: bf16[256,512], index: 5, kind: input, shape index: {}]   ;;  %s5510_s6 = inlined_call_operand.vmem [shape: f32[1,512], index: 6, kind: input, shape index: {}]   ;;  %s5511_s7 = inlined_call_operand.vmem [shape: bf16[512,128], index: 7, kind: input, shape index: {}]   ;;  %s5512_s8 = inlined_call_operand.vmem [shape: f32[1,128], index: 8, kind: input, shape index: {}]   ;;  %s5513_s9 = inlined_call_operand.hbm [shape: f32[512,128], index: 9, kind: output, shape index: {}]  }
   0x1   :  { %5526 = sst [smem:[#allocation36_spill]] %s5507_s3 }
   0x2   :  { %14 = vsyncpa [#allocation3], 0 }
   0x3   :  { %15 = vsyncpa [#allocation6], 0 }
   0x4   :  { %16 = vsyncpa [#allocation4], 0 }
   0x5   :  { %18 = vsyncpa [#allocation4 + $0x1], 0  ;;  %s4069_s30 = smov 0   ;;  %s4071_s10 = smov 0  }
   0x6   :  { %s4073_s11 = smov 0   ;;  %s4075_s12 = smov 0  }
   0x7 LB: > { %s4090_s13 = sadd.s32 4294967295, %s4009_s12   ;;  %s3109_s14 = sadd.s32 4294967294, %s4009_s12   ;;  %s4009_s12 = sphi %s4075_s12, %s5596_s12   ;;  %s4005_s11 = sphi %s4073_s11, %s5595_s11   ;;  %s4001_s10 = sphi %s4071_s10, %s5594_s10   ;;  %s3997_s30 = sphi %s4069_s30, %s5593_s30  }
   0x8   : > { %s4094_s15 = sadd.s32 1, %s4009_s12   ;;  %s225_s16 = sadd.s32 1, %s4005_s11 }
   0x9   : > { %s222_s17 = ssub.s32 %s4009_s12, %s4094_s15  ;;  %p235_p0 = scmp.ne.s32.totalorder %s4005_s11, %s4001_s10 }
   0xa   : > { %p223_p1 = scmp.eq.s32.totalorder %s222_s17, 0  ;;  %p236_p2 = scmp.eq.s32.totalorder %s4090_s13, 1 }
   0xb   : > { %p241_p3 = scmp.ne.s32.totalorder %s4001_s10, %s3997_s30  ;;  %p242_p4 = scmp.eq.s32.totalorder %s3109_s14, 1 }
   0xc   : > { %s4105_s18 = scalar_select %p223_p1, %s4005_s11, %s225_s16  }
   0xd   : > { %p4107_p5 = por %p236_p2, %p235_p0  ;;  %p4111_p6 = por %p242_p4, %p241_p3 }
   0xe   : > { %p3110_p7 = scmp.ge.s32.totalorder %s4009_s12, 1  ;;  %p249_p8 = scmp.lt.s32.totalorder %s4009_s12, 3 }
   0xf   : > { %p3831_p9 = scmp.eq.s32.totalorder %s4090_s13, 0  ;;  %s5530_s3 = sld [smem:[#allocation36_spill]] }
  0x10   : > { %p4118_p10 = pnand %p3110_p7, %p249_p8  ;;  %s4011_s25 = smov [#allocation2]  }
  0x11   : > { %s268_s26 = sshll.u32 %s4011_s25, 4  ;;  %s283_s29 = sshll.u32 %s5509_s5, 4  ;;  %s269_s26 = int_to_ptr.vmem [resolvable:$true] %s268_s26  ;;  %s284_s29 = int_to_ptr.hbm [resolvable:$true] %s283_s29 }
  0x12   : > { %p3820_p11 = pneg %p4118_p10  ;;  %s4012_s14 = smov 128  }
  0x13   : > { %s4013_s16 = smov 8   ;;  %s4014_s17 = smov [#allocation5]  }
  0x14   : > { %p3821_p12 = pnand %p3831_p9, %p3820_p11  ;;  %s285_s22 = sshll.u32 %s4014_s17, 4  ;;  %s286_s22 = int_to_ptr.vmem [resolvable:$true] %s285_s22 }
  0x15   : > { %s266_s24 = sshll.u32 %s5530_s3, 4  ;;  %s4015_s23 = smov 256   ;;  %s267_s24 = int_to_ptr.hbm [resolvable:$true] %s266_s24 }
  0x16   : > { %3823 = dma.hbm_to_vmem [thread:$0]  (!%p3821_p12), %s267_s24, 2048, %s269_s26, [#allocation3], %s4012_s14, %s4012_s14, %s4013_s16  }
  0x17   : > { %s4016_s3 = smov 16   ;;  %319 = sbr.rel (%p4118_p10) target bundleno = 1403 (0x57b), region = 56 }
  0x18   : > { %3826 = dma.hbm_to_vmem [thread:$0]  (!%p3821_p12), %s284_s29, 8192, %s286_s22, [#allocation6], %s4015_s23, %s4015_s23, %s4016_s3  }
  0x1c   : > { %3984 = dma.done.wait (%p3831_p9), [#allocation3], 2048  }
  0x1d   : > { %3986 = vsyncadd (%p3831_p9), [#allocation3], 4294965248 }
  0x1e   : > { %3988 = dma.done.wait (%p3831_p9), [#allocation6], 8192  }
  0x1f   : > { %3990 = vsyncadd (%p3831_p9), [#allocation6], 4294959104  ;;  %s3118_s24 = sshll.u32 %s4090_s13, 5  ;;  %v3678_v0 = vld [vmem:[%s5505_s1 + $0x8] sm:$0xff]  ;;  %v3677_v1 = vld [vmem:[%s5505_s1] sm:$0xff]  ;;  %vm501_vm0 = vcmask 261120  }
  0x20   : > { %p362_p13 = scmp.lt.s32.totalorder %s3118_s24, 63  ;;  %556 = vmatpush.bf16.msra.mxu0 %v3678_v0  ;;  %3792 = vmatpush.bf16.msra.mxu3 %v3678_v0  ;;  %v3266_v7 = vld [vmem:[#allocation2 + $0x70] sm:$0xf]  ;;  %v3694_v8 = vld [vmem:[#allocation2 + $0x74] sm:$0xf0]  ;;  %s358_s27 = sand.u32 1, %s4001_s10  }
  0x21   : > { %v3693_v9 = vld [vmem:[#allocation2 + $0x74] sm:$0xf]  ;;  %v3267_v10 = vor.u32 %v3694_v8, %v3266_v7  ;;  %v3268_v11 = vld [vmem:[#allocation2 + $0x78] sm:$0xf0]  ;;  %v3258_v14 = vld [vmem:[#allocation2 + $0x60] sm:$0xf] }
  0x22   : > { %s5598_s24 = smov (!%p362_p13, %s3118_s24), 63  ;;  %v4164_v12 = vor.u32 %v3693_v9, %v3268_v11  ;;  %v3692_v15 = vld [vmem:[#allocation2 + $0x64] sm:$0xf0]  ;;  %v3691_v16 = vld [vmem:[#allocation2 + $0x64] sm:$0xf]  ;;  %s3117_s28 = sshll.u32 %s358_s27, 8 }
  0x23   : > { %s3119_s3 = sshll.u32 %s5598_s24, 2  ;;  %789 = vmatpush.bf16.msra.mxu1 %v3267_v10  ;;  %v3259_v17 = vor.u32 %v3692_v15, %v3258_v14  ;;  %v3260_v18 = vld [vmem:[#allocation2 + $0x68] sm:$0xf0]  ;;  %v3250_v20 = vld [vmem:[#allocation2 + $0x50] sm:$0xf]  ;;  %s5377_s29 = scalar_lea.vmem [#allocation7], %s3117_s28 }
  0x24   : > { %s4152_s14 = scalar_lea.vmem %s5504_s0, %s3119_s3  ;;  %557 = vmatpush.bf16.msra.mxu0 %v3677_v1  ;;  %3793 = vmatpush.bf16.msra.mxu3 %v3677_v1  ;;  %v4169_v19 = vor.u32 %v3691_v16, %v3260_v18  ;;  %v3690_v21 = vld [vmem:[#allocation2 + $0x54] sm:$0xf0]  ;;  %v3689_v22 = vld [vmem:[#allocation2 + $0x54] sm:$0xf]  ;;  %v3252_v24 = vld [vmem:[#allocation2 + $0x58] sm:$0xf0] }
  0x25   : > { %v3661_v2 = vld [vmem:[%s4152_s14] sm:$0xff]  ;;  %v3662_v3 = vld [vmem:[%s4152_s14 + $0x8] sm:$0xff]  ;;  %v3663_v4 = vld [vmem:[%s4152_s14 + $0x10] sm:$0xff]  ;;  %878 = vmatpush.bf16.msra.mxu2 %v4164_v12  ;;  %v3251_v23 = vor.u32 %v3690_v21, %v3250_v20  ;;  %v4172_v25 = vor.u32 %v3689_v22, %v3252_v24  ;;  %s3022_s23 = sshll.u32 %s5377_s29, 4  ;;  %s3959_s28 = scalar_lea.hbm %s5513_s9, 512  ;;  %s3023_s23 = int_to_ptr.vmem [resolvable:$true] %s3022_s23 }
  0x26   : > { %v3664_v5 = vld [vmem:[%s4152_s14 + $0x18] sm:$0xff]  ;;  %v3665_v6 = vld [vmem:[%s4152_s14 + $0x20] sm:$0xff]  ;;  %v3666_v13 = vld [vmem:[%s4152_s14 + $0x28] sm:$0xff] }
  0x27   : > { %3192 = vmatmul.msk.bf16.vlgmr.msra.gmra.mxu0 %vm501_vm0, %v3661_v2  ;;  %790 = vmatpush.bf16.msra.mxu1 %v3259_v17  ;;  %v3242_v26 = vld [vmem:[#allocation2 + $0x40] sm:$0xf]  ;;  %v3688_v27 = vld [vmem:[#allocation2 + $0x44] sm:$0xf0]  ;;  %v3687_v28 = vld [vmem:[#allocation2 + $0x44] sm:$0xf] }
  0x28   : > { %3794 = vmatpush.bf16.msrb.mxu3 %v3267_v10  ;;  %v3244_v29 = vld [vmem:[#allocation2 + $0x48] sm:$0xf0]  ;;  %v3243_v30 = vor.u32 %v3688_v27, %v3242_v26  ;;  %v3234_v32 = vld [vmem:[#allocation2 + $0x30] sm:$0xf]  ;;  %v3686_v33 = vld [vmem:[#allocation2 + $0x34] sm:$0xf0] }
  0x29   : > { %879 = vmatpush.bf16.msra.mxu2 %v4169_v19  ;;  %v4175_v31 = vor.u32 %v3687_v28, %v3244_v29  ;;  %v3685_v34 = vld [vmem:[#allocation2 + $0x34] sm:$0xf]  ;;  %v3235_v35 = vor.u32 %v3686_v33, %v3234_v32  ;;  %v3236_v36 = vld [vmem:[#allocation2 + $0x38] sm:$0xf0]  ;;  %v3226_v39 = vld [vmem:[#allocation2 + $0x20] sm:$0xf] }
  0x2a   : > { %v3667_v37 = vld [vmem:[%s4152_s14 + $0x30] sm:$0xff]  ;;  %v4179_v38 = vor.u32 %v3685_v34, %v3236_v36  ;;  %v3684_v40 = vld [vmem:[#allocation2 + $0x24] sm:$0xf0]  ;;  %v3683_v42 = vld [vmem:[#allocation2 + $0x24] sm:$0xf] }
  0x2b   : > { %791 = vmatpush.bf16.msra.mxu1 %v3251_v23  ;;  %v3227_v41 = vor.u32 %v3684_v40, %v3226_v39  ;;  %v3228_v43 = vld [vmem:[#allocation2 + $0x28] sm:$0xf0]  ;;  %v3218_v45 = vld [vmem:[#allocation2 + $0x10] sm:$0xf]  ;;  %v3682_v46 = vld [vmem:[#allocation2 + $0x14] sm:$0xf0] }
  0x2c   : > { %3795 = vmatpush.bf16.msrb.mxu3 %v3259_v17  ;;  %v4183_v44 = vor.u32 %v3683_v42, %v3228_v43  ;;  %v3681_v47 = vld [vmem:[#allocation2 + $0x14] sm:$0xf]  ;;  %v3219_v48 = vor.u32 %v3682_v46, %v3218_v45  ;;  %v3220_v49 = vld [vmem:[#allocation2 + $0x18] sm:$0xf0]  ;;  %v3210_v51 = vld [vmem:[#allocation2] sm:$0xf] }
  0x2d   : > { %880 = vmatpush.bf16.msra.mxu2 %v4172_v25  ;;  %v4186_v50 = vor.u32 %v3681_v47, %v3220_v49  ;;  %v3680_v52 = vld [vmem:[#allocation2 + $0x4] sm:$0xf0]  ;;  %v3679_v53 = vld [vmem:[#allocation2 + $0x4] sm:$0xf]  ;;  %v3212_v55 = vld [vmem:[#allocation2 + $0x8] sm:$0xf0] }
  0x2e   : > { %v3211_v54 = vor.u32 %v3680_v52, %v3210_v51  ;;  %v4189_v56 = vor.u32 %v3679_v53, %v3212_v55  ;;  %v3668_v57 = vld [vmem:[%s4152_s14 + $0x38] sm:$0xff]  ;;  %v3669_v58 = vld [vmem:[%s4152_s14 + $0x40] sm:$0xff]  ;;  %v3671_v11 = vld [vmem:[%s4152_s14 + $0x50] sm:$0xff] }
  0x2f   : > { %792 = vmatpush.bf16.msra.mxu1 %v3243_v30  ;;  %v4198_v60 = vld [vmem:[%s5506_s2] ss:$0 sm:$0xff]  ;;  %v3674_v14 = vld [vmem:[%s4152_s14 + $0x68] sm:$0xff]  ;;  %v3672_v22 = vld [vmem:[%s4152_s14 + $0x58] sm:$0xff] }
  0x30   : > { %3796 = vmatpush.bf16.msrb.mxu3 %v3251_v23  ;;  %v3673_v29 = vld [vmem:[%s4152_s14 + $0x60] sm:$0xff]  ;;  %v3757_v46 = vld [vmem:[#allocation5 + $0x1ec] sm:$0xf0] }
  0x31   : > { %881 = vmatpush.bf16.msra.mxu2 %v4175_v31  ;;  %3205 = vmatmul.msk.bf16.vlgmr.msra.gmra.mxu3 %vm501_vm0, %v3674_v14  ;;  %v3514_v45 = vld [vmem:[#allocation5 + $0x1e0] sm:$0xf] }
  0x32   : > { %v3498_v49 = vld [vmem:[#allocation5 + $0x1c0] sm:$0xf] }
  0x33   : > { %793 = vmatpush.bf16.msra.mxu1 %v3235_v35  ;;  %v3482_v53 = vld [vmem:[#allocation5 + $0x1a0] sm:$0xf] }
  0x34   : > { %3797 = vmatpush.bf16.msrb.mxu3 %v3243_v30 }
  0x35   : > { %882 = vmatpush.bf16.msra.mxu2 %v4179_v38 }
  0x37   : > { %3193 = vmatmul.msk.bf16.gmra.mxu0 %vm501_vm0, %v3662_v3  ;;  %794 = vmatpush.bf16.msra.mxu1 %v3227_v41  ;;  %v3670_v3 = vld [vmem:[%s4152_s14 + $0x48] sm:$0xff] }
  0x38   : > { %3798 = vmatpush.bf16.msrb.mxu3 %v3235_v35 }
  0x39   : > { %883 = vmatpush.bf16.msra.mxu2 %v4183_v44 }
  0x3b   : > { %795 = vmatpush.bf16.msra.mxu1 %v3219_v48 }
  0x3c   : > { %3799 = vmatpush.bf16.msrb.mxu3 %v3227_v41 }
  0x3d   : > { %884 = vmatpush.bf16.msra.mxu2 %v4186_v50 }
  0x3f   : > { %796 = vmatpush.bf16.msra.mxu1 %v3211_v54 }
  0x40   : > { %3800 = vmatpush.bf16.msrb.mxu3 %v3219_v48  ;;  %v3515_v48 = vor.u32 %v3757_v46, %v3514_v45  ;;  %v3715_v45 = vld [vmem:[#allocation5 + $0xa4] sm:$0xf]  ;;  %v3356_v46 = vld [vmem:[#allocation5 + $0xb0] sm:$0xf0] }
  0x41   : > { %885 = vmatpush.bf16.msra.mxu2 %v4189_v56 }
  0x42   : > { %1546 = vmatpush.bf16.msrb.mxu0 %v3515_v48  ;;  %v3747_v48 = vld [vmem:[#allocation5 + $0x1a4] sm:$0xf] }
  0x44   : > { %3801 = vmatpush.bf16.msrb.mxu3 %v3211_v54  ;;  %v3749_v54 = vld [vmem:[#allocation5 + $0x1ac] sm:$0xf0] }
  0x47   : > { %3194 = vmatmul.msk.bf16.gmra.mxu0 %vm501_vm0, %v3663_v4 }
  0x48   : > { %3802 = vmatpush.bf16.msra.mxu3 %v4164_v12  ;;  %v3675_v12 = vld [vmem:[%s4152_s14 + $0x70] sm:$0xff] }
  0x49   : > { %3206 = vmatmul.msk.bf16.gmra.mxu3 %vm501_vm0, %v3675_v12  ;;  %v3402_v12 = vld [vmem:[#allocation5 + $0x100] sm:$0xf] }
  0x4c   : > { %3803 = vmatpush.bf16.msra.mxu3 %v4169_v19 }
  0x50   : > { %3804 = vmatpush.bf16.msra.mxu3 %v4172_v25 }
  0x54   : > { %3805 = vmatpush.bf16.msra.mxu3 %v4175_v31  ;;  %v3676_v31 = vld [vmem:[%s4152_s14 + $0x78] sm:$0xff]  ;;  %s3791_s14 = sshll.u32 %s4090_s13, 8  ;;  %s3010_s13 = scalar_lea.sflag [#allocation4], %s358_s27 }
  0x55   : > { %s3021_s22 = scalar_lea.hbm %s5513_s9, %s3791_s14 }
  0x56   : > { %s3024_s24 = sshll.u32 %s3021_s22, 4  ;;  %s3025_s24 = int_to_ptr.hbm [resolvable:$true] %s3024_s24 }
  0x57   : > { %3195 = vmatmul.msk.bf16.gmra.mxu0 %vm501_vm0, %v3664_v5  ;;  %s3953_s3 = sshra.s32 %s3025_s24, 4  ;;  %s3954_s3 = int_to_ptr.hbm [resolvable:$true] %s3953_s3 }
  0x58   : > { %3806 = vmatpush.bf16.msra.mxu3 %v4179_v38  ;;  %s3955_s25 = scalar_lea.hbm %s3954_s3, 256  ;;  %p3960_p3 = scmp.lt.s32.totalorder %s3954_s3, %s5513_s9 }
  0x59   : > { %3207 = vmatmul.msk.bf16.gmra.mxu3 %vm501_vm0, %v3676_v31  ;;  %p3956_p0 = scmp.ne.s32.totalorder %s3954_s3, %s3955_s25  ;;  %p3961_p4 = scmp.lt.s32.totalorder %s3959_s28, %s3955_s25 }
  0x5b   : > { %p3957_p1 = pnand %p3956_p0, %p4107_p5  ;;  %p3962_p7 = por %p3961_p4, %p3960_p3 }
  0x5c   : > { %3807 = vmatpush.bf16.msra.mxu3 %v4183_v44 }
  0x5d   : > { %p3958_p2 = pneg %p3957_p1 }
  0x5f   : > { %p3963_p8 = pnand %p3962_p7, %p3958_p2 }
  0x60   : > { %3808 = vmatpush.bf16.msra.mxu3 %v4186_v50  ;;  %v3753_v50 = vld [vmem:[#allocation5 + $0x1cc] sm:$0xf0] }
  0x61   : > { %v3499_v51 = vor.u32 %v3753_v50, %v3498_v49  ;;  %v3484_v49 = vld [vmem:[#allocation5 + $0x1b0] sm:$0xf0] }
  0x63   : > { %1547 = vmatpush.bf16.msrb.mxu0 %v3499_v51  ;;  %v3487_v51 = vor.u32 %v3747_v48, %v3484_v49 }
  0x64   : > { %3809 = vmatpush.bf16.msra.mxu3 %v4189_v56  ;;  %v3483_v56 = vor.u32 %v3749_v54, %v3482_v53 }
  0x67   : > { %3196 = vmatmul.msk.bf16.gmra.mxu0 %vm501_vm0, %v3665_v6 }
  0x68   : > { %1548 = vmatpush.bf16.msrb.mxu0 %v3483_v56  ;;  %v3340_v56 = vld [vmem:[#allocation5 + $0x90] sm:$0xf0] }
  0x77   : > { %3197 = vmatmul.msk.bf16.gmra.mxu0 %vm501_vm0, %v3666_v13 }
  0x87   : > { %3198 = vmatmul.msk.bf16.gmra.mxu0 %vm501_vm0, %v3667_v37 }
  0x97   : > { %3199 = vmatmul.msk.bf16.gmra.mxu0 %vm501_vm0, %v3668_v57 }
  0xa4   : > { %v559_v59 = vpop.f32.mrf.mxu0 }
  0xa5   : > { %v560_v61 = vadd.f32 %v4198_v60, %v559_v59 }
  0xa7   : > { %3200 = vmatmul.msk.bf16.gmra.mxu0 %vm501_vm0, %v3669_v58  ;;  %v639_v0 = vmax.f32 %v560_v61, 0.0  ;;  %v3466_v61 = vld [vmem:[#allocation5 + $0x180] sm:$0xf] }
  0xac   : > { %v561_v62 = vpop.f32.mrf.mxu0 }
  0xad   : > { %v562_v63 = vadd.f32 %v4198_v60, %v561_v62  ;;  %v3745_v62 = vld [vmem:[#allocation5 + $0x18c] sm:$0xf0] }
  0xaf   : > { %v640_v1 = vmax.f32 %v562_v63, 0.0  ;;  %v3467_v63 = vor.u32 %v3745_v62, %v3466_v61  ;;  %v3468_v61 = vld [vmem:[#allocation5 + $0x190] sm:$0xf0] }
  0xb1   : > { %v671_v2 = vpack.c.bf16 %v640_v1, %v639_v0  ;;  %1549 = vmatpush.bf16.msrb.mxu0 %v3467_v63  ;;  %v3450_v1 = vld [vmem:[#allocation5 + $0x160] sm:$0xf] }
  0xb3   : > { %797 = vmatmul.bf16.vlgmr.msra.gmra.mxu1 %v671_v2  ;;  %886 = vmatmul.bf16.vlgmr.msra.gmra.mxu2 %v671_v2  ;;  %v3741_v2 = vld [vmem:[#allocation5 + $0x16c] sm:$0xf0] }
  0xb4   : > { %v564_v4 = vpop.f32.mrf.mxu0 }
  0xb5   : > { %v565_v5 = vadd.f32 %v4198_v60, %v564_v4  ;;  %v3451_v4 = vor.u32 %v3741_v2, %v3450_v1 }
  0xb7   : > { %3201 = vmatmul.msk.bf16.gmra.mxu0 %vm501_vm0, %v3670_v3  ;;  %v641_v8 = vmax.f32 %v565_v5, 0.0  ;;  %v3434_v5 = vld [vmem:[#allocation5 + $0x140] sm:$0xf] }
  0xb8   : > { %1550 = vmatpush.bf16.msrb.mxu0 %v3451_v4 }
  0xbc   : > { %v566_v6 = vpop.f32.mrf.mxu0 }
  0xbd   : > { %v567_v7 = vadd.f32 %v4198_v60, %v566_v6  ;;  %v3737_v6 = vld [vmem:[#allocation5 + $0x14c] sm:$0xf0] }
  0xbf   : > { %v642_v9 = vmax.f32 %v567_v7, 0.0  ;;  %v3435_v7 = vor.u32 %v3737_v6, %v3434_v5  ;;  %v3707_v6 = vld [vmem:[#allocation5 + $0x64] sm:$0xf] }
  0xc1   : > { %v672_v10 = vpack.c.bf16 %v642_v9, %v641_v8  ;;  %1551 = vmatpush.bf16.msrb.mxu0 %v3435_v7  ;;  %v3418_v9 = vld [vmem:[#allocation5 + $0x120] sm:$0xf]  ;;  %v3324_v7 = vld [vmem:[#allocation5 + $0x70] sm:$0xf0] }
  0xc3   : > { %802 = vmatmul.bf16.gmra.mxu1 %v672_v10  ;;  %891 = vmatmul.bf16.gmra.mxu2 %v672_v10  ;;  %v3733_v10 = vld [vmem:[#allocation5 + $0x12c] sm:$0xf0] }
  0xc4   : > { %v569_v13 = vpop.f32.mrf.mxu0 }
  0xc5   : > { %v570_v15 = vadd.f32 %v4198_v60, %v569_v13  ;;  %v3419_v13 = vor.u32 %v3733_v10, %v3418_v9  ;;  %v3739_v9 = vld [vmem:[#allocation5 + $0x164] sm:$0xf]  ;;  %v3452_v10 = vld [vmem:[#allocation5 + $0x170] sm:$0xf0] }
  0xc7   : > { %3202 = vmatmul.msk.bf16.gmra.mxu0 %vm501_vm0, %v3671_v11  ;;  %v643_v18 = vmax.f32 %v570_v15, 0.0  ;;  %v3755_v15 = vld [vmem:[#allocation5 + $0x1e4] sm:$0xf] }
  0xc8   : > { %1552 = vmatpush.bf16.msrb.mxu0 %v3419_v13  ;;  %v3455_v13 = vor.u32 %v3739_v9, %v3452_v10 }
  0xcc   : > { %v571_v16 = vpop.f32.mrf.mxu0 }
  0xcd   : > { %v572_v17 = vadd.f32 %v4198_v60, %v571_v16  ;;  %v3516_v16 = vld [vmem:[#allocation5 + $0x1f0] sm:$0xf0] }
  0xcf   : > { %v644_v20 = vmax.f32 %v572_v17, 0.0  ;;  %v3519_v17 = vor.u32 %v3755_v15, %v3516_v16  ;;  %v3703_v15 = vld [vmem:[#allocation5 + $0x44] sm:$0xf]  ;;  %v3308_v16 = vld [vmem:[#allocation5 + $0x50] sm:$0xf0] }
  0xd1   : > { %v673_v21 = vpack.c.bf16 %v644_v20, %v643_v18  ;;  %1724 = vmatpush.bf16.msrb.mxu2 %v3519_v17  ;;  %v3735_v17 = vld [vmem:[#allocation5 + $0x144] sm:$0xf] }
  0xd3   : > { %807 = vmatmul.bf16.gmra.mxu1 %v673_v21  ;;  %896 = vmatmul.bf16.gmra.mxu2 %v673_v21  ;;  %v3723_v21 = vld [vmem:[#allocation5 + $0xe4] sm:$0xf] }
  0xd4   : > { %v574_v23 = vpop.f32.mrf.mxu0 }
  0xd5   : > { %v575_v19 = vadd.f32 %v4198_v60, %v574_v23 }
  0xd7   : > { %3203 = vmatmul.msk.bf16.gmra.mxu0 %vm501_vm0, %v3672_v22  ;;  %v645_v26 = vmax.f32 %v575_v19, 0.0  ;;  %v3388_v22 = vld [vmem:[#allocation5 + $0xf0] sm:$0xf0]  ;;  %v3729_v19 = vld [vmem:[#allocation5 + $0x10c] sm:$0xf0] }
  0xd8   : > { %v3391_v23 = vor.u32 %v3723_v21, %v3388_v22  ;;  %v3436_v21 = vld [vmem:[#allocation5 + $0x150] sm:$0xf0] }
  0xd9   : > { %v3439_v22 = vor.u32 %v3735_v17, %v3436_v21 }
  0xda   : > { %1635 = vmatpush.bf16.msrb.mxu1 %v3391_v23 }
  0xdc   : > { %v576_v24 = vpop.f32.mrf.mxu0 }
  0xdd   : > { %v577_v25 = vadd.f32 %v4198_v60, %v576_v24 }
  0xdf   : > { %v646_v27 = vmax.f32 %v577_v25, 0.0  ;;  %v3403_v25 = vor.u32 %v3729_v19, %v3402_v12  ;;  %v3699_v12 = vld [vmem:[#allocation5 + $0x24] sm:$0xf]  ;;  %v3292_v19 = vld [vmem:[#allocation5 + $0x30] sm:$0xf0] }
  0xe1   : > { %v674_v28 = vpack.c.bf16 %v646_v27, %v645_v26  ;;  %1553 = vmatpush.bf16.msrb.mxu0 %v3403_v25  ;;  %v3731_v25 = vld [vmem:[#allocation5 + $0x124] sm:$0xf] }
  0xe3   : > { %812 = vmatmul.bf16.gmra.mxu1 %v674_v28  ;;  %901 = vmatmul.bf16.gmra.mxu2 %v674_v28 }
  0xe4   : > { %v579_v30 = vpop.f32.mrf.mxu0 }
  0xe5   : > { %v580_v32 = vadd.f32 %v4198_v60, %v579_v30 }
  0xe7   : > { %3204 = vmatmul.msk.bf16.gmra.mxu0 %vm501_vm0, %v3673_v29  ;;  %v647_v35 = vmax.f32 %v580_v32, 0.0 }
  0xec   : > { %v581_v33 = vpop.f32.mrf.mxu0 }
  0xed   : > { %v582_v34 = vadd.f32 %v4198_v60, %v581_v33 }
  0xef   : > { %v648_v36 = vmax.f32 %v582_v34, 0.0  ;;  %v3751_v34 = vld [vmem:[#allocation5 + $0x1c4] sm:$0xf] }
  0xf1   : > { %v675_v37 = vpack.c.bf16 %v648_v36, %v647_v35  ;;  %v3500_v35 = vld [vmem:[#allocation5 + $0x1d0] sm:$0xf0] }
  0xf3   : > { %817 = vmatmul.bf16.gmra.mxu1 %v675_v37  ;;  %906 = vmatmul.bf16.gmra.mxu2 %v675_v37  ;;  %v3503_v37 = vor.u32 %v3751_v34, %v3500_v35  ;;  %v3276_v34 = vld [vmem:[#allocation5 + $0x10] sm:$0xf0]  ;;  %v3727_v35 = vld [vmem:[#allocation5 + $0x104] sm:$0xf] }
  0xf4   : > { %v584_v38 = vpop.f32.mrf.mxu0 }
  0xf5   : > { %v585_v39 = vadd.f32 %v4198_v60, %v584_v38  ;;  %v3719_v38 = vld [vmem:[#allocation5 + $0xc4] sm:$0xf]  ;;  %1725 = vmatpush.bf16.msrb.mxu2 %v3503_v37 }
  0xf7   : > { %v649_v42 = vmax.f32 %v585_v39, 0.0  ;;  %v3372_v39 = vld [vmem:[#allocation5 + $0xd0] sm:$0xf0] }
  0xf9   : > { %1726 = vmatpush.bf16.msrb.mxu2 %v3487_v51 }
  0xfc   : > { %v586_v40 = vpop.f32.mrf.mxu0 }
  0xfd   : > { %v587_v41 = vadd.f32 %v4198_v60, %v586_v40 }
  0xff   : > { %v650_v43 = vmax.f32 %v587_v41, 0.0  ;;  %v3375_v41 = vor.u32 %v3719_v38, %v3372_v39  ;;  %v3404_v38 = vld [vmem:[#allocation5 + $0x110] sm:$0xf0] }
 0x101   : > { %v676_v44 = vpack.c.bf16 %v650_v43, %v649_v42  ;;  %v4246_v42 = vld [vmem:[%s5508_s4] sm:$0x3]  ;;  %1636 = vmatpush.bf16.msrb.mxu1 %v3375_v41 }
 0x103   : > { %822 = vmatmul.bf16.gmra.mxu1 %v676_v44  ;;  %911 = vmatmul.bf16.gmra.mxu2 %v676_v44  ;;  %v4251_v44 = vperm.slane %v4246_v42, 1 }
 0x104   : > { %v589_v47 = vpop.f32.mrf.mxu0 }
 0x105   : > { %v590_v52 = vadd.f32 %v4198_v60, %v589_v47  ;;  %v3359_v47 = vor.u32 %v3715_v45, %v3356_v46  ;;  %v3407_v45 = vor.u32 %v3727_v35, %v3404_v38 }
 0x107   : > { %v651_v58 = vmax.f32 %v590_v52, 0.0  ;;  %1637 = vmatpush.bf16.msrb.mxu1 %v3359_v47 }
 0x10c   : > { %v591_v55 = vpop.f32.mrf.mxu0 }
 0x10d   : > { %v592_v57 = vadd.f32 %v4198_v60, %v591_v55  ;;  %v3711_v55 = vld [vmem:[#allocation5 + $0x84] sm:$0xf] }
 0x10f   : > { %v652_v59 = vmax.f32 %v592_v57, 0.0  ;;  %v3743_v57 = vld [vmem:[#allocation5 + $0x184] sm:$0xf] }
 0x110   : > { %v3471_v1 = vor.u32 %v3743_v57, %v3468_v61 }
 0x111   : > { %v677_v0 = vpack.c.bf16 %v652_v59, %v651_v58  ;;  %v3343_v59 = vor.u32 %v3711_v55, %v3340_v56 }
 0x112   : > { %1727 = vmatpush.bf16.msrb.mxu2 %v3471_v1 }
 0x113   : > { %827 = vmatmul.bf16.gmra.mxu1 %v677_v0  ;;  %916 = vmatmul.bf16.gmra.mxu2 %v677_v0 }
 0x114   : > { %v594_v3 = vpop.f32.mrf.mxu0  ;;  %1638 = vmatpush.bf16.msrb.mxu1 %v3343_v59 }
 0x115   : > { %v595_v8 = vadd.f32 %v4198_v60, %v594_v3 }
 0x116   : > { %1728 = vmatpush.bf16.msrb.mxu2 %v3455_v13 }
 0x117   : > { %v653_v18 = vmax.f32 %v595_v8, 0.0  ;;  %v3327_v8 = vor.u32 %v3707_v6, %v3324_v7  ;;  %v624_v6 = vpop.f32.mrf.mxu3 }
 0x119   : > { %1639 = vmatpush.bf16.msrb.mxu1 %v3327_v8  ;;  %v4285_v8 = vperm.slane %v4246_v42, 0 }
 0x11a   : > { %1729 = vmatpush.bf16.msrb.mxu2 %v3439_v22 }
 0x11c   : > { %v596_v11 = vpop.f32.mrf.mxu0 }
 0x11d   : > { %v597_v14 = vadd.f32 %v4198_v60, %v596_v11 }
 0x11f   : > { %v654_v20 = vmax.f32 %v597_v14, 0.0  ;;  %v626_v21 = vpop.f32.mrf.mxu3 }
 0x121   : > { %v678_v24 = vpack.c.bf16 %v654_v20, %v653_v18  ;;  %v3311_v20 = vor.u32 %v3703_v15, %v3308_v16 }
 0x123   : > { %832 = vmatmul.bf16.gmra.mxu1 %v678_v24  ;;  %921 = vmatmul.bf16.gmra.mxu2 %v678_v24  ;;  %v3295_v24 = vor.u32 %v3699_v12, %v3292_v19 }
 0x124   : > { %v599_v26 = vpop.f32.mrf.mxu0  ;;  %1640 = vmatpush.bf16.msrb.mxu1 %v3311_v20 }
 0x125   : > { %v600_v27 = vadd.f32 %v4198_v60, %v599_v26  ;;  %v3420_v26 = vld [vmem:[#allocation5 + $0x130] sm:$0xf0] }
 0x127   : > { %v655_v30 = vmax.f32 %v600_v27, 0.0 }
 0x128   : > { %1641 = vmatpush.bf16.msrb.mxu1 %v3295_v24 }
 0x12c   : > { %v601_v28 = vpop.f32.mrf.mxu0 }
 0x12d   : > { %v602_v29 = vadd.f32 %v4198_v60, %v601_v28  ;;  %v3423_v28 = vor.u32 %v3731_v25, %v3420_v26 }
 0x12f   : > { %v656_v31 = vmax.f32 %v602_v29, 0.0  ;;  %1730 = vmatpush.bf16.msrb.mxu2 %v3423_v28 }
 0x130   : > { %v4241_v32 = vpop.f32.mrf.mxu1 }
 0x131   : > { %v679_v33 = vpack.c.bf16 %v656_v31, %v655_v30  ;;  %v799_v13 = vadd.f32 %v4241_v32, %v4285_v8 }
 0x133   : > { %837 = vmatmul.bf16.gmra.mxu1 %v679_v33  ;;  %926 = vmatmul.bf16.gmra.mxu2 %v679_v33  ;;  %v3695_v33 = vld [vmem:[#allocation5 + $0x4] sm:$0xf]  ;;  %v967_v42 = vmax.f32 %v799_v13, 0.0 }
 0x134   : > { %v604_v36 = vpop.f32.mrf.mxu0  ;;  %v3279_v37 = vor.u32 %v3695_v33, %v3276_v34  ;;  %1731 = vmatpush.bf16.msrb.mxu2 %v3407_v45  ;;  %v625_v33 = vadd.f32 %v4198_v60, %v624_v6  ;;  %v627_v34 = vadd.f32 %v4198_v60, %v626_v21 }
 0x135   : > { %v605_v50 = vadd.f32 %v4198_v60, %v604_v36 }
 0x136   : > { %v887_v40 = vpop.f32.mrf.mxu2  ;;  %1642 = vmatpush.bf16.msrb.mxu1 %v3279_v37  ;;  %v665_v37 = vmax.f32 %v625_v33, 0.0  ;;  %v666_v38 = vmax.f32 %v627_v34, 0.0  ;;  %v3370_v33 = vld [vmem:[#allocation5 + $0xc0] sm:$0xf]  ;;  %v3721_v34 = vld [vmem:[#allocation5 + $0xcc] sm:$0xf0] }
 0x137   : > { %v888_v53 = vadd.f32 %v887_v40, %v4251_v44  ;;  %v657_v62 = vmax.f32 %v605_v50, 0.0 }
 0x138   : > { %v4248_v43 = vpop.f32.mrf.mxu1 }
 0x139   : > { %v968_v3 = vmax.f32 %v888_v53, 0.0  ;;  %v801_v10 = vadd.f32 %v4248_v43, %v4285_v8 }
 0x13b   : > { %v969_v16 = vmax.f32 %v801_v10, 0.0 }
 0x13c   : > { %v606_v52 = vpop.f32.mrf.mxu0 }
 0x13d   : > { %v607_v54 = vadd.f32 %v4198_v60, %v606_v52  ;;  %v4299_v43 = vpack.c.bf16 %v969_v16, %v967_v42 }
 0x13e   : > { %v889_v58 = vpop.f32.mrf.mxu2 }
 0x13f   : > { %v658_v63 = vmax.f32 %v607_v54, 0.0  ;;  %v890_v0 = vadd.f32 %v889_v58, %v4251_v44 }
 0x140   : > { %v4257_v2 = vpop.f32.mrf.mxu1 }
 0x141   : > { %v970_v4 = vmax.f32 %v890_v0, 0.0  ;;  %v680_v5 = vpack.c.bf16 %v658_v63, %v657_v62  ;;  %v804_v35 = vadd.f32 %v4257_v2, %v4285_v8 }
 0x143   : > { %v4259_v11 = vpack.c.bf16 %v970_v4, %v968_v3  ;;  %842 = vmatmul.bf16.gmra.mxu1 %v680_v5  ;;  %931 = vmatmul.bf16.gmra.mxu2 %v680_v5 }
 0x144   : > { %v609_v14 = vpop.f32.mrf.mxu0 }
 0x145   : > { %1554 = vmatmul.bf16.vlgmr.msrb.gmra.mxu0 %v4259_v11  ;;  %v610_v27 = vadd.f32 %v4198_v60, %v609_v14 }
 0x146   : > { %v892_v18 = vpop.f32.mrf.mxu2 }
 0x147   : > { %v893_v30 = vadd.f32 %v892_v18, %v4251_v44  ;;  %v659_v39 = vmax.f32 %v610_v27, 0.0 }
 0x148   : > { %v4262_v23 = vpop.f32.mrf.mxu1 }
 0x149   : > { %v972_v47 = vmax.f32 %v893_v30, 0.0  ;;  %v629_v30 = vpop.f32.mrf.mxu3 }
 0x14c   : > { %v611_v29 = vpop.f32.mrf.mxu0 }
 0x14d   : > { %v612_v31 = vadd.f32 %v4198_v60, %v611_v29 }
 0x14e   : > { %v894_v36 = vpop.f32.mrf.mxu2 }
 0x14f   : > { %v660_v40 = vmax.f32 %v612_v31, 0.0  ;;  %v895_v41 = vadd.f32 %v894_v36, %v4251_v44  ;;  %v806_v31 = vadd.f32 %v4262_v23, %v4285_v8 }
 0x150   : > { %v4268_v46 = vpop.f32.mrf.mxu1 }
 0x151   : > { %v974_v48 = vmax.f32 %v895_v41, 0.0  ;;  %v681_v49 = vpack.c.bf16 %v660_v40, %v659_v39  ;;  %v973_v36 = vmax.f32 %v806_v31, 0.0  ;;  %v971_v41 = vmax.f32 %v804_v35, 0.0 }
 0x153   : > { %v4270_v50 = vpack.c.bf16 %v974_v48, %v972_v47  ;;  %847 = vmatmul.bf16.gmra.mxu1 %v681_v49  ;;  %936 = vmatmul.bf16.gmra.mxu2 %v681_v49  ;;  %v4321_v48 = vpack.c.bf16 %v973_v36, %v971_v41  ;;  %v3371_v36 = vor.u32 %v3721_v34, %v3370_v33 }
 0x154   : > { %v614_v51 = vpop.f32.mrf.mxu0 }
 0x155   : > { %1559 = vmatmul.bf16.gmra.mxu0 %v4270_v50  ;;  %v615_v54 = vadd.f32 %v4198_v60, %v614_v51  ;;  %v4323_v51 = vpack.c.bf16 %v666_v38, %v665_v37 }
 0x156   : > { %v897_v52 = vpop.f32.mrf.mxu2 }
 0x157   : > { %v898_v56 = vadd.f32 %v897_v52, %v4251_v44  ;;  %v661_v59 = vmax.f32 %v615_v54, 0.0  ;;  %v631_v52 = vpop.f32.mrf.mxu3 }
 0x158   : > { %v4273_v53 = vpop.f32.mrf.mxu1 }
 0x159   : > { %v976_v0 = vmax.f32 %v898_v56, 0.0  ;;  %v811_v56 = vadd.f32 %v4273_v53, %v4285_v8 }
 0x15c   : > { %v616_v55 = vpop.f32.mrf.mxu0 }
 0x15d   : > { %v617_v57 = vadd.f32 %v4198_v60, %v616_v55 }
 0x15e   : > { %v899_v58 = vpop.f32.mrf.mxu2 }
 0x15f   : > { %v662_v61 = vmax.f32 %v617_v57, 0.0  ;;  %v900_v62 = vadd.f32 %v899_v58, %v4251_v44  ;;  %v630_v57 = vadd.f32 %v4198_v60, %v629_v30  ;;  %v632_v58 = vadd.f32 %v4198_v60, %v631_v52 }
 0x160   : > { %v4279_v63 = vpop.f32.mrf.mxu1 }
 0x161   : > { %v978_v1 = vmax.f32 %v900_v62, 0.0  ;;  %v682_v3 = vpack.c.bf16 %v662_v61, %v661_v59  ;;  %v809_v59 = vadd.f32 %v4268_v46, %v4285_v8  ;;  %v634_v61 = vpop.f32.mrf.mxu3  ;;  %v977_v62 = vmax.f32 %v811_v56, 0.0  ;;  %v3386_v46 = vld [vmem:[#allocation5 + $0xe0] sm:$0xf] }
 0x163   : > { %v4281_v4 = vpack.c.bf16 %v978_v1, %v976_v0  ;;  %852 = vmatmul.bf16.gmra.mxu1 %v682_v3  ;;  %941 = vmatmul.bf16.gmra.mxu2 %v682_v3  ;;  %v667_v0 = vmax.f32 %v630_v57, 0.0  ;;  %v668_v1 = vmax.f32 %v632_v58, 0.0  ;;  %v975_v6 = vmax.f32 %v809_v59, 0.0 }
 0x164   : > { %v619_v5 = vpop.f32.mrf.mxu0 }
 0x165   : > { %1564 = vmatmul.bf16.gmra.mxu0 %v4281_v4  ;;  %v620_v14 = vadd.f32 %v4198_v60, %v619_v5  ;;  %v4343_v53 = vpack.c.bf16 %v977_v62, %v975_v6  ;;  %v3713_v62 = vld [vmem:[#allocation5 + $0x8c] sm:$0xf0] }
 0x166   : > { %v902_v7 = vpop.f32.mrf.mxu2 }
 0x167   : > { %v903_v17 = vadd.f32 %v902_v7, %v4251_v44  ;;  %v663_v22 = vmax.f32 %v620_v14, 0.0 }
 0x168   : > { %v4287_v9 = vpop.f32.mrf.mxu1 }
 0x169   : > { %v980_v32 = vmax.f32 %v903_v17, 0.0  ;;  %v3725_v17 = vld [vmem:[#allocation5 + $0xec] sm:$0xf0]  ;;  %v816_v42 = vadd.f32 %v4287_v9, %v4285_v8 }
 0x16c   : > { %v621_v15 = vpop.f32.mrf.mxu0 }
 0x16d   : > { %v622_v18 = vadd.f32 %v4198_v60, %v621_v15  ;;  %v4345_v15 = vpack.c.bf16 %v668_v1, %v667_v0 }
 0x16e   : > { %v904_v20 = vpop.f32.mrf.mxu2 }
 0x16f   : > { %v664_v12 = vmax.f32 %v622_v18, 0.0  ;;  %v905_v19 = vadd.f32 %v904_v20, %v4251_v44  ;;  %v3387_v18 = vor.u32 %v3725_v17, %v3386_v46  ;;  %v636_v20 = vpop.f32.mrf.mxu3  ;;  %v3709_v46 = vld [vmem:[#allocation5 + $0x6c] sm:$0xf0] }
 0x170   : > { %v4297_v24 = vpop.f32.mrf.mxu1 }
 0x171   : > { %v982_v25 = vmax.f32 %v905_v19, 0.0  ;;  %v4301_v26 = vpack.c.bf16 %v664_v12, %v663_v22  ;;  %v635_v12 = vadd.f32 %v4198_v60, %v634_v61  ;;  %v637_v19 = vadd.f32 %v4198_v60, %v636_v20  ;;  %v3338_v61 = vld [vmem:[#allocation5 + $0x80] sm:$0xf] }
 0x172   : > { %v819_v57 = vadd.f32 %v4297_v24, %v4285_v8  ;;  %v3339_v1 = vor.u32 %v3713_v62, %v3338_v61  ;;  %v3322_v24 = vld [vmem:[#allocation5 + $0x60] sm:$0xf] }
 0x173   : > { %v4303_v27 = vpack.c.bf16 %v982_v25, %v980_v32  ;;  %857 = vmatmul.bf16.vlgmr.msrb.gmra.mxu3 %v4301_v26  ;;  %1643 = vmatmul.bf16.vlgmr.msrb.gmra.mxu1 %v4299_v43  ;;  %v814_v32 = vadd.f32 %v4279_v63, %v4285_v8  ;;  %v981_v25 = vmax.f32 %v816_v42, 0.0  ;;  %v670_v30 = vmax.f32 %v637_v19, 0.0  ;;  %v3306_v19 = vld [vmem:[#allocation5 + $0x40] sm:$0xf] }
 0x174   : > { %1732 = vmatmul.bf16.vlgmr.msrb.gmra.mxu2 %v4259_v11  ;;  %1457 = vmatpush.bf16.msrb.mxu3 %v3387_v18  ;;  %v3323_v17 = vor.u32 %v3709_v46, %v3322_v24 }
 0x175   : > { %1569 = vmatmul.bf16.gmra.mxu0 %v4303_v27  ;;  %v979_v37 = vmax.f32 %v814_v32, 0.0  ;;  %v3705_v32 = vld [vmem:[#allocation5 + $0x4c] sm:$0xf0] }
 0x176   : > { %v907_v28 = vpop.f32.mrf.mxu2 }
 0x177   : > { %v908_v39 = vadd.f32 %v907_v28, %v4251_v44  ;;  %v669_v28 = vmax.f32 %v635_v12, 0.0 }
 0x178   : > { %v4309_v29 = vpop.f32.mrf.mxu1  ;;  %1458 = vmatpush.bf16.msrb.mxu3 %v3371_v36 }
 0x179   : > { %v984_v23 = vmax.f32 %v908_v39, 0.0  ;;  %v4365_v39 = vpack.c.bf16 %v981_v25, %v979_v37  ;;  %v4367_v63 = vpack.c.bf16 %v670_v30, %v669_v28  ;;  %v821_v56 = vadd.f32 %v4309_v29, %v4285_v8  ;;  %v3701_v37 = vld [vmem:[#allocation5 + $0x2c] sm:$0xf0] }
 0x17a   : > { %v3307_v28 = vor.u32 %v3705_v32, %v3306_v19  ;;  %v3724_v19 = vld [vmem:[#allocation5 + $0xec] sm:$0xf] }
 0x17b   : > { %v985_v58 = vmax.f32 %v821_v56, 0.0  ;;  %v3697_v56 = vld [vmem:[#allocation5 + $0xc] sm:$0xf0] }
 0x17e   : > { %v909_v40 = vpop.f32.mrf.mxu2 }
 0x17f   : > { %v910_v45 = vadd.f32 %v909_v40, %v4251_v44 }
 0x180   : > { %v4319_v47 = vpop.f32.mrf.mxu1 }
 0x181   : > { %v986_v49 = vmax.f32 %v910_v45, 0.0  ;;  %v3354_v45 = vld [vmem:[#allocation5 + $0xa0] sm:$0xf]  ;;  %v824_v42 = vadd.f32 %v4319_v47, %v4285_v8 }
 0x182   : > { %v3290_v47 = vld [vmem:[#allocation5 + $0x20] sm:$0xf] }
 0x183   : > { %v4325_v54 = vpack.c.bf16 %v986_v49, %v984_v23  ;;  %862 = vmatmul.bf16.gmra.mxu3 %v4323_v51  ;;  %1648 = vmatmul.bf16.gmra.mxu1 %v4321_v48  ;;  %v3717_v23 = vld [vmem:[#allocation5 + $0xac] sm:$0xf0]  ;;  %v987_v30 = vmax.f32 %v824_v42, 0.0 }
 0x184   : > { %1737 = vmatmul.bf16.gmra.mxu2 %v4270_v50  ;;  %v3355_v49 = vor.u32 %v3717_v23, %v3354_v45 }
 0x185   : > { %1574 = vmatmul.bf16.gmra.mxu0 %v4325_v54 }
 0x186   : > { %v912_v2 = vpop.f32.mrf.mxu2  ;;  %1459 = vmatpush.bf16.msrb.mxu3 %v3355_v49 }
 0x187   : > { %v913_v3 = vadd.f32 %v912_v2, %v4251_v44 }
 0x188   : > { %v4331_v55 = vpop.f32.mrf.mxu1 }
 0x189   : > { %v988_v13 = vmax.f32 %v913_v3, 0.0  ;;  %v983_v3 = vmax.f32 %v819_v57, 0.0 }
 0x18a   : > { %1460 = vmatpush.bf16.msrb.mxu3 %v3339_v1 }
 0x18e   : > { %v914_v5 = vpop.f32.mrf.mxu2  ;;  %1461 = vmatpush.bf16.msrb.mxu3 %v3323_v17 }
 0x18f   : > { %v915_v7 = vadd.f32 %v914_v5, %v4251_v44 }
 0x190   : > { %v4341_v10 = vpop.f32.mrf.mxu1 }
 0x191   : > { %v990_v14 = vmax.f32 %v915_v7, 0.0  ;;  %v4385_v7 = vpack.c.bf16 %v985_v58, %v983_v3  ;;  %v829_v23 = vadd.f32 %v4341_v10, %v4285_v8 }
 0x192   : > { %1462 = vmatpush.bf16.msrb.mxu3 %v3307_v28 }
 0x193   : > { %v4347_v16 = vpack.c.bf16 %v990_v14, %v988_v13  ;;  %867 = vmatmul.bf16.gmra.mxu3 %v4345_v15  ;;  %1653 = vmatmul.bf16.gmra.mxu1 %v4343_v53 }
 0x194   : > { %1742 = vmatmul.bf16.gmra.mxu2 %v4281_v4 }
 0x195   : > { %1579 = vmatmul.bf16.gmra.mxu0 %v4347_v16 }
 0x196   : > { %v917_v21 = vpop.f32.mrf.mxu2 }
 0x197   : > { %v918_v31 = vadd.f32 %v917_v21, %v4251_v44  ;;  %v826_v21 = vadd.f32 %v4331_v55, %v4285_v8 }
 0x198   : > { %v4355_v22 = vpop.f32.mrf.mxu1 }
 0x199   : > { %v992_v60 = vmax.f32 %v918_v31, 0.0  ;;  %v831_v45 = vadd.f32 %v4355_v22, %v4285_v8 }
 0x19e   : > { %v919_v35 = vpop.f32.mrf.mxu2 }
 0x19f   : > { %v920_v9 = vadd.f32 %v919_v35, %v4251_v44 }
 0x1a0   : > { %v4363_v38 = vpop.f32.mrf.mxu1 }
 0x1a1   : > { %v994_v40 = vmax.f32 %v920_v9, 0.0  ;;  %v3291_v9 = vor.u32 %v3701_v37, %v3290_v47  ;;  %v834_v42 = vadd.f32 %v4363_v38, %v4285_v8 }
 0x1a3   : > { %v4369_v41 = vpack.c.bf16 %v994_v40, %v992_v60  ;;  %872 = vmatmul.bf16.gmra.mxu3 %v4367_v63  ;;  %1658 = vmatmul.bf16.gmra.mxu1 %v4365_v39 }
 0x1a4   : > { %1747 = vmatmul.bf16.gmra.mxu2 %v4303_v27  ;;  %1463 = vmatpush.bf16.msrb.mxu3 %v3291_v9 }
 0x1a5   : > { %1584 = vmatmul.bf16.gmra.mxu0 %v4369_v41 }
 0x1a6   : > { %v922_v52 = vpop.f32.mrf.mxu2 }
 0x1a7   : > { %v923_v59 = vadd.f32 %v922_v52, %v4251_v44  ;;  %v3274_v52 = vld [vmem:[#allocation5] sm:$0xf] }
 0x1a8   : > { %v4375_v2 = vpop.f32.mrf.mxu1  ;;  %v3275_v58 = vor.u32 %v3697_v56, %v3274_v52 }
 0x1a9   : > { %v996_v13 = vmax.f32 %v923_v59, 0.0  ;;  %v991_v59 = vmax.f32 %v829_v23, 0.0  ;;  %v836_v17 = vadd.f32 %v4375_v2, %v4285_v8  ;;  %v995_v2 = vmax.f32 %v834_v42, 0.0 }
 0x1aa   : > { %1464 = vmatpush.bf16.msrb.mxu3 %v3275_v58 }
 0x1ab   : > { %v997_v28 = vmax.f32 %v836_v17, 0.0  ;;  %v3378_v17 = vld [vmem:[#allocation5 + $0xc8] sm:$0xf] }
 0x1ad   : > { %v4443_v38 = vpack.c.bf16 %v997_v28, %v995_v2  ;;  %v3508_v28 = vld [vmem:[#allocation5 + $0x1d8] sm:$0xf0]  ;;  %v3754_v2 = vld [vmem:[#allocation5 + $0x1d4] sm:$0xf0] }
 0x1ae   : > { %v924_v0 = vpop.f32.mrf.mxu2 }
 0x1af   : > { %v925_v5 = vadd.f32 %v924_v0, %v4251_v44 }
 0x1b0   : > { %v4383_v6 = vpop.f32.mrf.mxu1 }
 0x1b1   : > { %v998_v29 = vmax.f32 %v925_v5, 0.0  ;;  %v3394_v5 = vld [vmem:[#allocation5 + $0xe8] sm:$0xf]  ;;  %v839_v56 = vadd.f32 %v4383_v6, %v4285_v8 }
 0x1b3   : > { %v4387_v14 = vpack.c.bf16 %v998_v29, %v996_v13  ;;  %946 = vmatmul.bf16.vlgmr.msra.gmra.mxu3 %v4301_v26  ;;  %1663 = vmatmul.bf16.gmra.mxu1 %v4385_v7  ;;  %v989_v26 = vmax.f32 %v826_v21, 0.0  ;;  %v3726_v13 = vld [vmem:[#allocation5 + $0xf4] sm:$0xf0]  ;;  %v3522_v21 = vld [vmem:[#allocation5 + $0x1e8] sm:$0xf] }
 0x1b4   : > { %1752 = vmatmul.bf16.gmra.mxu2 %v4325_v54  ;;  %v3395_v29 = vor.u32 %v3726_v13, %v3394_v5 }
 0x1b5   : > { %1589 = vmatmul.bf16.gmra.mxu0 %v4387_v14  ;;  %v4403_v34 = vpack.c.bf16 %v989_v26, %v987_v30 }
 0x1b6   : > { %v927_v18 = vpop.f32.mrf.mxu2  ;;  %1813 = vmatpush.bf16.msra.mxu3 %v3395_v29 }
 0x1b7   : > { %v928_v12 = vadd.f32 %v927_v18, %v4251_v44  ;;  %v3756_v18 = vld [vmem:[#allocation5 + $0x1ec] sm:$0xf] }
 0x1b8   : > { %v4393_v20 = vpop.f32.mrf.mxu1 }
 0x1b9   : > { %v1000_v35 = vmax.f32 %v928_v12, 0.0  ;;  %v3758_v12 = vld [vmem:[#allocation5 + $0x1f4] sm:$0xf0]  ;;  %v841_v52 = vadd.f32 %v4393_v20, %v4285_v8 }
 0x1ba   : > { %v3523_v32 = vor.u32 %v3758_v12, %v3522_v21 }
 0x1bc   : > { %1902 = vmatpush.bf16.msra.mxu0 %v3523_v32 }
 0x1be   : > { %v929_v25 = vpop.f32.mrf.mxu2 }
 0x1bf   : > { %v930_v31 = vadd.f32 %v929_v25, %v4251_v44  ;;  %v3396_v25 = vld [vmem:[#allocation5 + $0xf8] sm:$0xf0] }
 0x1c0   : > { %v4401_v33 = vpop.f32.mrf.mxu1 }
 0x1c1   : > { %v1002_v55 = vmax.f32 %v930_v31, 0.0  ;;  %v3399_v31 = vor.u32 %v3724_v19, %v3396_v25  ;;  %v3752_v25 = vld [vmem:[#allocation5 + $0x1cc] sm:$0xf] }
 0x1c2   : > { %v4427_v10 = vpop.f32.mrf.mxu0 }
 0x1c3   : > { %v4405_v36 = vpack.c.bf16 %v1002_v55, %v1000_v35  ;;  %951 = vmatmul.bf16.gmra.mxu3 %v4323_v51  ;;  %1668 = vmatmul.bf16.gmra.mxu1 %v4403_v34  ;;  %v993_v51 = vmax.f32 %v831_v45, 0.0 }
 0x1c4   : > { %1757 = vmatmul.bf16.gmra.mxu2 %v4347_v16  ;;  %1991 = vmatpush.bf16.msra.mxu1 %v3399_v31  ;;  %v3511_v31 = vor.u32 %v3752_v25, %v3508_v28 }
 0x1c5   : > { %5531 = vst [vmem:[#allocation11_spill] sm:$0xff] %v4405_v36  ;;  %1594 = vmatmul.bf16.gmra.mxu0 %v4405_v36  ;;  %v4421_v0 = vpack.c.bf16 %v993_v51, %v991_v59  ;;  %v999_v59 = vmax.f32 %v839_v56, 0.0 }
 0x1c6   : > { %v932_v60 = vpop.f32.mrf.mxu2 }
 0x1c7   : > { %v933_v49 = vadd.f32 %v932_v60, %v4251_v44 }
 0x1c8   : > { %v4411_v40 = vpop.f32.mrf.mxu1 }
 0x1c9   : > { %v1004_v1 = vmax.f32 %v933_v49, 0.0  ;;  %v846_v32 = vadd.f32 %v4411_v40, %v4285_v8 }
 0x1ca   : > { %v4438_v35 = vpop.f32.mrf.mxu0 }
 0x1ce   : > { %v934_v57 = vpop.f32.mrf.mxu2 }
 0x1cf   : > { %v935_v61 = vadd.f32 %v934_v57, %v4251_v44  ;;  %v1001_v57 = vmax.f32 %v841_v52, 0.0  ;;  %v1005_v52 = vmax.f32 %v846_v32, 0.0 }
 0x1d0   : > { %v4419_v62 = vpop.f32.mrf.mxu1 }
 0x1d1   : > { %v1006_v22 = vmax.f32 %v935_v61, 0.0  ;;  %v4466_v5 = vpack.c.bf16 %v1001_v57, %v999_v59  ;;  %v849_v32 = vadd.f32 %v4419_v62, %v4285_v8  ;;  %v3362_v62 = vld [vmem:[#allocation5 + $0xa8] sm:$0xf] }
 0x1d2   : > { %v4451_v51 = vpop.f32.mrf.mxu0 }
 0x1d3   : > { %v4423_v3 = vpack.c.bf16 %v1006_v22, %v1004_v1  ;;  %956 = vmatmul.bf16.gmra.mxu3 %v4345_v15  ;;  %1673 = vmatmul.bf16.gmra.mxu1 %v4421_v0  ;;  %v3524_v15 = vld [vmem:[#allocation5 + $0x1f8] sm:$0xf0]  ;;  %v4464_v1 = vld [vmem:[%s5510_s6] sm:$0xf] }
 0x1d4   : > { %1762 = vmatmul.bf16.gmra.mxu2 %v4369_v41  ;;  %v3527_v26 = vor.u32 %v3756_v18, %v3524_v15  ;;  %v4471_v6 = vperm.slane %v4464_v1, 1  ;;  %v3722_v18 = vld [vmem:[#allocation5 + $0xd4] sm:$0xf0] }
 0x1d5   : > { %5532 = vst [vmem:[#allocation12_spill] sm:$0xff] %v4423_v3  ;;  %1599 = vmatmul.bf16.gmra.mxu0 %v4423_v3  ;;  %v3379_v15 = vor.u32 %v3722_v18, %v3378_v17 }
 0x1d6   : > { %v937_v24 = vpop.f32.mrf.mxu2  ;;  %2080 = vmatpush.bf16.msra.mxu2 %v3527_v26 }
 0x1d7   : > { %v938_v30 = vadd.f32 %v937_v24, %v4251_v44  ;;  %1814 = vmatpush.bf16.msra.mxu3 %v3379_v15 }
 0x1d8   : > { %v4431_v46 = vpop.f32.mrf.mxu1 }
 0x1d9   : > { %v1008_v9 = vmax.f32 %v938_v30, 0.0  ;;  %v844_v30 = vadd.f32 %v4401_v33, %v4285_v8 }
 0x1da   : > { %v4468_v29 = vpop.f32.mrf.mxu0  ;;  %2081 = vmatpush.bf16.msra.mxu2 %v3511_v31  ;;  %v1007_v31 = vmax.f32 %v849_v32, 0.0 }
 0x1db   : > { %v1003_v40 = vmax.f32 %v844_v30, 0.0 }
 0x1de   : > { %v939_v55 = vpop.f32.mrf.mxu2 }
 0x1df   : > { %v940_v47 = vadd.f32 %v939_v55, %v4251_v44  ;;  %v3506_v55 = vld [vmem:[#allocation5 + $0x1c8] sm:$0xf] }
 0x1e0   : > { %v4441_v37 = vpop.f32.mrf.mxu1 }
 0x1e1   : > { %v1010_v60 = vmax.f32 %v940_v47, 0.0  ;;  %v3720_v47 = vld [vmem:[#allocation5 + $0xcc] sm:$0xf] }
 0x1e3   : > { %v4445_v45 = vpack.c.bf16 %v1010_v60, %v1008_v9  ;;  %961 = vmatmul.bf16.gmra.mxu3 %v4367_v63  ;;  %1678 = vmatmul.bf16.gmra.mxu1 %v4443_v38  ;;  %v4486_v9 = vpop.f32.mrf.mxu0  ;;  %v3507_v60 = vor.u32 %v3754_v2, %v3506_v55 }
 0x1e4   : > { %1767 = vmatmul.bf16.gmra.mxu2 %v4387_v14 }
 0x1e5   : > { %5533 = vst [vmem:[#allocation13_spill] sm:$0xff] %v4445_v45  ;;  %1604 = vmatmul.bf16.gmra.mxu0 %v4445_v45 }
 0x1e6   : > { %v942_v23 = vpop.f32.mrf.mxu2  ;;  %1903 = vmatpush.bf16.msra.mxu0 %v3507_v60 }
 0x1e7   : > { %v943_v63 = vadd.f32 %v942_v23, %v4251_v44  ;;  %v3380_v23 = vld [vmem:[#allocation5 + $0xd8] sm:$0xf0] }
 0x1e8   : > { %v4453_v49 = vpop.f32.mrf.mxu1  ;;  %v3383_v56 = vor.u32 %v3720_v47, %v3380_v23 }
 0x1e9   : > { %v1012_v13 = vmax.f32 %v943_v63, 0.0 }
 0x1ea   : > { %1992 = vmatpush.bf16.msra.mxu1 %v3383_v56 }
 0x1eb   : > { %v4498_v17 = vpop.f32.mrf.mxu0 }
 0x1ee   : > { %v944_v58 = vpop.f32.mrf.mxu2 }
 0x1ef   : > { %v945_v61 = vadd.f32 %v944_v58, %v4251_v44 }
 0x1f0   : > { %v1644_v22 = vpop.f32.mrf.mxu1 }
 0x1f1   : > { %v1014_v20 = vmax.f32 %v945_v61, 0.0  ;;  %v1645_v21 = vadd.f32 %v1644_v22, %v4471_v6  ;;  %v4491_v61 = vpack.c.bf16 %v1005_v52, %v1003_v40 }
 0x1f3   : > { %v4473_v24 = vpack.c.bf16 %v1014_v20, %v1012_v13  ;;  %1465 = vmatmul.bf16.vlgmr.msrb.gmra.mxu3 %v4299_v43  ;;  %1683 = vmatmul.bf16.gmra.mxu1 %v4466_v5  ;;  %v4510_v2 = vpop.f32.mrf.mxu0 }
 0x1f4   : > { %1772 = vmatmul.bf16.gmra.mxu2 %v4405_v36  ;;  %v3412_v36 = vld [vmem:[#allocation5 + $0x118] sm:$0xf0] }
 0x1f5   : > { %5534 = vst [vmem:[#allocation14_spill] sm:$0xff] %v4473_v24  ;;  %1609 = vmatmul.bf16.gmra.mxu0 %v4473_v24 }
 0x1f6   : > { %v4480_v42 = vpop.f32.mrf.mxu3 }
 0x1f7   : > { %v1733_v26 = vpop.f32.mrf.mxu2 }
 0x1f8   : > { %v1734_v12 = vadd.f32 %v1733_v26, %v1645_v21  ;;  %v1646_v19 = vpop.f32.mrf.mxu1 }
 0x1f9   : > { %v1647_v57 = vadd.f32 %v1646_v19, %v4471_v6 }
 0x1fa   : > { %v2170_v22 = vmax.f32 %v1734_v12, 0.0  ;;  %v851_v12 = vadd.f32 %v4431_v46, %v4285_v8  ;;  %v3718_v46 = vld [vmem:[#allocation5 + $0xb4] sm:$0xf0] }
 0x1fc   : > { %v1009_v25 = vmax.f32 %v851_v12, 0.0  ;;  %v854_v12 = vadd.f32 %v4441_v37, %v4285_v8 }
 0x1fe   : > { %v4489_v63 = vpop.f32.mrf.mxu3  ;;  %v4512_v23 = vpack.c.bf16 %v1009_v25, %v1007_v31  ;;  %v3490_v25 = vld [vmem:[#allocation5 + $0x1a8] sm:$0xf]  ;;  %v3716_v31 = vld [vmem:[#allocation5 + $0xac] sm:$0xf] }
 0x1ff   : > { %v1735_v58 = vpop.f32.mrf.mxu2 }
 0x200   : > { %v1736_v33 = vadd.f32 %v1735_v58, %v1647_v57  ;;  %v1649_v59 = vpop.f32.mrf.mxu1  ;;  %v3363_v57 = vor.u32 %v3718_v46, %v3362_v62 }
 0x201   : > { %v1650_v18 = vadd.f32 %v1649_v59, %v4471_v6 }
 0x202   : > { %v2174_v13 = vmax.f32 %v1736_v33, 0.0  ;;  %1815 = vmatpush.bf16.msra.mxu3 %v3363_v57 }
 0x203   : > { %1470 = vmatmul.bf16.gmra.mxu3 %v4321_v48  ;;  %1688 = vmatmul.bf16.gmra.mxu1 %v4491_v61 }
 0x204   : > { %v4495_v20 = vpack.c.bf16 %v2174_v13, %v2170_v22  ;;  %1777 = vmatmul.bf16.gmra.mxu2 %v4423_v3 }
 0x206   : > { %5535 = vst [vmem:[#allocation15_spill] sm:$0xff] %v4495_v20  ;;  %v4501_v15 = vpop.f32.mrf.mxu3 }
 0x207   : > { %v1738_v21 = vpop.f32.mrf.mxu2 }
 0x208   : > { %v1739_v26 = vadd.f32 %v1738_v21, %v1650_v18  ;;  %v1651_v19 = vpop.f32.mrf.mxu1  ;;  %v856_v18 = vadd.f32 %v4453_v49, %v4285_v8  ;;  %v4524_v21 = vpop.f32.mrf.mxu0  ;;  %v1011_v49 = vmax.f32 %v854_v12, 0.0 }
 0x209   : > { %v1652_v28 = vadd.f32 %v1651_v19, %v4471_v6  ;;  %v3492_v19 = vld [vmem:[#allocation5 + $0x1b8] sm:$0xf0] }
 0x20a   : > { %v2178_v52 = vmax.f32 %v1739_v26, 0.0  ;;  %v3748_v26 = vld [vmem:[#allocation5 + $0x1ac] sm:$0xf] }
 0x20b   : > { %v3495_v32 = vor.u32 %v3748_v26, %v3492_v19 }
 0x20d   : > { %2082 = vmatpush.bf16.msra.mxu2 %v3495_v32 }
 0x20e   : > { %v4508_v30 = vpop.f32.mrf.mxu3 }
 0x20f   : > { %v1740_v55 = vpop.f32.mrf.mxu2 }
 0x210   : > { %v1741_v47 = vadd.f32 %v1740_v55, %v1652_v28  ;;  %v1654_v60 = vpop.f32.mrf.mxu1  ;;  %v3750_v28 = vld [vmem:[#allocation5 + $0x1b4] sm:$0xf0] }
 0x211   : > { %v1655_v58 = vadd.f32 %v1654_v60, %v4471_v6  ;;  %v3491_v55 = vor.u32 %v3750_v28, %v3490_v25  ;;  %v1013_v60 = vmax.f32 %v856_v18, 0.0  ;;  %v4535_v18 = vpop.f32.mrf.mxu0 }
 0x212   : > { %v2182_v56 = vmax.f32 %v1741_v47, 0.0  ;;  %v3364_v47 = vld [vmem:[#allocation5 + $0xb8] sm:$0xf0] }
 0x213   : > { %1475 = vmatmul.bf16.gmra.mxu3 %v4343_v53  ;;  %1693 = vmatmul.bf16.gmra.mxu1 %v4512_v23  ;;  %v4531_v37 = vpack.c.bf16 %v1013_v60, %v1011_v49 }
 0x214   : > { %1782 = vmatmul.bf16.gmra.mxu2 %v4445_v45  ;;  %v4517_v40 = vpack.c.bf16 %v2182_v56, %v2178_v52  ;;  %v3367_v52 = vor.u32 %v3716_v31, %v3364_v47  ;;  %1904 = vmatpush.bf16.msra.mxu0 %v3491_v55  ;;  %v859_v31 = vadd.f32 %v4480_v42, %v4285_v8  ;;  %v3346_v42 = vld [vmem:[#allocation5 + $0x88] sm:$0xf] }
 0x216   : > { %5536 = vst [vmem:[#allocation16_spill] sm:$0xff] %v4517_v40  ;;  %v4520_v33 = vpop.f32.mrf.mxu3  ;;  %1993 = vmatpush.bf16.msra.mxu1 %v3367_v52 }
 0x217   : > { %v1743_v59 = vpop.f32.mrf.mxu2 }
 0x218   : > { %v1744_v22 = vadd.f32 %v1743_v59, %v1655_v58  ;;  %v1656_v13 = vpop.f32.mrf.mxu1 }
 0x219   : > { %v1657_v56 = vadd.f32 %v1656_v13, %v4471_v6  ;;  %v4547_v47 = vpop.f32.mrf.mxu0 }
 0x21a   : > { %v2186_v59 = vmax.f32 %v1744_v22, 0.0  ;;  %v861_v22 = vadd.f32 %v4489_v63, %v4285_v8  ;;  %v3714_v63 = vld [vmem:[#allocation5 + $0x94] sm:$0xf0] }
 0x21c   : > { %v1017_v55 = vmax.f32 %v861_v22, 0.0 }
 0x21e   : > { %v4529_v62 = vpop.f32.mrf.mxu3 }
 0x21f   : > { %v1745_v46 = vpop.f32.mrf.mxu2 }
 0x220   : > { %v1746_v57 = vadd.f32 %v1745_v46, %v1657_v56  ;;  %v1659_v58 = vpop.f32.mrf.mxu1  ;;  %v1015_v56 = vmax.f32 %v859_v31, 0.0 }
 0x221   : > { %v1660_v19 = vadd.f32 %v1659_v58, %v4471_v6 }
 0x222   : > { %v2190_v26 = vmax.f32 %v1746_v57, 0.0  ;;  %v4552_v58 = vpack.c.bf16 %v1017_v55, %v1015_v56 }
 0x223   : > { %1480 = vmatmul.bf16.gmra.mxu3 %v4365_v39  ;;  %1698 = vmatmul.bf16.gmra.mxu1 %v4531_v37 }
 0x224   : > { %1787 = vmatmul.bf16.gmra.mxu2 %v4473_v24  ;;  %v4538_v13 = vpack.c.bf16 %v2190_v26, %v2186_v59 }
 0x226   : > { %5537 = vst [vmem:[#allocation17_spill] sm:$0xff] %v4538_v13  ;;  %v4541_v12 = vpop.f32.mrf.mxu3  ;;  %v864_v13 = vadd.f32 %v4501_v15, %v4285_v8 }
 0x227   : > { %v1748_v32 = vpop.f32.mrf.mxu2 }
 0x228   : > { %v1749_v25 = vadd.f32 %v1748_v32, %v1660_v19  ;;  %v1661_v28 = vpop.f32.mrf.mxu1  ;;  %v3347_v19 = vor.u32 %v3714_v63, %v3346_v42  ;;  %v3712_v63 = vld [vmem:[#allocation5 + $0x8c] sm:$0xf] }
 0x229   : > { %v1662_v60 = vadd.f32 %v1661_v28, %v4471_v6 }
 0x22a   : > { %v2194_v59 = vmax.f32 %v1749_v25, 0.0  ;;  %1816 = vmatpush.bf16.msra.mxu3 %v3347_v19  ;;  %v866_v25 = vadd.f32 %v4508_v30, %v4285_v8  ;;  %v1019_v30 = vmax.f32 %v864_v13, 0.0 }
 0x22c   : > { %v1021_v19 = vmax.f32 %v866_v25, 0.0 }
 0x22e   : > { %v4550_v52 = vpop.f32.mrf.mxu3 }
 0x22f   : > { %v1750_v49 = vpop.f32.mrf.mxu2 }
 0x230   : > { %v1751_v46 = vadd.f32 %v1750_v49, %v1662_v60  ;;  %v1664_v57 = vpop.f32.mrf.mxu1  ;;  %v4559_v60 = vpop.f32.mrf.mxu0  ;;  %v3744_v49 = vld [vmem:[#allocation5 + $0x18c] sm:$0xf] }
 0x231   : > { %v1665_v28 = vadd.f32 %v1664_v57, %v4471_v6 }
 0x232   : > { %v2198_v26 = vmax.f32 %v1751_v46, 0.0  ;;  %v3476_v46 = vld [vmem:[#allocation5 + $0x198] sm:$0xf0] }
 0x233   : > { %1485 = vmatmul.bf16.gmra.mxu3 %v4385_v7  ;;  %1703 = vmatmul.bf16.gmra.mxu1 %v4552_v58  ;;  %v3479_v42 = vor.u32 %v3744_v49, %v3476_v46  ;;  %v4568_v46 = vpack.c.bf16 %v1021_v19, %v1019_v30  ;;  %v871_v30 = vadd.f32 %v4529_v62, %v4285_v8 }
 0x234   : > { %v4556_v32 = vpack.c.bf16 %v2198_v26, %v2194_v59  ;;  %v3474_v59 = vld [vmem:[#allocation5 + $0x188] sm:$0xf]  ;;  %v3746_v26 = vld [vmem:[#allocation5 + $0x194] sm:$0xf0] }
 0x235   : > { %v3475_v57 = vor.u32 %v3746_v26, %v3474_v59  ;;  %2083 = vmatpush.bf16.msra.mxu2 %v3479_v42 }
 0x236   : > { %5538 = vst [vmem:[#allocation18_spill] sm:$0xff] %v4556_v32  ;;  %v947_v22 = vpop.f32.mrf.mxu3  ;;  %v3348_v32 = vld [vmem:[#allocation5 + $0x98] sm:$0xf0] }
 0x237   : > { %v1753_v31 = vpop.f32.mrf.mxu2  ;;  %v948_v40 = vadd.f32 %v947_v22, %v4251_v44  ;;  %1905 = vmatpush.bf16.msra.mxu0 %v3475_v57 }
 0x238   : > { %v1754_v55 = vadd.f32 %v1753_v31, %v1665_v28  ;;  %v1666_v56 = vpop.f32.mrf.mxu1  ;;  %v3351_v28 = vor.u32 %v3712_v63, %v3348_v32  ;;  %v4570_v25 = vpop.f32.mrf.mxu0  ;;  %v3708_v32 = vld [vmem:[#allocation5 + $0x6c] sm:$0xf]  ;;  %v3332_v63 = vld [vmem:[#allocation5 + $0x78] sm:$0xf0] }
 0x239   : > { %v1667_v31 = vadd.f32 %v1666_v56, %v4471_v6  ;;  %v1016_v59 = vmax.f32 %v948_v40, 0.0  ;;  %v3704_v40 = vld [vmem:[#allocation5 + $0x4c] sm:$0xf] }
 0x23a   : > { %1994 = vmatpush.bf16.msra.mxu1 %v3351_v28  ;;  %v2202_v22 = vmax.f32 %v1754_v55, 0.0  ;;  %v3316_v55 = vld [vmem:[#allocation5 + $0x58] sm:$0xf0] }
 0x23b   : > { %v3319_v19 = vor.u32 %v3704_v40, %v3316_v55  ;;  %v3284_v40 = vld [vmem:[#allocation5 + $0x18] sm:$0xf0] }
 0x23e   : > { %v949_v20 = vpop.f32.mrf.mxu3 }
 0x23f   : > { %v950_v24 = vadd.f32 %v949_v20, %v4251_v44  ;;  %v1755_v45 = vpop.f32.mrf.mxu2  ;;  %v3335_v20 = vor.u32 %v3708_v32, %v3332_v63 }
 0x240   : > { %v1756_v15 = vadd.f32 %v1755_v45, %v1667_v31  ;;  %v1669_v49 = vpop.f32.mrf.mxu1 }
 0x241   : > { %v1018_v26 = vmax.f32 %v950_v24, 0.0  ;;  %v1670_v45 = vadd.f32 %v1669_v49, %v4471_v6  ;;  %1995 = vmatpush.bf16.msra.mxu1 %v3335_v20  ;;  %v1025_v49 = vmax.f32 %v871_v30, 0.0 }
 0x242   : > { %v2206_v42 = vmax.f32 %v1756_v15, 0.0  ;;  %v3700_v15 = vld [vmem:[#allocation5 + $0x2c] sm:$0xf] }
 0x243   : > { %v4572_v56 = vpack.c.bf16 %v1018_v26, %v1016_v59  ;;  %1490 = vmatmul.bf16.gmra.mxu3 %v4403_v34  ;;  %1708 = vmatmul.bf16.gmra.mxu1 %v4568_v46  ;;  %v3300_v59 = vld [vmem:[#allocation5 + $0x38] sm:$0xf0]  ;;  %v869_v26 = vadd.f32 %v4520_v33, %v4285_v8 }
 0x244   : > { %v4576_v13 = vpack.c.bf16 %v2206_v42, %v2202_v22  ;;  %v3303_v22 = vor.u32 %v3700_v15, %v3300_v59  ;;  %v4585_v42 = vpop.f32.mrf.mxu0 }
 0x245   : > { %5539 = vst [vmem:[#allocation19_spill] sm:$0xff] %v4572_v56  ;;  %1614 = vmatmul.bf16.gmra.mxu0 %v4572_v56  ;;  %1792 = vmatmul.bf16.gmra.mxu2 %v4572_v56  ;;  %v1023_v55 = vmax.f32 %v869_v26, 0.0  ;;  %v3710_v26 = vld [vmem:[#allocation5 + $0x74] sm:$0xf0] }
 0x246   : > { %5540 = vst [vmem:[#allocation20_spill] sm:$0xff] %v4576_v13  ;;  %v952_v24 = vpop.f32.mrf.mxu3  ;;  %1996 = vmatpush.bf16.msra.mxu1 %v3319_v19 }
 0x247   : > { %v1758_v57 = vpop.f32.mrf.mxu2  ;;  %v953_v32 = vadd.f32 %v952_v24, %v4251_v44  ;;  %v4590_v33 = vpack.c.bf16 %v1025_v49, %v1023_v55 }
 0x248   : > { %v1759_v28 = vadd.f32 %v1758_v57, %v1670_v45  ;;  %v1671_v31 = vpop.f32.mrf.mxu1  ;;  %v3696_v45 = vld [vmem:[#allocation5 + $0xc] sm:$0xf] }
 0x249   : > { %v1672_v63 = vadd.f32 %v1671_v31, %v4471_v6  ;;  %v3287_v19 = vor.u32 %v3696_v45, %v3284_v40  ;;  %v1020_v15 = vmax.f32 %v953_v32, 0.0  ;;  %v3330_v31 = vld [vmem:[#allocation5 + $0x68] sm:$0xf]  ;;  %v3742_v45 = vld [vmem:[#allocation5 + $0x174] sm:$0xf0] }
 0x24a   : > { %1997 = vmatpush.bf16.msra.mxu1 %v3303_v22  ;;  %v2210_v30 = vmax.f32 %v1759_v28, 0.0  ;;  %v3331_v22 = vor.u32 %v3710_v26, %v3330_v31  ;;  %v3460_v28 = vld [vmem:[#allocation5 + $0x178] sm:$0xf0]  ;;  %v876_v31 = vadd.f32 %v4550_v52, %v4285_v8 }
 0x24c   : > { %v4600_v49 = vpop.f32.mrf.mxu0  ;;  %1817 = vmatpush.bf16.msra.mxu3 %v3331_v22  ;;  %v3426_v22 = vld [vmem:[#allocation5 + $0x128] sm:$0xf] }
 0x24e   : > { %v954_v20 = vpop.f32.mrf.mxu3  ;;  %1998 = vmatpush.bf16.msra.mxu1 %v3287_v19 }
 0x24f   : > { %v955_v62 = vadd.f32 %v954_v20, %v4251_v44  ;;  %v1760_v57 = vpop.f32.mrf.mxu2  ;;  %v3458_v20 = vld [vmem:[#allocation5 + $0x168] sm:$0xf] }
 0x250   : > { %v1761_v13 = vadd.f32 %v1760_v57, %v1672_v63  ;;  %v1674_v56 = vpop.f32.mrf.mxu1  ;;  %v3740_v63 = vld [vmem:[#allocation5 + $0x16c] sm:$0xf] }
 0x251   : > { %v1022_v59 = vmax.f32 %v955_v62, 0.0  ;;  %v1675_v32 = vadd.f32 %v1674_v56, %v4471_v6  ;;  %v3463_v62 = vor.u32 %v3740_v63, %v3460_v28  ;;  %v874_v56 = vadd.f32 %v4541_v12, %v4285_v8  ;;  %v3734_v63 = vld [vmem:[#allocation5 + $0x134] sm:$0xf0] }
 0x252   : > { %v2214_v3 = vmax.f32 %v1761_v13, 0.0  ;;  %v3459_v13 = vor.u32 %v3742_v45, %v3458_v20  ;;  %v3444_v20 = vld [vmem:[#allocation5 + $0x158] sm:$0xf0]  ;;  %v1029_v28 = vmax.f32 %v876_v31, 0.0  ;;  %v3730_v31 = vld [vmem:[#allocation5 + $0x114] sm:$0xf0] }
 0x253   : > { %v4592_v24 = vpack.c.bf16 %v1022_v59, %v1020_v15  ;;  %1495 = vmatmul.bf16.gmra.mxu3 %v4421_v0  ;;  %1713 = vmatmul.bf16.gmra.mxu1 %v4590_v33  ;;  %v3738_v59 = vld [vmem:[#allocation5 + $0x154] sm:$0xf0] }
 0x254   : > { %v4596_v40 = vpack.c.bf16 %v2214_v3, %v2210_v30  ;;  %1906 = vmatpush.bf16.msra.mxu0 %v3459_v13  ;;  %2084 = vmatpush.bf16.msra.mxu2 %v3463_v62  ;;  %v3442_v3 = vld [vmem:[#allocation5 + $0x148] sm:$0xf]  ;;  %v3736_v30 = vld [vmem:[#allocation5 + $0x14c] sm:$0xf]  ;;  %v3427_v62 = vor.u32 %v3734_v63, %v3426_v22  ;;  %v4610_v8 = vpop.f32.mrf.mxu0 }
 0x255   : > { %5541 = vst [vmem:[#allocation21_spill] sm:$0xff] %v4592_v24  ;;  %1619 = vmatmul.bf16.gmra.mxu0 %v4592_v24  ;;  %1797 = vmatmul.bf16.gmra.mxu2 %v4592_v24  ;;  %v3443_v26 = vor.u32 %v3738_v59, %v3442_v3  ;;  %v3447_v45 = vor.u32 %v3736_v30, %v3444_v20  ;;  %v3732_v13 = vld [vmem:[#allocation5 + $0x12c] sm:$0xf]  ;;  %v1027_v3 = vmax.f32 %v874_v56, 0.0  ;;  %v3410_v20 = vld [vmem:[#allocation5 + $0x108] sm:$0xf] }
 0x256   : > { %5542 = vst [vmem:[#allocation22_spill] sm:$0xff] %v4596_v40  ;;  %v957_v55 = vpop.f32.mrf.mxu3 }
 0x257   : > { %v1763_v57 = vpop.f32.mrf.mxu2 }
 0x258   : > { %v1764_v19 = vadd.f32 %v1763_v57, %v1675_v32  ;;  %v1676_v15 = vpop.f32.mrf.mxu1  ;;  %1907 = vmatpush.bf16.msra.mxu0 %v3443_v26  ;;  %2085 = vmatpush.bf16.msra.mxu2 %v3447_v45  ;;  %v958_v32 = vadd.f32 %v957_v55, %v4251_v44  ;;  %v3428_v57 = vld [vmem:[#allocation5 + $0x138] sm:$0xf0]  ;;  %v3728_v45 = vld [vmem:[#allocation5 + $0x10c] sm:$0xf]  ;;  %v4612_v55 = vpack.c.bf16 %v1029_v28, %v1027_v3 }
 0x259   : > { %v1677_v40 = vadd.f32 %v1676_v15, %v4471_v6  ;;  %v3431_v52 = vor.u32 %v3732_v13, %v3428_v57  ;;  %v3411_v15 = vor.u32 %v3730_v31, %v3410_v20  ;;  %v3415_v57 = vor.u32 %v3728_v45, %v3412_v36 }
 0x25a   : > { %v1024_v22 = vmax.f32 %v958_v32, 0.0  ;;  %v2218_v13 = vmax.f32 %v1764_v19, 0.0 }
 0x25c   : > { %1908 = vmatpush.bf16.msra.mxu0 %v3427_v62  ;;  %2086 = vmatpush.bf16.msra.mxu2 %v3431_v52  ;;  %v4623_v52 = vpop.f32.mrf.mxu0 }
 0x25e   : > { %v959_v24 = vpop.f32.mrf.mxu3 }
 0x25f   : > { %v960_v59 = vadd.f32 %v959_v24, %v4251_v44  ;;  %v1765_v30 = vpop.f32.mrf.mxu2 }
 0x260   : > { %v1766_v12 = vadd.f32 %v1765_v30, %v1677_v40  ;;  %v1679_v26 = vpop.f32.mrf.mxu1  ;;  %1909 = vmatpush.bf16.msra.mxu0 %v3411_v15  ;;  %2087 = vmatpush.bf16.msra.mxu2 %v3415_v57  ;;  %v3706_v57 = vld [vmem:[#allocation5 + $0x54] sm:$0xf0] }
 0x261   : > { %v1026_v63 = vmax.f32 %v960_v59, 0.0  ;;  %v1680_v28 = vadd.f32 %v1679_v26, %v4471_v6 }
 0x262   : > { %v2222_v56 = vmax.f32 %v1766_v12, 0.0 }
 0x263   : > { %v4614_v24 = vpack.c.bf16 %v1026_v63, %v1024_v22  ;;  %1500 = vmatmul.bf16.gmra.mxu3 %v4443_v38  ;;  %1718 = vmatmul.bf16.gmra.mxu1 %v4612_v55 }
 0x264   : > { %v4618_v40 = vpack.c.bf16 %v2222_v56, %v2218_v13  ;;  %v3314_v56 = vld [vmem:[#allocation5 + $0x48] sm:$0xf] }
 0x265   : > { %1624 = vmatmul.bf16.gmra.mxu0 %v4614_v24  ;;  %1802 = vmatmul.bf16.gmra.mxu2 %v4614_v24 }
 0x266   : > { %v962_v32 = vpop.f32.mrf.mxu3 }
 0x267   : > { %v1768_v19 = vpop.f32.mrf.mxu2  ;;  %v963_v3 = vadd.f32 %v962_v32, %v4251_v44  ;;  %v3315_v32 = vor.u32 %v3706_v57, %v3314_v56 }
 0x268   : > { %v1769_v62 = vadd.f32 %v1768_v19, %v1680_v28  ;;  %v1681_v36 = vpop.f32.mrf.mxu1  ;;  %v4632_v28 = vpop.f32.mrf.mxu0 }
 0x269   : > { %v1682_v59 = vadd.f32 %v1681_v36, %v4471_v6  ;;  %v1028_v22 = vmax.f32 %v963_v3, 0.0  ;;  %1818 = vmatpush.bf16.msra.mxu3 %v3315_v32  ;;  %v4640_v36 = vperm.slane %v4464_v1, 0 }
 0x26a   : > { %v2226_v15 = vmax.f32 %v1769_v62, 0.0 }
 0x26e   : > { %v964_v30 = vpop.f32.mrf.mxu3 }
 0x26f   : > { %v965_v12 = vadd.f32 %v964_v30, %v4251_v44  ;;  %v1770_v20 = vpop.f32.mrf.mxu2 }
 0x270   : > { %v1771_v31 = vadd.f32 %v1770_v20, %v1682_v59  ;;  %v1684_v45 = vpop.f32.mrf.mxu1  ;;  %v4643_v20 = vpop.f32.mrf.mxu0 }
 0x271   : > { %v1030_v63 = vmax.f32 %v965_v12, 0.0  ;;  %v1685_v44 = vadd.f32 %v1684_v45, %v4471_v6 }
 0x272   : > { %v2230_v26 = vmax.f32 %v1771_v31, 0.0 }
 0x273   : > { %v4628_v13 = vpack.c.bf16 %v1030_v63, %v1028_v22  ;;  %1505 = vmatmul.bf16.gmra.mxu3 %v4466_v5  ;;  %1999 = vmatmul.bf16.vlgmr.msra.gmra.mxu1 %v4299_v43 }
 0x274   : > { %v4634_v19 = vpack.c.bf16 %v2230_v26, %v2226_v15 }
 0x275   : > { %1629 = vmatmul.bf16.gmra.mxu0 %v4628_v13  ;;  %1807 = vmatmul.bf16.gmra.mxu2 %v4628_v13 }
 0x276   : > { %v1466_v62 = vpop.f32.mrf.mxu3 }
 0x277   : > { %v1773_v3 = vpop.f32.mrf.mxu2  ;;  %v1467_v12 = vadd.f32 %v1466_v62, %v4640_v36 }
 0x278   : > { %v1774_v59 = vadd.f32 %v1773_v3, %v1685_v44  ;;  %v1686_v30 = vpop.f32.mrf.mxu1 }
 0x279   : > { %v1687_v31 = vadd.f32 %v1686_v30, %v4471_v6  ;;  %v1556_v63 = vadd.f32 %v4427_v10, %v1467_v12 }
 0x27a   : > { %v2234_v57 = vmax.f32 %v1774_v59, 0.0  ;;  %v4658_v59 = vpop.f32.mrf.mxu0 }
 0x27b   : > { %v2169_v44 = vmax.f32 %v1556_v63, 0.0 }
 0x27e   : > { %v1468_v22 = vpop.f32.mrf.mxu3 }
 0x27f   : > { %v1469_v15 = vadd.f32 %v1468_v22, %v4640_v36  ;;  %v1775_v45 = vpop.f32.mrf.mxu2 }
 0x280   : > { %v1776_v26 = vadd.f32 %v1775_v45, %v1687_v31  ;;  %v1689_v56 = vpop.f32.mrf.mxu1 }
 0x281   : > { %v1558_v1 = vadd.f32 %v4438_v35, %v1469_v15  ;;  %v1690_v10 = vadd.f32 %v1689_v56, %v4471_v6 }
 0x282   : > { %v2238_v32 = vmax.f32 %v1776_v26, 0.0 }
 0x283   : > { %v2173_v3 = vmax.f32 %v1558_v1, 0.0  ;;  %1510 = vmatmul.bf16.gmra.mxu3 %v4491_v61  ;;  %2004 = vmatmul.bf16.gmra.mxu1 %v4321_v48 }
 0x284   : > { %v4651_v62 = vpack.c.bf16 %v2238_v32, %v2234_v57 }
 0x285   : > { %v4653_v30 = vpack.c.bf16 %v2173_v3, %v2169_v44  ;;  %1910 = vmatmul.bf16.vlgmr.msra.gmra.mxu0 %v4259_v11  ;;  %2088 = vmatmul.bf16.vlgmr.msra.gmra.mxu2 %v4259_v11  ;;  %v4665_v44 = vpop.f32.mrf.mxu0 }
 0x286   : > { %5543 = vst [vmem:[#allocation23_spill] sm:$0xff] %v4651_v62  ;;  %v1471_v12 = vpop.f32.mrf.mxu3 }
 0x287   : > { %v1778_v35 = vpop.f32.mrf.mxu2  ;;  %v1472_v63 = vadd.f32 %v1471_v12, %v4640_v36  ;;  %v3298_v12 = vld [vmem:[#allocation5 + $0x28] sm:$0xf] }
 0x288   : > { %v1779_v31 = vadd.f32 %v1778_v35, %v1690_v10  ;;  %v1691_v22 = vpop.f32.mrf.mxu1 }
 0x289   : > { %v1692_v15 = vadd.f32 %v1691_v22, %v4471_v6  ;;  %v1561_v26 = vadd.f32 %v4451_v51, %v1472_v63  ;;  %v3702_v22 = vld [vmem:[#allocation5 + $0x34] sm:$0xf0] }
 0x28a   : > { %v2242_v3 = vmax.f32 %v1779_v31, 0.0  ;;  %v3299_v51 = vor.u32 %v3702_v22, %v3298_v12 }
 0x28b   : > { %v2177_v10 = vmax.f32 %v1561_v26, 0.0 }
 0x28c   : > { %1819 = vmatpush.bf16.msra.mxu3 %v3299_v51 }
 0x28e   : > { %v1473_v45 = vpop.f32.mrf.mxu3 }
 0x28f   : > { %v1474_v1 = vadd.f32 %v1473_v45, %v4640_v36  ;;  %v1780_v57 = vpop.f32.mrf.mxu2 }
 0x290   : > { %v1781_v32 = vadd.f32 %v1780_v57, %v1692_v15  ;;  %v1694_v11 = vpop.f32.mrf.mxu1 }
 0x291   : > { %v1563_v56 = vadd.f32 %v4468_v29, %v1474_v1  ;;  %v1695_v31 = vadd.f32 %v1694_v11, %v4471_v6 }
 0x292   : > { %v2246_v62 = vmax.f32 %v1781_v32, 0.0  ;;  %v4677_v32 = vpop.f32.mrf.mxu0 }
 0x293   : > { %v2181_v35 = vmax.f32 %v1563_v56, 0.0  ;;  %1515 = vmatmul.bf16.gmra.mxu3 %v4512_v23  ;;  %2009 = vmatmul.bf16.gmra.mxu1 %v4343_v53 }
 0x294   : > { %v4669_v63 = vpack.c.bf16 %v2246_v62, %v2242_v3 }
 0x295   : > { %1915 = vmatmul.bf16.gmra.mxu0 %v4270_v50  ;;  %2093 = vmatmul.bf16.gmra.mxu2 %v4270_v50  ;;  %v4673_v29 = vpack.c.bf16 %v2181_v35, %v2177_v10 }
 0x296   : > { %v1476_v15 = vpop.f32.mrf.mxu3 }
 0x297   : > { %v1783_v45 = vpop.f32.mrf.mxu2  ;;  %v1477_v57 = vadd.f32 %v1476_v15, %v4640_v36 }
 0x298   : > { %v1784_v26 = vadd.f32 %v1783_v45, %v1695_v31  ;;  %v1696_v1 = vpop.f32.mrf.mxu1 }
 0x299   : > { %v1697_v62 = vadd.f32 %v1696_v1, %v4471_v6  ;;  %v1566_v3 = vadd.f32 %v4486_v9, %v1477_v57 }
 0x29a   : > { %v2250_v22 = vmax.f32 %v1784_v26, 0.0  ;;  %v4691_v1 = vpop.f32.mrf.mxu0 }
 0x29b   : > { %v2185_v31 = vmax.f32 %v1566_v3, 0.0 }
 0x29e   : > { %v1478_v56 = vpop.f32.mrf.mxu3 }
 0x29f   : > { %v1479_v50 = vadd.f32 %v1478_v56, %v4640_v36  ;;  %v1785_v10 = vpop.f32.mrf.mxu2 }
 0x2a0   : > { %v1786_v35 = vadd.f32 %v1785_v10, %v1697_v62  ;;  %v1699_v12 = vpop.f32.mrf.mxu1 }
 0x2a1   : > { %v1568_v11 = vadd.f32 %v4498_v17, %v1479_v50  ;;  %v1700_v17 = vadd.f32 %v1699_v12, %v4471_v6 }
 0x2a2   : > { %v2254_v51 = vmax.f32 %v1786_v35, 0.0 }
 0x2a3   : > { %v2189_v45 = vmax.f32 %v1568_v11, 0.0  ;;  %1520 = vmatmul.bf16.gmra.mxu3 %v4531_v37  ;;  %2014 = vmatmul.bf16.gmra.mxu1 %v4365_v39 }
 0x2a4   : > { %v4685_v15 = vpack.c.bf16 %v2254_v51, %v2250_v22  ;;  %v4698_v22 = vpop.f32.mrf.mxu0 }
 0x2a5   : > { %1920 = vmatmul.bf16.gmra.mxu0 %v4281_v4  ;;  %2098 = vmatmul.bf16.gmra.mxu2 %v4281_v4  ;;  %v4689_v9 = vpack.c.bf16 %v2189_v45, %v2185_v31 }
 0x2a6   : > { %5544 = vst [vmem:[#allocation24_spill] sm:$0xff] %v4685_v15  ;;  %v1481_v26 = vpop.f32.mrf.mxu3 }
 0x2a7   : > { %v1788_v57 = vpop.f32.mrf.mxu2  ;;  %v1482_v3 = vadd.f32 %v1481_v26, %v4640_v36  ;;  %v3282_v26 = vld [vmem:[#allocation5 + $0x8] sm:$0xf] }
 0x2a8   : > { %v1789_v62 = vadd.f32 %v1788_v57, %v1700_v17  ;;  %v1701_v56 = vpop.f32.mrf.mxu1 }
 0x2a9   : > { %v1702_v50 = vadd.f32 %v1701_v56, %v4471_v6  ;;  %v1571_v35 = vadd.f32 %v4510_v2, %v1482_v3  ;;  %v3698_v56 = vld [vmem:[#allocation5 + $0x14] sm:$0xf0] }
 0x2aa   : > { %v2258_v45 = vmax.f32 %v1789_v62, 0.0  ;;  %v3283_v2 = vor.u32 %v3698_v56, %v3282_v26 }
 0x2ab   : > { %v2193_v17 = vmax.f32 %v1571_v35, 0.0 }
 0x2ac   : > { %1820 = vmatpush.bf16.msra.mxu3 %v3283_v2 }
 0x2ae   : > { %v1483_v10 = vpop.f32.mrf.mxu3 }
 0x2af   : > { %v1484_v11 = vadd.f32 %v1483_v10, %v4640_v36  ;;  %v1790_v4 = vpop.f32.mrf.mxu2  ;;  %v4709_v10 = vpop.f32.mrf.mxu0 }
 0x2b0   : > { %v1791_v51 = vadd.f32 %v1790_v4, %v1702_v50  ;;  %v1704_v31 = vpop.f32.mrf.mxu1 }
 0x2b1   : > { %v1573_v12 = vadd.f32 %v4524_v21, %v1484_v11  ;;  %v1705_v26 = vadd.f32 %v1704_v31, %v4471_v6 }
 0x2b2   : > { %v2262_v15 = vmax.f32 %v1791_v51, 0.0 }
 0x2b3   : > { %v2197_v57 = vmax.f32 %v1573_v12, 0.0  ;;  %1525 = vmatmul.bf16.gmra.mxu3 %v4552_v58  ;;  %2019 = vmatmul.bf16.gmra.mxu1 %v4385_v7 }
 0x2b4   : > { %v4703_v3 = vpack.c.bf16 %v2262_v15, %v2258_v45 }
 0x2b5   : > { %1925 = vmatmul.bf16.gmra.mxu0 %v4303_v27  ;;  %2103 = vmatmul.bf16.gmra.mxu2 %v4303_v27  ;;  %v4707_v50 = vpack.c.bf16 %v2197_v57, %v2193_v17 }
 0x2b6   : > { %5545 = vst [vmem:[#allocation25_spill] sm:$0xff] %v4703_v3  ;;  %v1486_v21 = vpop.f32.mrf.mxu3 }
 0x2b7   : > { %5546 = vst [vmem:[#allocation26_spill] sm:$0xff] %v4707_v50  ;;  %v1487_v35 = vadd.f32 %v1486_v21, %v4640_v36 }
 0x2b8   : > { %v1706_v62 = vpop.f32.mrf.mxu1 }
 0x2b9   : > { %v1576_v4 = vadd.f32 %v4535_v18, %v1487_v35 }
 0x2bb   : > { %v2201_v27 = vmax.f32 %v1576_v4, 0.0  ;;  %v1707_v4 = vadd.f32 %v1706_v62, %v4471_v6 }
 0x2be   : > { %v1488_v11 = vpop.f32.mrf.mxu3 }
 0x2bf   : > { %v1489_v51 = vadd.f32 %v1488_v11, %v4640_v36 }
 0x2c0   : > { %v1709_v15 = vpop.f32.mrf.mxu1 }
 0x2c1   : > { %v1578_v12 = vadd.f32 %v4547_v47, %v1489_v51 }
 0x2c2   : > { %v4715_v45 = vpop.f32.mrf.mxu0 }
 0x2c3   : > { %v2205_v17 = vmax.f32 %v1578_v12, 0.0  ;;  %1530 = vmatmul.bf16.gmra.mxu3 %v4568_v46  ;;  %2024 = vmatmul.bf16.gmra.mxu1 %v4403_v34 }
 0x2c5   : > { %1930 = vmatmul.bf16.gmra.mxu0 %v4325_v54  ;;  %2108 = vmatmul.bf16.gmra.mxu2 %v4325_v54  ;;  %v4721_v57 = vpack.c.bf16 %v2205_v17, %v2201_v27 }
 0x2c6   : > { %v1491_v18 = vpop.f32.mrf.mxu3 }
 0x2c7   : > { %5547 = vst [vmem:[#allocation27_spill] sm:$0xff] %v4721_v57  ;;  %v1492_v35 = vadd.f32 %v1491_v18, %v4640_v36 }
 0x2c8   : > { %v1711_v56 = vpop.f32.mrf.mxu1  ;;  %v1793_v2 = vpop.f32.mrf.mxu2 }
 0x2c9   : > { %v1794_v47 = vadd.f32 %v1793_v2, %v1705_v26  ;;  %v1581_v51 = vadd.f32 %v4559_v60, %v1492_v35  ;;  %v3766_v60 = vld [vmem:[%s5511_s7 + $0x38] sm:$0xff] }
 0x2ca   : > { %v4724_v21 = vpop.f32.mrf.mxu0  ;;  %2621 = vmatpush.bf16.msrb.mxu3 %v3766_v60 }
 0x2cb   : > { %v2209_v57 = vmax.f32 %v1581_v51, 0.0  ;;  %v2266_v26 = vmax.f32 %v1794_v47, 0.0 }
 0x2ce   : > { %v1493_v11 = vpop.f32.mrf.mxu3 }
 0x2cf   : > { %v1494_v12 = vadd.f32 %v1493_v11, %v4640_v36 }
 0x2d0   : > { %v1714_v54 = vpop.f32.mrf.mxu1  ;;  %v1795_v27 = vpop.f32.mrf.mxu2 }
 0x2d1   : > { %v1583_v17 = vadd.f32 %v4570_v25, %v1494_v12  ;;  %v1796_v3 = vadd.f32 %v1795_v27, %v1707_v4  ;;  %v3790_v12 = vld [vmem:[%s5511_s7 + $0xf8] sm:$0xff] }
 0x2d2   : > { %v4731_v31 = vpop.f32.mrf.mxu0  ;;  %2888 = vmatpush.bf16.msrb.mxu2 %v3790_v12 }
 0x2d3   : > { %v2213_v2 = vmax.f32 %v1583_v17, 0.0  ;;  %v2270_v50 = vmax.f32 %v1796_v3, 0.0  ;;  %1535 = vmatmul.bf16.gmra.mxu3 %v4590_v33  ;;  %2029 = vmatmul.bf16.gmra.mxu1 %v4421_v0  ;;  %v1710_v3 = vadd.f32 %v1709_v15, %v4471_v6 }
 0x2d5   : > { %1935 = vmatmul.bf16.gmra.mxu0 %v4347_v16  ;;  %2113 = vmatmul.bf16.gmra.mxu2 %v4347_v16  ;;  %v4740_v25 = vpack.c.bf16 %v2213_v2, %v2209_v57  ;;  %v4742_v62 = vpack.c.bf16 %v2270_v50, %v2266_v26  ;;  %v3774_v16 = vld [vmem:[%s5511_s7 + $0x78] sm:$0xff]  ;;  %v1712_v57 = vadd.f32 %v1711_v56, %v4471_v6 }
 0x2d6   : > { %v1496_v18 = vpop.f32.mrf.mxu3  ;;  %v3782_v50 = vld [vmem:[%s5511_s7 + $0xb8] sm:$0xff]  ;;  %2710 = vmatpush.bf16.msrb.mxu0 %v3774_v16 }
 0x2d7   : > { %5548 = vst [vmem:[#allocation28_spill] sm:$0xff] %v4740_v25  ;;  %v1497_v51 = vadd.f32 %v1496_v18, %v4640_v36  ;;  %2799 = vmatpush.bf16.msrb.mxu1 %v3782_v50 }
 0x2d8   : > { %5549 = vst [vmem:[#allocation29_spill] sm:$0xff] %v4742_v62  ;;  %v1716_v47 = vpop.f32.mrf.mxu1  ;;  %v1798_v35 = vpop.f32.mrf.mxu2 }
 0x2d9   : > { %v1799_v11 = vadd.f32 %v1798_v35, %v1710_v3  ;;  %v1586_v27 = vadd.f32 %v4585_v42, %v1497_v51  ;;  %v1715_v51 = vadd.f32 %v1714_v54, %v4471_v6 }
 0x2da   : > { %v4745_v4 = vpop.f32.mrf.mxu0 }
 0x2db   : > { %v2217_v35 = vmax.f32 %v1586_v27, 0.0  ;;  %v2274_v62 = vmax.f32 %v1799_v11, 0.0 }
 0x2de   : > { %v1498_v15 = vpop.f32.mrf.mxu3 }
 0x2df   : > { %v1499_v17 = vadd.f32 %v1498_v15, %v4640_v36 }
 0x2e0   : > { %v1719_v26 = vpop.f32.mrf.mxu1  ;;  %v1800_v2 = vpop.f32.mrf.mxu2 }
 0x2e1   : > { %v1588_v60 = vadd.f32 %v4600_v49, %v1499_v17  ;;  %v1801_v18 = vadd.f32 %v1800_v2, %v1712_v57  ;;  %v1717_v17 = vadd.f32 %v1716_v47, %v4471_v6 }
 0x2e2   : > { %v4761_v3 = vpop.f32.mrf.mxu0 }
 0x2e3   : > { %v2221_v25 = vmax.f32 %v1588_v60, 0.0  ;;  %v2278_v12 = vmax.f32 %v1801_v18, 0.0  ;;  %1540 = vmatmul.bf16.gmra.mxu3 %v4612_v55  ;;  %2034 = vmatmul.bf16.gmra.mxu1 %v4443_v38 }
 0x2e5   : > { %1940 = vmatmul.bf16.gmra.mxu0 %v4369_v41  ;;  %2118 = vmatmul.bf16.gmra.mxu2 %v4369_v41  ;;  %v4767_v42 = vpack.c.bf16 %v2221_v25, %v2217_v35  ;;  %v4769_v56 = vpack.c.bf16 %v2278_v12, %v2274_v62 }
 0x2e6   : > { %v1501_v49 = vpop.f32.mrf.mxu3 }
 0x2e7   : > { %5550 = vst [vmem:[#allocation30_spill] sm:$0xff] %v4769_v56  ;;  %v1502_v57 = vadd.f32 %v1501_v49, %v4640_v36 }
 0x2e8   : > { %v1803_v16 = vpop.f32.mrf.mxu2  ;;  %v1721_v50 = vpop.f32.mrf.mxu1 }
 0x2e9   : > { %v1804_v11 = vadd.f32 %v1803_v16, %v1715_v51  ;;  %v1591_v2 = vadd.f32 %v4610_v8, %v1502_v57  ;;  %v3765_v8 = vld [vmem:[%s5511_s7 + $0x30] sm:$0xff] }
 0x2ea   : > { %v4772_v15 = vpop.f32.mrf.mxu0  ;;  %2622 = vmatpush.bf16.msrb.mxu3 %v3765_v8  ;;  %v4812_v8 = vld [vmem:[%s5510_s6] sm:$0xf] }
 0x2eb   : > { %v2225_v54 = vmax.f32 %v1591_v2, 0.0  ;;  %v2282_v35 = vmax.f32 %v1804_v11, 0.0  ;;  %v1720_v11 = vadd.f32 %v1719_v26, %v4471_v6  ;;  %v3773_v2 = vld [vmem:[%s5511_s7 + $0x70] sm:$0xff] }
 0x2ec   : > { %2711 = vmatpush.bf16.msrb.mxu0 %v3773_v2 }
 0x2ee   : > { %v1503_v27 = vpop.f32.mrf.mxu3 }
 0x2ef   : > { %v1504_v41 = vadd.f32 %v1503_v27, %v4640_v36 }
 0x2f0   : > { %v1805_v25 = vpop.f32.mrf.mxu2  ;;  %v2000_v16 = vpop.f32.mrf.mxu1 }
 0x2f1   : > { %v1593_v62 = vadd.f32 %v4623_v52, %v1504_v41  ;;  %v1806_v60 = vadd.f32 %v1805_v25, %v1717_v17  ;;  %v3781_v41 = vld [vmem:[%s5511_s7 + $0xb0] sm:$0xff] }
 0x2f2   : > { %v4779_v18 = vpop.f32.mrf.mxu0  ;;  %2800 = vmatpush.bf16.msrb.mxu1 %v3781_v41 }
 0x2f3   : > { %v2229_v12 = vmax.f32 %v1593_v62, 0.0  ;;  %v2286_v51 = vmax.f32 %v1806_v60, 0.0  ;;  %1821 = vmatmul.bf16.vlgmr.msra.gmra.mxu3 %v4299_v43  ;;  %2039 = vmatmul.bf16.gmra.mxu1 %v4466_v5  ;;  %v1722_v62 = vadd.f32 %v1721_v50, %v4471_v6 }
 0x2f5   : > { %1945 = vmatmul.bf16.gmra.mxu0 %v4387_v14  ;;  %2123 = vmatmul.bf16.gmra.mxu2 %v4387_v14  ;;  %v4788_v52 = vpack.c.bf16 %v2229_v12, %v2225_v54  ;;  %v4790_v47 = vpack.c.bf16 %v2286_v51, %v2282_v35  ;;  %v3789_v14 = vld [vmem:[%s5511_s7 + $0xf0] sm:$0xff] }
 0x2f6   : > { %v1506_v49 = vpop.f32.mrf.mxu3  ;;  %2889 = vmatpush.bf16.msrb.mxu2 %v3789_v14 }
 0x2f7   : > { %5551 = vst [vmem:[#allocation31_spill] sm:$0xff] %v4788_v52  ;;  %v1507_v17 = vadd.f32 %v1506_v49, %v4640_v36  ;;  %v4815_v49 = vperm.slane %v4812_v8, 3 }
 0x2f8   : > { %5552 = vst [vmem:[#allocation32_spill] sm:$0xff] %v4790_v47  ;;  %v1808_v57 = vpop.f32.mrf.mxu2  ;;  %v2002_v26 = vpop.f32.mrf.mxu1 }
 0x2f9   : > { %v1809_v43 = vadd.f32 %v1808_v57, %v1720_v11  ;;  %v1596_v60 = vadd.f32 %v4632_v28, %v1507_v17  ;;  %v2001_v41 = vadd.f32 %v2000_v16, %v4815_v49 }
 0x2fa   : > { %v4793_v27 = vpop.f32.mrf.mxu0 }
 0x2fb   : > { %v2233_v57 = vmax.f32 %v1596_v60, 0.0  ;;  %v2290_v6 = vmax.f32 %v1809_v43, 0.0 }
 0x2fe   : > { %v1508_v25 = vpop.f32.mrf.mxu3 }
 0x2ff   : > { %v1509_v54 = vadd.f32 %v1508_v25, %v4640_v36 }
 0x300   : > { %v1810_v35 = vpop.f32.mrf.mxu2  ;;  %v2005_v25 = vpop.f32.mrf.mxu1 }
 0x301   : > { %v1598_v12 = vadd.f32 %v4643_v20, %v1509_v54  ;;  %v1811_v51 = vadd.f32 %v1810_v35, %v1722_v62  ;;  %v5553_v20 = vld [vmem:[#allocation11_spill] sm:$0xff]  ;;  %v2003_v35 = vadd.f32 %v2002_v26, %v4815_v49 }
 0x302   : > { %v4817_v11 = vpop.f32.mrf.mxu0 }
 0x303   : > { %v2237_v50 = vmax.f32 %v1598_v12, 0.0  ;;  %v2294_v28 = vmax.f32 %v1811_v51, 0.0  ;;  %1826 = vmatmul.bf16.gmra.mxu3 %v4321_v48  ;;  %2044 = vmatmul.bf16.gmra.mxu1 %v4491_v61 }
 0x305   : > { %1950 = vmatmul.bf16.gmra.mxu0 %v5553_v20  ;;  %2128 = vmatmul.bf16.gmra.mxu2 %v5553_v20  ;;  %v4823_v17 = vpack.c.bf16 %v2237_v50, %v2233_v57  ;;  %v4825_v14 = vpack.c.bf16 %v2294_v28, %v2290_v6 }
 0x306   : > { %v1511_v2 = vpop.f32.mrf.mxu3 }
 0x307   : > { %5554 = vst [vmem:[#allocation11_spill] sm:$0xff] %v4823_v17  ;;  %v1512_v48 = vadd.f32 %v1511_v2, %v4640_v36  ;;  %v5556_v2 = vld [vmem:[#allocation12_spill] sm:$0xff] }
 0x308   : > { %5555 = vst [vmem:[#allocation33_spill] sm:$0xff] %v4825_v14  ;;  %v2089_v62 = vpop.f32.mrf.mxu2  ;;  %v2007_v6 = vpop.f32.mrf.mxu1 }
 0x309   : > { %v2090_v43 = vadd.f32 %v2089_v62, %v2001_v41  ;;  %v1601_v12 = vadd.f32 %v4658_v59, %v1512_v48  ;;  %v3764_v59 = vld [vmem:[%s5511_s7 + $0x28] sm:$0xff] }
 0x30a   : > { %v4828_v60 = vpop.f32.mrf.mxu0  ;;  %2623 = vmatpush.bf16.msrb.mxu3 %v3764_v59 }
 0x30b   : > { %v2241_v20 = vmax.f32 %v1601_v12, 0.0  ;;  %v2172_v41 = vmax.f32 %v2090_v43, 0.0  ;;  %v2006_v43 = vadd.f32 %v2005_v25, %v4815_v49 }
 0x30e   : > { %v1513_v54 = vpop.f32.mrf.mxu3 }
 0x30f   : > { %v1514_v51 = vadd.f32 %v1513_v54, %v4640_v36 }
 0x310   : > { %v2091_v57 = vpop.f32.mrf.mxu2  ;;  %v2010_v12 = vpop.f32.mrf.mxu1 }
 0x311   : > { %v1603_v50 = vadd.f32 %v4665_v44, %v1514_v51  ;;  %v2092_v28 = vadd.f32 %v2091_v57, %v2003_v35  ;;  %v3772_v57 = vld [vmem:[%s5511_s7 + $0x68] sm:$0xff] }
 0x312   : > { %v4835_v16 = vpop.f32.mrf.mxu0  ;;  %2712 = vmatpush.bf16.msrb.mxu0 %v3772_v57  ;;  %v2011_v57 = vadd.f32 %v2010_v12, %v4815_v49 }
 0x313   : > { %v2245_v62 = vmax.f32 %v1603_v50, 0.0  ;;  %v2176_v14 = vmax.f32 %v2092_v28, 0.0  ;;  %1831 = vmatmul.bf16.gmra.mxu3 %v4343_v53  ;;  %2049 = vmatmul.bf16.gmra.mxu1 %v4512_v23  ;;  %v3780_v50 = vld [vmem:[%s5511_s7 + $0xa8] sm:$0xff]  ;;  %v2008_v28 = vadd.f32 %v2007_v6, %v4815_v49  ;;  %v5558_v6 = vld [vmem:[#allocation13_spill] sm:$0xff] }
 0x314   : > { %2801 = vmatpush.bf16.msrb.mxu1 %v3780_v50 }
 0x315   : > { %v4842_v26 = vpack.c.bf16 %v2176_v14, %v2172_v41  ;;  %1955 = vmatmul.bf16.gmra.mxu0 %v5556_v2  ;;  %2133 = vmatmul.bf16.gmra.mxu2 %v5556_v2  ;;  %v4846_v44 = vpack.c.bf16 %v2245_v62, %v2241_v20  ;;  %v3788_v14 = vld [vmem:[%s5511_s7 + $0xe8] sm:$0xff] }
 0x316   : > { %v1516_v48 = vpop.f32.mrf.mxu3  ;;  %2890 = vmatpush.bf16.msrb.mxu2 %v3788_v14 }
 0x317   : > { %5557 = vst [vmem:[#allocation12_spill] sm:$0xff] %v4846_v44  ;;  %v1517_v51 = vadd.f32 %v1516_v48, %v4640_v36 }
 0x318   : > { %v2094_v54 = vpop.f32.mrf.mxu2  ;;  %v2012_v14 = vpop.f32.mrf.mxu1 }
 0x319   : > { %v2095_v53 = vadd.f32 %v2094_v54, %v2006_v43  ;;  %v1606_v20 = vadd.f32 %v4677_v32, %v1517_v51 }
 0x31a   : > { %v4849_v35 = vpop.f32.mrf.mxu0 }
 0x31b   : > { %v2249_v43 = vmax.f32 %v1606_v20, 0.0  ;;  %v2180_v54 = vmax.f32 %v2095_v53, 0.0  ;;  %v2013_v20 = vadd.f32 %v2012_v14, %v4815_v49  ;;  %v5560_v14 = vld [vmem:[#allocation14_spill] sm:$0xff] }
 0x31e   : > { %v1518_v25 = vpop.f32.mrf.mxu3 }
 0x31f   : > { %v1519_v41 = vadd.f32 %v1518_v25, %v4640_v36 }
 0x320   : > { %v2096_v62 = vpop.f32.mrf.mxu2 }
 0x321   : > { %v1608_v59 = vadd.f32 %v4691_v1, %v1519_v41  ;;  %v2097_v2 = vadd.f32 %v2096_v62, %v2008_v28  ;;  %v2015_v41 = vpop.f32.mrf.mxu1 }
 0x322   : > { %v4865_v48 = vpop.f32.mrf.mxu0 }
 0x323   : > { %v2253_v44 = vmax.f32 %v1608_v59, 0.0  ;;  %v2184_v17 = vmax.f32 %v2097_v2, 0.0  ;;  %1836 = vmatmul.bf16.gmra.mxu3 %v4365_v39  ;;  %2054 = vmatmul.bf16.gmra.mxu1 %v4531_v37 }
 0x325   : > { %1960 = vmatmul.bf16.gmra.mxu0 %v5558_v6  ;;  %2138 = vmatmul.bf16.gmra.mxu2 %v5558_v6  ;;  %v4871_v32 = vpack.c.bf16 %v2184_v17, %v2180_v54  ;;  %v4873_v51 = vpack.c.bf16 %v2253_v44, %v2249_v43 }
 0x326   : > { %v1521_v1 = vpop.f32.mrf.mxu3 }
 0x327   : > { %5559 = vst [vmem:[#allocation13_spill] sm:$0xff] %v4873_v51  ;;  %v1522_v39 = vadd.f32 %v1521_v1, %v4640_v36 }
 0x328   : > { %v2099_v50 = vpop.f32.mrf.mxu2 }
 0x329   : > { %v2100_v53 = vadd.f32 %v2099_v50, %v2011_v57  ;;  %v1611_v62 = vadd.f32 %v4698_v22, %v1522_v39  ;;  %v3763_v22 = vld [vmem:[%s5511_s7 + $0x20] sm:$0xff] }
 0x32a   : > { %v4876_v25 = vpop.f32.mrf.mxu0  ;;  %2624 = vmatpush.bf16.msrb.mxu3 %v3763_v22 }
 0x32b   : > { %v2257_v12 = vmax.f32 %v1611_v62, 0.0  ;;  %v2188_v54 = vmax.f32 %v2100_v53, 0.0  ;;  %v2016_v53 = vadd.f32 %v2015_v41, %v4815_v49 }
 0x32e   : > { %v1523_v28 = vpop.f32.mrf.mxu3 }
 0x32f   : > { %v1524_v17 = vadd.f32 %v1523_v28, %v4640_v36 }
 0x330   : > { %v2101_v59 = vpop.f32.mrf.mxu2 }
 0x331   : > { %v1613_v44 = vadd.f32 %v4709_v10, %v1524_v17  ;;  %v2102_v2 = vadd.f32 %v2101_v59, %v2013_v20  ;;  %v3787_v17 = vld [vmem:[%s5511_s7 + $0xe0] sm:$0xff] }
 0x332   : > { %v4883_v43 = vpop.f32.mrf.mxu0  ;;  %v3771_v59 = vld [vmem:[%s5511_s7 + $0x60] sm:$0xff]  ;;  %2891 = vmatpush.bf16.msrb.mxu2 %v3787_v17 }
 0x333   : > { %v2261_v6 = vmax.f32 %v1613_v44, 0.0  ;;  %v2192_v57 = vmax.f32 %v2102_v2, 0.0  ;;  %1841 = vmatmul.bf16.gmra.mxu3 %v4385_v7  ;;  %2059 = vmatmul.bf16.gmra.mxu1 %v4552_v58  ;;  %v2017_v7 = vpop.f32.mrf.mxu1  ;;  %v3779_v44 = vld [vmem:[%s5511_s7 + $0xa0] sm:$0xff] }
 0x334   : > { %2713 = vmatpush.bf16.msrb.mxu0 %v3771_v59  ;;  %2802 = vmatpush.bf16.msrb.mxu1 %v3779_v44  ;;  %v2018_v2 = vadd.f32 %v2017_v7, %v4815_v49  ;;  %v5562_v7 = vld [vmem:[#allocation19_spill] sm:$0xff] }
 0x335   : > { %1965 = vmatmul.bf16.gmra.mxu0 %v5560_v14  ;;  %2143 = vmatmul.bf16.gmra.mxu2 %v5560_v14  ;;  %v4892_v10 = vpack.c.bf16 %v2192_v57, %v2188_v54  ;;  %v4894_v1 = vpack.c.bf16 %v2261_v6, %v2257_v12 }
 0x336   : > { %v1526_v50 = vpop.f32.mrf.mxu3 }
 0x337   : > { %5561 = vst [vmem:[#allocation14_spill] sm:$0xff] %v4894_v1  ;;  %v1527_v62 = vadd.f32 %v1526_v50, %v4640_v36 }
 0x338   : > { %v2104_v39 = vpop.f32.mrf.mxu2 }
 0x339   : > { %v2105_v28 = vadd.f32 %v2104_v39, %v2016_v53  ;;  %v1616_v12 = vadd.f32 %v4715_v45, %v1527_v62 }
 0x33a   : > { %v4897_v20 = vpop.f32.mrf.mxu0 }
 0x33b   : > { %v4915_v50 = vpop.f32.mrf.mxu1  ;;  %v2265_v53 = vmax.f32 %v1616_v12, 0.0  ;;  %v2196_v39 = vmax.f32 %v2105_v28, 0.0 }
 0x33e   : > { %v1528_v41 = vpop.f32.mrf.mxu3 }
 0x33f   : > { %v1529_v54 = vadd.f32 %v1528_v41, %v4640_v36 }
 0x340   : > { %v2106_v6 = vpop.f32.mrf.mxu2 }
 0x341   : > { %v1618_v57 = vadd.f32 %v4724_v21, %v1529_v54  ;;  %v2107_v22 = vadd.f32 %v2106_v6, %v2018_v2 }
 0x342   : > { %v4913_v14 = vpop.f32.mrf.mxu0 }
 0x343   : > { %v2269_v17 = vmax.f32 %v1618_v57, 0.0  ;;  %v2200_v59 = vmax.f32 %v2107_v22, 0.0  ;;  %1846 = vmatmul.bf16.gmra.mxu3 %v4403_v34  ;;  %2064 = vmatmul.bf16.gmra.mxu1 %v4568_v46  ;;  %v4930_v2 = vpop.f32.mrf.mxu1 }
 0x345   : > { %1970 = vmatmul.bf16.gmra.mxu0 %v5562_v7  ;;  %2148 = vmatmul.bf16.gmra.mxu2 %v5562_v7  ;;  %v4921_v45 = vpack.c.bf16 %v2200_v59, %v2196_v39  ;;  %v4923_v21 = vpack.c.bf16 %v2269_v17, %v2265_v53  ;;  %v3762_v17 = vld [vmem:[%s5511_s7 + $0x18] sm:$0xff]  ;;  %v5564_v59 = vld [vmem:[#allocation21_spill] sm:$0xff] }
 0x346   : > { %v1531_v62 = vpop.f32.mrf.mxu3  ;;  %2625 = vmatpush.bf16.msrb.mxu3 %v3762_v17  ;;  %v3768_v17 = vld [vmem:[%s5511_s7 + $0x48] sm:$0xff] }
 0x347   : > { %5563 = vst [vmem:[#allocation19_spill] sm:$0xff] %v4923_v21  ;;  %v1532_v28 = vadd.f32 %v1531_v62, %v4640_v36 }
 0x348   : > { %v4925_v44 = vpop.f32.mrf.mxu2 }
 0x349   : > { %v1621_v12 = vadd.f32 %v4731_v31, %v1532_v28  ;;  %v3770_v31 = vld [vmem:[%s5511_s7 + $0x58] sm:$0xff] }
 0x34a   : > { %v4927_v41 = vpop.f32.mrf.mxu0  ;;  %2714 = vmatpush.bf16.msrb.mxu0 %v3770_v31  ;;  %v3778_v28 = vld [vmem:[%s5511_s7 + $0x98] sm:$0xff] }
 0x34b   : > { %v2273_v22 = vmax.f32 %v1621_v12, 0.0  ;;  %v4954_v62 = vpop.f32.mrf.mxu1  ;;  %2803 = vmatpush.bf16.msrb.mxu1 %v3778_v28  ;;  %v3769_v12 = vld [vmem:[%s5511_s7 + $0x50] sm:$0xff]  ;;  %v3776_v28 = vld [vmem:[%s5511_s7 + $0x88] sm:$0xff] }
 0x34e   : > { %v1533_v34 = vpop.f32.mrf.mxu3  ;;  %2715 = vmatpush.bf16.msrb.mxu0 %v3769_v12 }
 0x34f   : > { %v1534_v54 = vadd.f32 %v1533_v34, %v4640_v36 }
 0x350   : > { %v4934_v6 = vpop.f32.mrf.mxu2 }
 0x351   : > { %v1623_v57 = vadd.f32 %v4745_v4, %v1534_v54  ;;  %v3786_v4 = vld [vmem:[%s5511_s7 + $0xd8] sm:$0xff]  ;;  %v3785_v54 = vld [vmem:[%s5511_s7 + $0xd0] sm:$0xff] }
 0x352   : > { %v4937_v39 = vpop.f32.mrf.mxu0  ;;  %2892 = vmatpush.bf16.msrb.mxu2 %v3786_v4  ;;  %2716 = vmatpush.bf16.msrb.mxu0 %v3768_v17 }
 0x353   : > { %v2277_v53 = vmax.f32 %v1623_v57, 0.0  ;;  %1851 = vmatmul.bf16.gmra.mxu3 %v4421_v0  ;;  %2069 = vmatmul.bf16.gmra.mxu1 %v4590_v33 }
 0x355   : > { %1975 = vmatmul.bf16.gmra.mxu0 %v5564_v59  ;;  %2153 = vmatmul.bf16.gmra.mxu2 %v5564_v59  ;;  %v4952_v7 = vpack.c.bf16 %v2277_v53, %v2273_v22  ;;  %v3777_v22 = vld [vmem:[%s5511_s7 + $0x90] sm:$0xff]  ;;  %v3784_v59 = vld [vmem:[%s5511_s7 + $0xc8] sm:$0xff] }
 0x356   : > { %v1536_v0 = vpop.f32.mrf.mxu3  ;;  %2893 = vmatpush.bf16.msrb.mxu2 %v3785_v54  ;;  %2804 = vmatpush.bf16.msrb.mxu1 %v3777_v22  ;;  %v4986_v54 = vpop.f32.mrf.mxu1 }
 0x357   : > { %5565 = vst [vmem:[#allocation21_spill] sm:$0xff] %v4952_v7  ;;  %v1537_v57 = vadd.f32 %v1536_v0, %v4640_v36  ;;  %v3767_v7 = vld [vmem:[%s5511_s7 + $0x40] sm:$0xff] }
 0x358   : > { %v4959_v34 = vpop.f32.mrf.mxu2  ;;  %2717 = vmatpush.bf16.msrb.mxu0 %v3767_v7 }
 0x359   : > { %v1626_v4 = vadd.f32 %v4761_v3, %v1537_v57  ;;  %v3783_v3 = vld [vmem:[%s5511_s7 + $0xc0] sm:$0xff] }
 0x35a   : > { %v4971_v53 = vpop.f32.mrf.mxu0  ;;  %2894 = vmatpush.bf16.msrb.mxu2 %v3784_v59  ;;  %2805 = vmatpush.bf16.msrb.mxu1 %v3776_v28  ;;  %v3775_v59 = vld [vmem:[%s5511_s7 + $0x80] sm:$0xff] }
 0x35b   : > { %v2281_v57 = vmax.f32 %v1626_v4, 0.0 }
 0x35e   : > { %v1538_v31 = vpop.f32.mrf.mxu3  ;;  %2895 = vmatpush.bf16.msrb.mxu2 %v3783_v3  ;;  %2806 = vmatpush.bf16.msrb.mxu1 %v3775_v59 }
 0x35f   : > { %v1539_v0 = vadd.f32 %v1538_v31, %v4640_v36 }
 0x360   : > { %v4984_v12 = vpop.f32.mrf.mxu2 }
 0x361   : > { %v1628_v22 = vadd.f32 %v4772_v15, %v1539_v0 }
 0x362   : > { %v5004_v4 = vpop.f32.mrf.mxu0 }
 0x363   : > { %v2285_v17 = vmax.f32 %v1628_v22, 0.0  ;;  %1856 = vmatmul.bf16.gmra.mxu3 %v4443_v38  ;;  %2074 = vmatmul.bf16.gmra.mxu1 %v4612_v55  ;;  %v5008_v38 = vpop.f32.mrf.mxu1 }
 0x365   : > { %1980 = vmatmul.bf16.gmra.mxu0 %v4614_v24  ;;  %2158 = vmatmul.bf16.gmra.mxu2 %v4614_v24  ;;  %v5002_v15 = vpack.c.bf16 %v2285_v17, %v2281_v57 }
 0x366   : > { %v1541_v31 = vpop.f32.mrf.mxu3 }
 0x367   : > { %5566 = vst [vmem:[#allocation34_spill] sm:$0xff] %v5002_v15  ;;  %v1542_v28 = vadd.f32 %v1541_v31, %v4640_v36  ;;  %v3761_v15 = vld [vmem:[%s5511_s7 + $0x10] sm:$0xff] }
 0x368   : > { %v5006_v0 = vpop.f32.mrf.mxu2  ;;  %2626 = vmatpush.bf16.msrb.mxu3 %v3761_v15 }
 0x369   : > { %v1631_v7 = vadd.f32 %v4779_v18, %v1542_v28 }
 0x36a   : > { %v5013_v21 = vpop.f32.mrf.mxu0 }
 0x36b   : > { %v2289_v17 = vmax.f32 %v1631_v7, 0.0  ;;  %v5022_v31 = vpop.f32.mrf.mxu1 }
 0x36e   : > { %v1543_v22 = vpop.f32.mrf.mxu3 }
 0x36f   : > { %v1544_v3 = vadd.f32 %v1543_v22, %v4640_v36 }
 0x370   : > { %v5016_v57 = vpop.f32.mrf.mxu2 }
 0x371   : > { %v1633_v24 = vadd.f32 %v4793_v27, %v1544_v3  ;;  %v5029_v27 = vperm.slane %v4812_v8, 2 }
 0x372   : > { %v5031_v28 = vpop.f32.mrf.mxu0 }
 0x373   : > { %v2293_v59 = vmax.f32 %v1633_v24, 0.0  ;;  %1861 = vmatmul.bf16.gmra.mxu3 %v4466_v5  ;;  %v5036_v3 = vpop.f32.mrf.mxu1 }
 0x375   : > { %1985 = vmatmul.bf16.gmra.mxu0 %v4628_v13  ;;  %2163 = vmatmul.bf16.gmra.mxu2 %v4628_v13  ;;  %v5026_v36 = vpack.c.bf16 %v2293_v59, %v2289_v17 }
 0x376   : > { %v1822_v18 = vpop.f32.mrf.mxu3 }
 0x377   : > { %5567 = vst [vmem:[#allocation35_spill] sm:$0xff] %v5026_v36  ;;  %v1823_v5 = vadd.f32 %v1822_v18, %v5029_v27  ;;  %v5568_v18 = vld [vmem:[#allocation15_spill] sm:$0xff] }
 0x378   : > { %v5034_v22 = vpop.f32.mrf.mxu2 }
 0x379   : > { %v1912_v24 = vadd.f32 %v4817_v11, %v1823_v5 }
 0x37a   : > { %v5042_v8 = vpop.f32.mrf.mxu0 }
 0x37b   : > { %v2171_v59 = vmax.f32 %v1912_v24, 0.0  ;;  %v5048_v11 = vpop.f32.mrf.mxu1 }
 0x37e   : > { %v1824_v7 = vpop.f32.mrf.mxu3 }
 0x37f   : > { %v1825_v13 = vadd.f32 %v1824_v7, %v5029_v27 }
 0x380   : > { %v5044_v1 = vpop.f32.mrf.mxu2 }
 0x381   : > { %v1914_v17 = vadd.f32 %v4828_v60, %v1825_v13 }
 0x382   : > { %v5051_v7 = vpop.f32.mrf.mxu0 }
 0x383   : > { %v2175_v15 = vmax.f32 %v1914_v17, 0.0  ;;  %1866 = vmatmul.bf16.gmra.mxu3 %v4491_v61 }
 0x385   : > { %v2299_v36 = vpack.c.bf16 %v2175_v15, %v2171_v59  ;;  %2718 = vmatmul.bf16.vlgmr.msrb.gmra.mxu0 %v5568_v18  ;;  %2896 = vmatmul.bf16.vlgmr.msrb.gmra.mxu2 %v4842_v26  ;;  %v5058_v59 = vpop.f32.mrf.mxu1 }
 0x386   : > { %v1827_v51 = vpop.f32.mrf.mxu3 }
 0x387   : > { %2807 = vmatmul.bf16.vlgmr.msrb.gmra.mxu1 %v2299_v36  ;;  %v1828_v5 = vadd.f32 %v1827_v51, %v5029_v27  ;;  %v3760_v51 = vld [vmem:[%s5511_s7 + $0x8] sm:$0xff] }
 0x388   : > { %v5054_v24 = vpop.f32.mrf.mxu2  ;;  %v5569_v36 = vld [vmem:[#allocation16_spill] sm:$0xff]  ;;  %2627 = vmatpush.bf16.msrb.mxu3 %v3760_v51 }
 0x389   : > { %v1917_v61 = vadd.f32 %v4835_v16, %v1828_v5 }
 0x38a   : > { %v5066_v5 = vpop.f32.mrf.mxu0 }
 0x38b   : > { %v2179_v26 = vmax.f32 %v1917_v61, 0.0 }
 0x38d   : > { %v5071_v61 = vpop.f32.mrf.mxu1 }
 0x38e   : > { %v1829_v60 = vpop.f32.mrf.mxu3 }
 0x38f   : > { %v1830_v13 = vadd.f32 %v1829_v60, %v5029_v27 }
 0x391   : > { %v1919_v17 = vadd.f32 %v4849_v35, %v1830_v13  ;;  %v5068_v35 = vpop.f32.mrf.mxu2 }
 0x393   : > { %v2183_v15 = vmax.f32 %v1919_v17, 0.0  ;;  %1871 = vmatmul.bf16.gmra.mxu3 %v4512_v23 }
 0x395   : > { %2723 = vmatmul.bf16.gmra.mxu0 %v5569_v36  ;;  %2901 = vmatmul.bf16.gmra.mxu2 %v4871_v32  ;;  %v2303_v16 = vpack.c.bf16 %v2183_v15, %v2179_v26  ;;  %v5076_v32 = vpop.f32.mrf.mxu0  ;;  %v5083_v52 = vpop.f32.mrf.mxu1 }
 0x396   : > { %v1832_v18 = vpop.f32.mrf.mxu3 }
 0x397   : > { %2812 = vmatmul.bf16.gmra.mxu1 %v2303_v16  ;;  %v1833_v60 = vadd.f32 %v1832_v18, %v5029_v27  ;;  %v5570_v16 = vld [vmem:[#allocation17_spill] sm:$0xff] }
 0x399   : > { %v1922_v13 = vadd.f32 %v4865_v48, %v1833_v60  ;;  %v5078_v15 = vpop.f32.mrf.mxu2 }
 0x39b   : > { %v2187_v26 = vmax.f32 %v1922_v13, 0.0 }
 0x39e   : > { %v1834_v23 = vpop.f32.mrf.mxu3 }
 0x39f   : > { %v1835_v17 = vadd.f32 %v1834_v23, %v5029_v27 }
 0x3a1   : > { %v1924_v36 = vadd.f32 %v4876_v25, %v1835_v17  ;;  %v5086_v25 = vpop.f32.mrf.mxu0  ;;  %v5088_v60 = vpop.f32.mrf.mxu2 }
 0x3a2   : > { %v5092_v17 = vpop.f32.mrf.mxu1 }
 0x3a3   : > { %v2191_v51 = vmax.f32 %v1924_v36, 0.0  ;;  %1876 = vmatmul.bf16.gmra.mxu3 %v4531_v37 }
 0x3a5   : > { %2728 = vmatmul.bf16.gmra.mxu0 %v5570_v16  ;;  %2906 = vmatmul.bf16.gmra.mxu2 %v4892_v10  ;;  %v2307_v18 = vpack.c.bf16 %v2191_v51, %v2187_v26  ;;  %v5571_v51 = vld [vmem:[#allocation18_spill] sm:$0xff] }
 0x3a6   : > { %v1837_v47 = vpop.f32.mrf.mxu3 }
 0x3a7   : > { %2817 = vmatmul.bf16.gmra.mxu1 %v2307_v18  ;;  %v1838_v48 = vadd.f32 %v1837_v47, %v5029_v27  ;;  %v3759_v47 = vld [vmem:[%s5511_s7] sm:$0xff] }
 0x3a8   : > { %2628 = vmatpush.bf16.msrb.mxu3 %v3759_v47 }
 0x3a9   : > { %v1927_v13 = vadd.f32 %v4883_v43, %v1838_v48  ;;  %v5101_v18 = vpop.f32.mrf.mxu0  ;;  %v5103_v48 = vpop.f32.mrf.mxu2 }
 0x3ab   : > { %v2195_v36 = vmax.f32 %v1927_v13, 0.0  ;;  %v5110_v13 = vpop.f32.mrf.mxu1 }
 0x3ae   : > { %v1839_v23 = vpop.f32.mrf.mxu3 }
 0x3af   : > { %v1840_v37 = vadd.f32 %v1839_v23, %v5029_v27 }
 0x3b1   : > { %v1929_v10 = vadd.f32 %v4897_v20, %v1840_v37  ;;  %v2023_v20 = vadd.f32 %v4930_v2, %v4815_v49  ;;  %v5118_v2 = vpop.f32.mrf.mxu2 }
 0x3b3   : > { %v2199_v26 = vmax.f32 %v1929_v10, 0.0  ;;  %1881 = vmatmul.bf16.gmra.mxu3 %v4552_v58  ;;  %v2021_v58 = vadd.f32 %v4915_v50, %v4815_v49  ;;  %v2112_v23 = vadd.f32 %v4934_v6, %v2023_v20  ;;  %v5122_v56 = vpop.f32.mrf.mxu1 }
 0x3b5   : > { %2733 = vmatmul.bf16.gmra.mxu0 %v5571_v51  ;;  %2911 = vmatmul.bf16.gmra.mxu2 %v4921_v45  ;;  %v2311_v16 = vpack.c.bf16 %v2199_v26, %v2195_v36  ;;  %v2110_v37 = vadd.f32 %v4925_v44, %v2021_v58  ;;  %v2208_v36 = vmax.f32 %v2112_v23, 0.0  ;;  %v5572_v44 = vld [vmem:[#allocation20_spill] sm:$0xff]  ;;  %v2028_v23 = vadd.f32 %v4986_v54, %v4815_v49 }
 0x3b6   : > { %v1842_v43 = vpop.f32.mrf.mxu3 }
 0x3b7   : > { %2822 = vmatmul.bf16.gmra.mxu1 %v2311_v16  ;;  %v1843_v45 = vadd.f32 %v1842_v43, %v5029_v27  ;;  %v2204_v51 = vmax.f32 %v2110_v37, 0.0  ;;  %v5116_v16 = vpop.f32.mrf.mxu0 }
 0x3b9   : > { %v1932_v26 = vadd.f32 %v4913_v14, %v1843_v45  ;;  %v2316_v43 = vpack.c.bf16 %v2208_v36, %v2204_v51  ;;  %v2026_v45 = vadd.f32 %v4954_v62, %v4815_v49 }
 0x3bb   : > { %v2203_v6 = vmax.f32 %v1932_v26, 0.0  ;;  %v2115_v36 = vadd.f32 %v4959_v34, %v2026_v45  ;;  %v5136_v51 = vpop.f32.mrf.mxu1  ;;  %v5573_v34 = vld [vmem:[#allocation22_spill] sm:$0xff] }
 0x3be   : > { %v1844_v10 = vpop.f32.mrf.mxu3 }
 0x3bf   : > { %v1845_v47 = vadd.f32 %v1844_v10, %v5029_v27  ;;  %v5130_v37 = vpop.f32.mrf.mxu0 }
 0x3c1   : > { %v1934_v50 = vadd.f32 %v4927_v41, %v1845_v47  ;;  %v2117_v41 = vadd.f32 %v4984_v12, %v2028_v23 }
 0x3c3   : > { %v2207_v20 = vmax.f32 %v1934_v50, 0.0  ;;  %1886 = vmatmul.bf16.gmra.mxu3 %v4568_v46  ;;  %v5132_v46 = vpop.f32.mrf.mxu2  ;;  %v2216_v47 = vmax.f32 %v2117_v41, 0.0  ;;  %v5149_v45 = vpop.f32.mrf.mxu1 }
 0x3c5   : > { %2738 = vmatmul.bf16.gmra.mxu0 %v5572_v44  ;;  %2916 = vmatmul.bf16.gmra.mxu2 %v2316_v43  ;;  %v2315_v14 = vpack.c.bf16 %v2207_v20, %v2203_v6  ;;  %v2212_v6 = vmax.f32 %v2115_v36, 0.0 }
 0x3c6   : > { %v1847_v58 = vpop.f32.mrf.mxu3 }
 0x3c7   : > { %2827 = vmatmul.bf16.gmra.mxu1 %v2315_v14  ;;  %v1848_v10 = vadd.f32 %v1847_v58, %v5029_v27  ;;  %v2320_v43 = vpack.c.bf16 %v2216_v47, %v2212_v6  ;;  %v5142_v44 = vpop.f32.mrf.mxu0 }
 0x3c9   : > { %v1937_v50 = vadd.f32 %v4937_v39, %v1848_v10  ;;  %v2033_v39 = vadd.f32 %v5022_v31, %v4815_v49 }
 0x3cb   : > { %v2211_v12 = vmax.f32 %v1937_v50, 0.0  ;;  %v5144_v14 = vpop.f32.mrf.mxu2 }
 0x3ce   : > { %v1849_v26 = vpop.f32.mrf.mxu3 }
 0x3cf   : > { %v1850_v54 = vadd.f32 %v1849_v26, %v5029_v27  ;;  %v5156_v47 = vpop.f32.mrf.mxu0 }
 0x3d1   : > { %v1939_v62 = vadd.f32 %v4971_v53, %v1850_v54  ;;  %v2031_v53 = vadd.f32 %v5008_v38, %v4815_v49  ;;  %v5163_v38 = vpop.f32.mrf.mxu1 }
 0x3d3   : > { %v2215_v20 = vmax.f32 %v1939_v62, 0.0  ;;  %1891 = vmatmul.bf16.gmra.mxu3 %v4590_v33  ;;  %v2122_v33 = vadd.f32 %v5016_v57, %v2033_v39  ;;  %v2120_v10 = vadd.f32 %v5006_v0, %v2031_v53  ;;  %v5158_v50 = vpop.f32.mrf.mxu2 }
 0x3d5   : > { %2743 = vmatmul.bf16.gmra.mxu0 %v5573_v34  ;;  %2921 = vmatmul.bf16.gmra.mxu2 %v2320_v43  ;;  %v2319_v58 = vpack.c.bf16 %v2215_v20, %v2211_v12  ;;  %v2224_v26 = vmax.f32 %v2122_v33, 0.0  ;;  %v2220_v6 = vmax.f32 %v2120_v10, 0.0 }
 0x3d6   : > { %v1852_v23 = vpop.f32.mrf.mxu3 }
 0x3d7   : > { %2832 = vmatmul.bf16.gmra.mxu1 %v2319_v58  ;;  %v1853_v41 = vadd.f32 %v1852_v23, %v5029_v27  ;;  %v2324_v0 = vpack.c.bf16 %v2224_v26, %v2220_v6  ;;  %v5169_v34 = vpop.f32.mrf.mxu0 }
 0x3d9   : > { %v1942_v54 = vadd.f32 %v5004_v4, %v1853_v41  ;;  %v2038_v4 = vadd.f32 %v5048_v11, %v4815_v49  ;;  %v5178_v39 = vpop.f32.mrf.mxu1 }
 0x3db   : > { %v2219_v57 = vmax.f32 %v1942_v54, 0.0  ;;  %v5171_v58 = vpop.f32.mrf.mxu2  ;;  %v2127_v23 = vadd.f32 %v5044_v1, %v2038_v4 }
 0x3dd   : > { %v2232_v33 = vmax.f32 %v2127_v23, 0.0 }
 0x3de   : > { %v1854_v36 = vpop.f32.mrf.mxu3 }
 0x3df   : > { %v1855_v31 = vadd.f32 %v1854_v36, %v5029_v27  ;;  %v5183_v26 = vpop.f32.mrf.mxu0 }
 0x3e1   : > { %v1944_v62 = vadd.f32 %v5013_v21, %v1855_v31  ;;  %v2036_v21 = vadd.f32 %v5036_v3, %v4815_v49 }
 0x3e3   : > { %v2223_v12 = vmax.f32 %v1944_v62, 0.0  ;;  %1896 = vmatmul.bf16.gmra.mxu3 %v4612_v55  ;;  %v5185_v3 = vpop.f32.mrf.mxu2  ;;  %v2041_v62 = vadd.f32 %v5058_v59, %v4815_v49 }
 0x3e5   : > { %2748 = vmatmul.bf16.gmra.mxu0 %v4618_v40  ;;  %2926 = vmatmul.bf16.gmra.mxu2 %v2324_v0  ;;  %v2323_v20 = vpack.c.bf16 %v2223_v12, %v2219_v57  ;;  %v2125_v40 = vadd.f32 %v5034_v22, %v2036_v21 }
 0x3e6   : > { %v1857_v43 = vpop.f32.mrf.mxu3 }
 0x3e7   : > { %2837 = vmatmul.bf16.gmra.mxu1 %v2323_v20  ;;  %v1858_v55 = vadd.f32 %v1857_v43, %v5029_v27  ;;  %v2228_v10 = vmax.f32 %v2125_v40, 0.0  ;;  %v5198_v0 = vpop.f32.mrf.mxu0  ;;  %v5574_v40 = vld [vmem:[#allocation23_spill] sm:$0xff] }
 0x3e9   : > { %v1947_v41 = vadd.f32 %v5031_v28, %v1858_v55  ;;  %v2328_v22 = vpack.c.bf16 %v2232_v33, %v2228_v10  ;;  %v5189_v28 = vpop.f32.mrf.mxu1 }
 0x3eb   : > { %v2227_v1 = vmax.f32 %v1947_v41, 0.0 }
 0x3ee   : > { %v1859_v53 = vpop.f32.mrf.mxu3 }
 0x3ef   : > { %v1860_v11 = vadd.f32 %v1859_v53, %v5029_v27  ;;  %v5209_v41 = vpop.f32.mrf.mxu0 }
 0x3f1   : > { %v1949_v36 = vadd.f32 %v5042_v8, %v1860_v11  ;;  %v2043_v8 = vadd.f32 %v5071_v61, %v4815_v49  ;;  %v5204_v23 = vpop.f32.mrf.mxu1  ;;  %v2048_v11 = vadd.f32 %v5092_v17, %v4815_v49 }
 0x3f3   : > { %v2231_v54 = vmax.f32 %v1949_v36, 0.0  ;;  %2629 = vmatmul.bf16.vlgmr.msrb.gmra.mxu3 %v4653_v30  ;;  %v2132_v57 = vadd.f32 %v5068_v35, %v2043_v8  ;;  %v2130_v30 = vadd.f32 %v5054_v24, %v2041_v62  ;;  %v2137_v10 = vadd.f32 %v5088_v60, %v2048_v11 }
 0x3f5   : > { %2753 = vmatmul.bf16.gmra.mxu0 %v4634_v19  ;;  %2931 = vmatmul.bf16.gmra.mxu2 %v2328_v22  ;;  %v2327_v31 = vpack.c.bf16 %v2231_v54, %v2227_v1  ;;  %v5200_v19 = vpop.f32.mrf.mxu2  ;;  %v2240_v43 = vmax.f32 %v2132_v57, 0.0  ;;  %v2236_v61 = vmax.f32 %v2130_v30, 0.0  ;;  %v2248_v22 = vmax.f32 %v2137_v10, 0.0 }
 0x3f6   : > { %v1862_v6 = vpop.f32.mrf.mxu3 }
 0x3f7   : > { %2842 = vmatmul.bf16.gmra.mxu1 %v2327_v31  ;;  %v1863_v12 = vadd.f32 %v1862_v6, %v5029_v27  ;;  %v2332_v24 = vpack.c.bf16 %v2240_v43, %v2236_v61  ;;  %v5224_v62 = vpop.f32.mrf.mxu0  ;;  %v2051_v43 = vadd.f32 %v5110_v13, %v4815_v49 }
 0x3f9   : > { %v1952_v4 = vadd.f32 %v5051_v7, %v1863_v12 }
 0x3fb   : > { %v2235_v35 = vmax.f32 %v1952_v4, 0.0 }
 0x3fd   : > { %v5211_v7 = vpop.f32.mrf.mxu2 }
 0x3fe   : > { %v1864_v20 = vpop.f32.mrf.mxu3 }
 0x3ff   : > { %v1865_v21 = vadd.f32 %v1864_v20, %v5029_v27  ;;  %v2053_v20 = vadd.f32 %v5122_v56, %v4815_v49  ;;  %v5238_v4 = vpop.f32.mrf.mxu0 }
 0x401   : > { %v1954_v59 = vadd.f32 %v5066_v5, %v1865_v21  ;;  %v2046_v5 = vadd.f32 %v5083_v52, %v4815_v49 }
 0x403   : > { %v2239_v55 = vmax.f32 %v1954_v59, 0.0  ;;  %2634 = vmatmul.bf16.gmra.mxu3 %v4673_v29  ;;  %v5218_v29 = vpop.f32.mrf.mxu1  ;;  %v2135_v1 = vadd.f32 %v5078_v15, %v2046_v5 }
 0x405   : > { %2758 = vmatmul.bf16.gmra.mxu0 %v5574_v40  ;;  %2936 = vmatmul.bf16.gmra.mxu2 %v2332_v24  ;;  %v2331_v53 = vpack.c.bf16 %v2239_v55, %v2235_v35  ;;  %v2244_v8 = vmax.f32 %v2135_v1, 0.0  ;;  %v5226_v17 = vpop.f32.mrf.mxu2 }
 0x406   : > { %v1867_v33 = vpop.f32.mrf.mxu3 }
 0x407   : > { %2847 = vmatmul.bf16.gmra.mxu1 %v2331_v53  ;;  %v1868_v36 = vadd.f32 %v1867_v33, %v5029_v27  ;;  %v2336_v12 = vpack.c.bf16 %v2248_v22, %v2244_v8  ;;  %v5575_v53 = vld [vmem:[#allocation26_spill] sm:$0xff]  ;;  %v5250_v11 = vpop.f32.mrf.mxu0 }
 0x409   : > { %v1957_v31 = vadd.f32 %v5076_v32, %v1868_v36 }
 0x40b   : > { %v2243_v60 = vmax.f32 %v1957_v31, 0.0  ;;  %v5230_v30 = vpop.f32.mrf.mxu1 }
 0x40e   : > { %v1869_v54 = vpop.f32.mrf.mxu3 }
 0x40f   : > { %v1870_v6 = vadd.f32 %v1869_v54, %v5029_v27 }
 0x411   : > { %v1959_v52 = vadd.f32 %v5086_v25, %v1870_v6  ;;  %v2142_v25 = vadd.f32 %v5118_v2, %v2053_v20  ;;  %v5577_v20 = vld [vmem:[#allocation27_spill] sm:$0xff] }
 0x413   : > { %v2247_v57 = vmax.f32 %v1959_v52, 0.0  ;;  %2639 = vmatmul.bf16.gmra.mxu3 %v4689_v9  ;;  %v5240_v9 = vpop.f32.mrf.mxu2  ;;  %v2256_v59 = vmax.f32 %v2142_v25, 0.0  ;;  %v5244_v35 = vpop.f32.mrf.mxu1 }
 0x414   : > { %v5264_v52 = vpop.f32.mrf.mxu0 }
 0x415   : > { %2763 = vmatmul.bf16.gmra.mxu0 %v4669_v63  ;;  %2941 = vmatmul.bf16.gmra.mxu2 %v2336_v12  ;;  %v2335_v32 = vpack.c.bf16 %v2247_v57, %v2243_v60  ;;  %v2140_v63 = vadd.f32 %v5103_v48, %v2051_v43  ;;  %v5576_v48 = vld [vmem:[#allocation24_spill] sm:$0xff]  ;;  %v5578_v43 = vld [vmem:[#allocation25_spill] sm:$0xff] }
 0x416   : > { %v1872_v15 = vpop.f32.mrf.mxu3 }
 0x417   : > { %2852 = vmatmul.bf16.gmra.mxu1 %v2335_v32  ;;  %v1873_v21 = vadd.f32 %v1872_v15, %v5029_v27  ;;  %v2252_v24 = vmax.f32 %v2140_v63, 0.0 }
 0x419   : > { %v1962_v55 = vadd.f32 %v5101_v18, %v1873_v21  ;;  %v2340_v33 = vpack.c.bf16 %v2256_v59, %v2252_v24  ;;  %v2058_v18 = vadd.f32 %v5149_v45, %v4815_v49 }
 0x41b   : > { %v2251_v2 = vmax.f32 %v1962_v55, 0.0  ;;  %v5252_v5 = vpop.f32.mrf.mxu2  ;;  %v5257_v1 = vpop.f32.mrf.mxu1  ;;  %v2147_v54 = vadd.f32 %v5144_v14, %v2058_v18 }
 0x41c   : > { %v5277_v63 = vpop.f32.mrf.mxu0 }
 0x41d   : > { %v2264_v8 = vmax.f32 %v2147_v54, 0.0 }
 0x41e   : > { %v1874_v61 = vpop.f32.mrf.mxu3 }
 0x41f   : > { %v1875_v56 = vadd.f32 %v1874_v61, %v5029_v27 }
 0x421   : > { %v1964_v13 = vadd.f32 %v5116_v16, %v1875_v56  ;;  %v2056_v16 = vadd.f32 %v5136_v51, %v4815_v49 }
 0x423   : > { %v2255_v40 = vmax.f32 %v1964_v13, 0.0  ;;  %2644 = vmatmul.bf16.gmra.mxu3 %v5575_v53  ;;  %v2145_v31 = vadd.f32 %v5132_v46, %v2056_v16  ;;  %v5266_v60 = vpop.f32.mrf.mxu2  ;;  %v5270_v32 = vpop.f32.mrf.mxu1 }
 0x425   : > { %2768 = vmatmul.bf16.gmra.mxu0 %v5576_v48  ;;  %2946 = vmatmul.bf16.gmra.mxu2 %v2340_v33  ;;  %v2339_v10 = vpack.c.bf16 %v2255_v40, %v2251_v2  ;;  %v2260_v12 = vmax.f32 %v2145_v31, 0.0  ;;  %v5291_v48 = vpop.f32.mrf.mxu0 }
 0x426   : > { %v1877_v36 = vpop.f32.mrf.mxu3 }
 0x427   : > { %2857 = vmatmul.bf16.gmra.mxu1 %v2339_v10  ;;  %v1878_v22 = vadd.f32 %v1877_v36, %v5029_v27  ;;  %v2344_v46 = vpack.c.bf16 %v2264_v8, %v2260_v12  ;;  %v5579_v36 = vld [vmem:[#allocation28_spill] sm:$0xff] }
 0x429   : > { %v1967_v57 = vadd.f32 %v5130_v37, %v1878_v22  ;;  %v2063_v37 = vadd.f32 %v5178_v39, %v4815_v49  ;;  %v2066_v22 = vadd.f32 %v5189_v28, %v4815_v49 }
 0x42b   : > { %v2259_v14 = vmax.f32 %v1967_v57, 0.0  ;;  %v5279_v61 = vpop.f32.mrf.mxu2  ;;  %v2152_v59 = vadd.f32 %v5171_v58, %v2063_v37  ;;  %v5284_v55 = vpop.f32.mrf.mxu1  ;;  %v2155_v8 = vadd.f32 %v5185_v3, %v2066_v22 }
 0x42d   : > { %v2272_v2 = vmax.f32 %v2152_v59, 0.0  ;;  %v5306_v57 = vpop.f32.mrf.mxu0 }
 0x42e   : > { %v1879_v6 = vpop.f32.mrf.mxu3 }
 0x42f   : > { %v1880_v45 = vadd.f32 %v1879_v6, %v5029_v27 }
 0x431   : > { %v1969_v51 = vadd.f32 %v5142_v44, %v1880_v45  ;;  %v2061_v44 = vadd.f32 %v5163_v38, %v4815_v49 }
 0x433   : > { %v2263_v15 = vmax.f32 %v1969_v51, 0.0  ;;  %2649 = vmatmul.bf16.gmra.mxu3 %v5577_v20  ;;  %v2150_v24 = vadd.f32 %v5158_v50, %v2061_v44  ;;  %v5293_v38 = vpop.f32.mrf.mxu2  ;;  %v5296_v16 = vpop.f32.mrf.mxu1  ;;  %v5580_v50 = vld [vmem:[#allocation29_spill] sm:$0xff]  ;;  %v2276_v20 = vmax.f32 %v2155_v8, 0.0 }
 0x435   : > { %2773 = vmatmul.bf16.gmra.mxu0 %v5578_v43  ;;  %2951 = vmatmul.bf16.gmra.mxu2 %v2344_v46  ;;  %v2343_v25 = vpack.c.bf16 %v2263_v15, %v2259_v14  ;;  %v2268_v53 = vmax.f32 %v2150_v24, 0.0  ;;  %v5581_v43 = vld [vmem:[#allocation30_spill] sm:$0xff]  ;;  %v5317_v37 = vpop.f32.mrf.mxu0 }
 0x436   : > { %v1882_v21 = vpop.f32.mrf.mxu3 }
 0x437   : > { %2862 = vmatmul.bf16.gmra.mxu1 %v2343_v25  ;;  %v1883_v56 = vadd.f32 %v1882_v21, %v5029_v27  ;;  %v2348_v18 = vpack.c.bf16 %v2272_v2, %v2268_v53 }
 0x439   : > { %v1972_v40 = vadd.f32 %v5156_v47, %v1883_v56 }
 0x43b   : > { %v2267_v58 = vmax.f32 %v1972_v40, 0.0  ;;  %v5308_v45 = vpop.f32.mrf.mxu2  ;;  %v5310_v14 = vpop.f32.mrf.mxu1 }
 0x43e   : > { %v1884_v13 = vpop.f32.mrf.mxu3 }
 0x43f   : > { %v1885_v39 = vadd.f32 %v1884_v13, %v5029_v27 }
 0x441   : > { %v1974_v33 = vadd.f32 %v5169_v34, %v1885_v39  ;;  %v2068_v34 = vadd.f32 %v5204_v23, %v4815_v49 }
 0x443   : > { %v2271_v10 = vmax.f32 %v1974_v33, 0.0  ;;  %2654 = vmatmul.bf16.gmra.mxu3 %v5579_v36  ;;  %v2157_v31 = vadd.f32 %v5200_v19, %v2068_v34  ;;  %v5319_v44 = vpop.f32.mrf.mxu2  ;;  %v5323_v59 = vpop.f32.mrf.mxu1  ;;  %v5582_v36 = vld [vmem:[#allocation31_spill] sm:$0xff] }
 0x444   : > { %v5332_v33 = vpop.f32.mrf.mxu0 }
 0x445   : > { %2778 = vmatmul.bf16.gmra.mxu0 %v5580_v50  ;;  %2956 = vmatmul.bf16.gmra.mxu2 %v2348_v18  ;;  %v2347_v47 = vpack.c.bf16 %v2271_v10, %v2267_v58  ;;  %v2280_v51 = vmax.f32 %v2157_v31, 0.0  ;;  %v5583_v18 = vld [vmem:[#allocation32_spill] sm:$0xff] }
 0x446   : > { %v1887_v54 = vpop.f32.mrf.mxu3 }
 0x447   : > { %2867 = vmatmul.bf16.gmra.mxu1 %v2347_v47  ;;  %v1888_v6 = vadd.f32 %v1887_v54, %v5029_v27  ;;  %v2352_v3 = vpack.c.bf16 %v2280_v51, %v2276_v20  ;;  %v2078_v47 = vadd.f32 %v5257_v1, %v4815_v49  ;;  %v2076_v54 = vadd.f32 %v5244_v35, %v4815_v49  ;;  %v5584_v20 = vld [vmem:[#allocation11_spill] sm:$0xff] }
 0x449   : > { %v1977_v15 = vadd.f32 %v5183_v26, %v1888_v6  ;;  %v2073_v26 = vadd.f32 %v5230_v30, %v4815_v49  ;;  %v2165_v6 = vadd.f32 %v5240_v9, %v2076_v54  ;;  %v5361_v9 = vld [vmem:[%s5512_s8] ss:$0 sm:$0xff] }
 0x44b   : > { %v2275_v19 = vmax.f32 %v1977_v15, 0.0  ;;  %v5334_v30 = vpop.f32.mrf.mxu2 }
 0x44c   : > { %v5346_v34 = vpop.f32.mrf.mxu0 }
 0x44e   : > { %v1889_v12 = vpop.f32.mrf.mxu3 }
 0x44f   : > { %v1890_v23 = vadd.f32 %v1889_v12, %v5029_v27 }
 0x451   : > { %v1979_v28 = vadd.f32 %v5198_v0, %v1890_v23  ;;  %v2071_v0 = vadd.f32 %v5218_v29, %v4815_v49  ;;  %v5337_v29 = vpop.f32.mrf.mxu1  ;;  %v2292_v49 = vmax.f32 %v2165_v6, 0.0 }
 0x453   : > { %v2279_v46 = vmax.f32 %v1979_v28, 0.0  ;;  %2659 = vmatmul.bf16.gmra.mxu3 %v4767_v42  ;;  %v2162_v42 = vadd.f32 %v5226_v17, %v2073_v26  ;;  %v2160_v24 = vadd.f32 %v5211_v7, %v2071_v0  ;;  %v5348_v22 = vpop.f32.mrf.mxu2 }
 0x455   : > { %2783 = vmatmul.bf16.gmra.mxu0 %v5581_v43  ;;  %2961 = vmatmul.bf16.gmra.mxu2 %v2352_v3  ;;  %v2351_v25 = vpack.c.bf16 %v2279_v46, %v2275_v19  ;;  %v2288_v2 = vmax.f32 %v2162_v42, 0.0  ;;  %v2284_v53 = vmax.f32 %v2160_v24, 0.0  ;;  %v5363_v19 = vpop.f32.mrf.mxu0 }
 0x456   : > { %v1892_v21 = vpop.f32.mrf.mxu3 }
 0x457   : > { %2872 = vmatmul.bf16.gmra.mxu1 %v2351_v25  ;;  %v1893_v56 = vadd.f32 %v1892_v21, %v5029_v27  ;;  %v2356_v7 = vpack.c.bf16 %v2288_v2, %v2284_v53 }
 0x459   : > { %v1982_v40 = vadd.f32 %v5209_v41, %v1893_v56  ;;  %v5352_v8 = vpop.f32.mrf.mxu1 }
 0x45b   : > { %v2283_v17 = vmax.f32 %v1982_v40, 0.0  ;;  %v5365_v46 = vpop.f32.mrf.mxu2 }
 0x45d   : > { %v2739_v40 = vpop.f32.mrf.mxu0 }
 0x45e   : > { %v1894_v13 = vpop.f32.mrf.mxu3 }
 0x45f   : > { %v1895_v39 = vadd.f32 %v1894_v13, %v5029_v27  ;;  %v5586_v13 = vld [vmem:[#allocation12_spill] sm:$0xff] }
 0x461   : > { %v1984_v58 = vadd.f32 %v5224_v62, %v1895_v39  ;;  %v2167_v62 = vadd.f32 %v5252_v5, %v2078_v47  ;;  %v5369_v3 = vpop.f32.mrf.mxu1 }
 0x463   : > { %v2287_v10 = vmax.f32 %v1984_v58, 0.0  ;;  %2664 = vmatmul.bf16.gmra.mxu3 %v5582_v36  ;;  %v2296_v51 = vmax.f32 %v2167_v62, 0.0  ;;  %v5587_v36 = vld [vmem:[#allocation13_spill] sm:$0xff] }
 0x465   : > { %2788 = vmatmul.bf16.gmra.mxu0 %v5583_v18  ;;  %2966 = vmatmul.bf16.gmra.mxu2 %v2356_v7  ;;  %v2355_v41 = vpack.c.bf16 %v2287_v10, %v2283_v17  ;;  %v2360_v28 = vpack.c.bf16 %v2296_v51, %v2292_v49  ;;  %v5588_v51 = vld [vmem:[#allocation14_spill] sm:$0xff] }
 0x466   : > { %v1897_v50 = vpop.f32.mrf.mxu3 }
 0x467   : > { %2877 = vmatmul.bf16.gmra.mxu1 %v2355_v41  ;;  %v1898_v31 = vadd.f32 %v1897_v50, %v5029_v27 }
 0x469   : > { %v1987_v1 = vadd.f32 %v5238_v4, %v1898_v31  ;;  %v5585_v4 = vld [vmem:[#allocation33_spill] sm:$0xff]  ;;  %v2828_v53 = vpop.f32.mrf.mxu1 }
 0x46b   : > { %v2291_v5 = vmax.f32 %v1987_v1, 0.0 }
 0x46e   : > { %v1899_v12 = vpop.f32.mrf.mxu3 }
 0x46f   : > { %v1900_v15 = vadd.f32 %v1899_v12, %v5029_v27 }
 0x471   : > { %v1989_v35 = vadd.f32 %v5250_v11, %v1900_v15  ;;  %v2830_v18 = vpop.f32.mrf.mxu1 }
 0x473   : > { %v2295_v23 = vmax.f32 %v1989_v35, 0.0  ;;  %2669 = vmatmul.bf16.gmra.mxu3 %v5584_v20 }
 0x475   : > { %2793 = vmatmul.bf16.gmra.mxu0 %v5585_v4  ;;  %2971 = vmatmul.bf16.gmra.mxu2 %v2360_v28  ;;  %v2359_v27 = vpack.c.bf16 %v2295_v23, %v2291_v5  ;;  %v5589_v4 = vld [vmem:[#allocation19_spill] sm:$0xff] }
 0x476   : > { %v2630_v11 = vpop.f32.mrf.mxu3 }
 0x477   : > { %v2631_v43 = vadd.f32 %v5361_v9, %v2630_v11  ;;  %2882 = vmatmul.bf16.gmra.mxu1 %v2359_v27 }
 0x479   : > { %v2720_v25 = vadd.f32 %v5264_v52, %v2631_v43  ;;  %v2833_v31 = vpop.f32.mrf.mxu1 }
 0x47b   : > { %v2809_v21 = vadd.f32 %v5270_v32, %v2720_v25 }
 0x47d   : > { %v2898_v26 = vadd.f32 %v5266_v60, %v2809_v21 }
 0x47e   : > { %v2632_v0 = vpop.f32.mrf.mxu3 }
 0x47f   : > { %2977 = vst [vmem:[%s5377_s29] sm:$0xff] %v2898_v26  ;;  %v2633_v42 = vadd.f32 %v5361_v9, %v2632_v0 }
 0x481   : > { %v2722_v56 = vadd.f32 %v5277_v63, %v2633_v42  ;;  %v2917_v63 = vpop.f32.mrf.mxu2  ;;  %v2835_v49 = vpop.f32.mrf.mxu1 }
 0x483   : > { %v2811_v24 = vadd.f32 %v5284_v55, %v2722_v56  ;;  %2674 = vmatmul.bf16.gmra.mxu3 %v5586_v13 }
 0x485   : > { %v2900_v52 = vadd.f32 %v5279_v61, %v2811_v24 }
 0x486   : > { %v2635_v32 = vpop.f32.mrf.mxu3 }
 0x487   : > { %2978 = vst [vmem:[%s5377_s29 + $0x8] sm:$0xff] %v2900_v52  ;;  %v2636_v60 = vadd.f32 %v5361_v9, %v2635_v32 }
 0x489   : > { %v2725_v2 = vadd.f32 %v5291_v48, %v2636_v60  ;;  %v2741_v48 = vpop.f32.mrf.mxu0  ;;  %v2919_v41 = vpop.f32.mrf.mxu2 }
 0x48b   : > { %v2814_v39 = vadd.f32 %v5296_v16, %v2725_v2 }
 0x48d   : > { %v2903_v58 = vadd.f32 %v5293_v38, %v2814_v39 }
 0x48e   : > { %v2637_v17 = vpop.f32.mrf.mxu3 }
 0x48f   : > { %2979 = vst [vmem:[%s5377_s29 + $0x10] sm:$0xff] %v2903_v58  ;;  %v2638_v55 = vadd.f32 %v5361_v9, %v2637_v17 }
 0x491   : > { %v2727_v61 = vadd.f32 %v5306_v57, %v2638_v55  ;;  %v2744_v54 = vpop.f32.mrf.mxu0  ;;  %v2922_v6 = vpop.f32.mrf.mxu2 }
 0x493   : > { %v2816_v10 = vadd.f32 %v5310_v14, %v2727_v61  ;;  %2679 = vmatmul.bf16.gmra.mxu3 %v5587_v36 }
 0x495   : > { %v2905_v7 = vadd.f32 %v5308_v45, %v2816_v10 }
 0x496   : > { %v2640_v16 = vpop.f32.mrf.mxu3 }
 0x497   : > { %2980 = vst [vmem:[%s5377_s29 + $0x18] sm:$0xff] %v2905_v7  ;;  %v2641_v38 = vadd.f32 %v5361_v9, %v2640_v16 }
 0x499   : > { %v2730_v50 = vadd.f32 %v5317_v37, %v2641_v38  ;;  %v2924_v5 = vpop.f32.mrf.mxu2 }
 0x49b   : > { %v2819_v47 = vadd.f32 %v5323_v59, %v2730_v50  ;;  %v2746_v59 = vpop.f32.mrf.mxu0 }
 0x49d   : > { %v2908_v57 = vadd.f32 %v5319_v44, %v2819_v47 }
 0x49e   : > { %v2642_v14 = vpop.f32.mrf.mxu3 }
 0x49f   : > { %2981 = vst [vmem:[%s5377_s29 + $0x20] sm:$0xff] %v2908_v57  ;;  %v2643_v62 = vadd.f32 %v5361_v9, %v2642_v14 }
 0x4a1   : > { %v2732_v45 = vadd.f32 %v5332_v33, %v2643_v62  ;;  %v2927_v11 = vpop.f32.mrf.mxu2 }
 0x4a3   : > { %v2821_v12 = vadd.f32 %v5337_v29, %v2732_v45  ;;  %2684 = vmatmul.bf16.gmra.mxu3 %v5588_v51  ;;  %v2749_v20 = vpop.f32.mrf.mxu0 }
 0x4a5   : > { %v2910_v37 = vadd.f32 %v5334_v30, %v2821_v12  ;;  %v5592_v12 = vld [vmem:[#allocation35_spill] sm:$0xff] }
 0x4a6   : > { %v2645_v1 = vpop.f32.mrf.mxu3 }
 0x4a7   : > { %2982 = vst [vmem:[%s5377_s29 + $0x28] sm:$0xff] %v2910_v37  ;;  %v2646_v44 = vadd.f32 %v5361_v9, %v2645_v1 }
 0x4a9   : > { %v2735_v15 = vadd.f32 %v5346_v34, %v2646_v44  ;;  %v2838_v34 = vpop.f32.mrf.mxu1  ;;  %v2929_v42 = vpop.f32.mrf.mxu2 }
 0x4ab   : > { %v2824_v35 = vadd.f32 %v5352_v8, %v2735_v15  ;;  %v2751_v21 = vpop.f32.mrf.mxu0 }
 0x4ad   : > { %v2913_v33 = vadd.f32 %v5348_v22, %v2824_v35 }
 0x4ae   : > { %v2647_v23 = vpop.f32.mrf.mxu3 }
 0x4af   : > { %2983 = vst [vmem:[%s5377_s29 + $0x30] sm:$0xff] %v2913_v33  ;;  %v2648_v29 = vadd.f32 %v5361_v9, %v2647_v23 }
 0x4b1   : > { %v2737_v30 = vadd.f32 %v5363_v19, %v2648_v29  ;;  %v2840_v19 = vpop.f32.mrf.mxu1  ;;  %v2932_v39 = vpop.f32.mrf.mxu2 }
 0x4b3   : > { %v2826_v28 = vadd.f32 %v5369_v3, %v2737_v30  ;;  %2689 = vmatmul.bf16.gmra.mxu3 %v5589_v4  ;;  %v2754_v52 = vpop.f32.mrf.mxu0 }
 0x4b5   : > { %v2915_v27 = vadd.f32 %v5365_v46, %v2826_v28  ;;  %v5590_v46 = vld [vmem:[#allocation21_spill] sm:$0xff] }
 0x4b6   : > { %v2650_v8 = vpop.f32.mrf.mxu3 }
 0x4b7   : > { %2984 = vst [vmem:[%s5377_s29 + $0x38] sm:$0xff] %v2915_v27  ;;  %v2651_v22 = vadd.f32 %v5361_v9, %v2650_v8 }
 0x4b9   : > { %v2740_v43 = vadd.f32 %v2739_v40, %v2651_v22  ;;  %v2843_v2 = vpop.f32.mrf.mxu1  ;;  %v2934_v7 = vpop.f32.mrf.mxu2 }
 0x4bb   : > { %v2829_v25 = vadd.f32 %v2828_v53, %v2740_v43  ;;  %v2756_v55 = vpop.f32.mrf.mxu0 }
 0x4bd   : > { %v2918_v26 = vadd.f32 %v2917_v63, %v2829_v25 }
 0x4be   : > { %v2652_v0 = vpop.f32.mrf.mxu3 }
 0x4bf   : > { %2985 = vst [vmem:[%s5377_s29 + $0x40] sm:$0xff] %v2918_v26  ;;  %v2653_v3 = vadd.f32 %v5361_v9, %v2652_v0 }
 0x4c1   : > { %v2742_v56 = vadd.f32 %v2741_v48, %v2653_v3  ;;  %v2845_v10 = vpop.f32.mrf.mxu1  ;;  %v5591_v48 = vld [vmem:[#allocation34_spill] sm:$0xff]  ;;  %v2937_v14 = vpop.f32.mrf.mxu2 }
 0x4c3   : > { %v2831_v24 = vadd.f32 %v2830_v18, %v2742_v56  ;;  %2694 = vmatmul.bf16.gmra.mxu3 %v5590_v46  ;;  %v2759_v50 = vpop.f32.mrf.mxu0 }
 0x4c5   : > { %v2920_v13 = vadd.f32 %v2919_v41, %v2831_v24 }
 0x4c6   : > { %v2655_v32 = vpop.f32.mrf.mxu3 }
 0x4c7   : > { %2986 = vst [vmem:[%s5377_s29 + $0x48] sm:$0xff] %v2920_v13  ;;  %v2656_v60 = vadd.f32 %v5361_v9, %v2655_v32 }
 0x4c9   : > { %v2745_v40 = vadd.f32 %v2744_v54, %v2656_v60  ;;  %v2848_v57 = vpop.f32.mrf.mxu1  ;;  %v2939_v15 = vpop.f32.mrf.mxu2 }
 0x4cb   : > { %v2834_v53 = vadd.f32 %v2833_v31, %v2745_v40  ;;  %v2761_v51 = vpop.f32.mrf.mxu0 }
 0x4cd   : > { %v2923_v58 = vadd.f32 %v2922_v6, %v2834_v53 }
 0x4ce   : > { %v2657_v63 = vpop.f32.mrf.mxu3 }
 0x4cf   : > { %2987 = vst [vmem:[%s5377_s29 + $0x50] sm:$0xff] %v2923_v58  ;;  %v2658_v17 = vadd.f32 %v5361_v9, %v2657_v63 }
 0x4d1   : > { %v2747_v61 = vadd.f32 %v2746_v59, %v2658_v17  ;;  %v2850_v1 = vpop.f32.mrf.mxu1  ;;  %v2942_v28 = vpop.f32.mrf.mxu2 }
 0x4d3   : > { %v2836_v36 = vadd.f32 %v2835_v49, %v2747_v61  ;;  %2699 = vmatmul.bf16.gmra.mxu3 %v5591_v48  ;;  %v2764_v33 = vpop.f32.mrf.mxu0 }
 0x4d5   : > { %v2925_v18 = vadd.f32 %v2924_v5, %v2836_v36 }
 0x4d6   : > { %v2660_v16 = vpop.f32.mrf.mxu3 }
 0x4d7   : > { %2988 = vst [vmem:[%s5377_s29 + $0x58] sm:$0xff] %v2925_v18  ;;  %v2661_v38 = vadd.f32 %v5361_v9, %v2660_v16 }
 0x4d9   : > { %v2750_v41 = vadd.f32 %v2749_v20, %v2661_v38  ;;  %v2853_v30 = vpop.f32.mrf.mxu1 }
 0x4db   : > { %v2839_v47 = vadd.f32 %v2838_v34, %v2750_v41  ;;  %v2766_v8 = vpop.f32.mrf.mxu0 }
 0x4dd   : > { %v2928_v54 = vadd.f32 %v2927_v11, %v2839_v47 }
 0x4de   : > { %v2662_v62 = vpop.f32.mrf.mxu3 }
 0x4df   : > { %2989 = vst [vmem:[%s5377_s29 + $0x60] sm:$0xff] %v2928_v54  ;;  %v2663_v31 = vadd.f32 %v5361_v9, %v2662_v62 }
 0x4e1   : > { %v2752_v45 = vadd.f32 %v2751_v21, %v2663_v31  ;;  %v2855_v43 = vpop.f32.mrf.mxu1  ;;  %v2944_v21 = vpop.f32.mrf.mxu2 }
 0x4e3   : > { %v2841_v6 = vadd.f32 %v2840_v19, %v2752_v45  ;;  %2704 = vmatmul.bf16.gmra.mxu3 %v5592_v12 }
 0x4e5   : > { %v2930_v37 = vadd.f32 %v2929_v42, %v2841_v6  ;;  %v2769_v42 = vpop.f32.mrf.mxu0 }
 0x4e6   : > { %v2665_v44 = vpop.f32.mrf.mxu3 }
 0x4e7   : > { %2990 = vst [vmem:[%s5377_s29 + $0x68] sm:$0xff] %v2930_v37  ;;  %v2666_v59 = vadd.f32 %v5361_v9, %v2665_v44 }
 0x4e9   : > { %v2755_v49 = vadd.f32 %v2754_v52, %v2666_v59  ;;  %v2858_v24 = vpop.f32.mrf.mxu1  ;;  %v2947_v13 = vpop.f32.mrf.mxu2 }
 0x4eb   : > { %v2844_v35 = vadd.f32 %v2843_v2, %v2755_v49 }
 0x4ed   : > { %v2933_v5 = vadd.f32 %v2932_v39, %v2844_v35  ;;  %v2771_v40 = vpop.f32.mrf.mxu0 }
 0x4ee   : > { %v2667_v23 = vpop.f32.mrf.mxu3 }
 0x4ef   : > { %2991 = vst [vmem:[%s5377_s29 + $0x70] sm:$0xff] %v2933_v5  ;;  %v2668_v29 = vadd.f32 %v5361_v9, %v2667_v23 }
 0x4f1   : > { %v2757_v20 = vadd.f32 %v2756_v55, %v2668_v29  ;;  %v2860_v53 = vpop.f32.mrf.mxu1  ;;  %v2949_v17 = vpop.f32.mrf.mxu2 }
 0x4f3   : > { %v2846_v4 = vadd.f32 %v2845_v10, %v2757_v20 }
 0x4f5   : > { %v2935_v34 = vadd.f32 %v2934_v7, %v2846_v4  ;;  %v2774_v36 = vpop.f32.mrf.mxu0 }
 0x4f6   : > { %v2670_v27 = vpop.f32.mrf.mxu3 }
 0x4f7   : > { %2992 = vst [vmem:[%s5377_s29 + $0x78] sm:$0xff] %v2935_v34  ;;  %v2671_v11 = vadd.f32 %v5361_v9, %v2670_v27 }
 0x4f9   : > { %v2760_v22 = vadd.f32 %v2759_v50, %v2671_v11  ;;  %v2863_v18 = vpop.f32.mrf.mxu1  ;;  %v2952_v38 = vpop.f32.mrf.mxu2 }
 0x4fb   : > { %v2849_v25 = vadd.f32 %v2848_v57, %v2760_v22 }
 0x4fd   : > { %v2938_v26 = vadd.f32 %v2937_v14, %v2849_v25  ;;  %v2776_v54 = vpop.f32.mrf.mxu0 }
 0x4fe   : > { %v2672_v19 = vpop.f32.mrf.mxu3 }
 0x4ff   : > { %2993 = vst [vmem:[%s5377_s29 + $0x80] sm:$0xff] %v2938_v26  ;;  %v2673_v0 = vadd.f32 %v5361_v9, %v2672_v19 }
 0x501   : > { %v2762_v3 = vadd.f32 %v2761_v51, %v2673_v0  ;;  %v2865_v62 = vpop.f32.mrf.mxu1  ;;  %v2954_v45 = vpop.f32.mrf.mxu2 }
 0x503   : > { %v2851_v56 = vadd.f32 %v2850_v1, %v2762_v3 }
 0x505   : > { %v2940_v46 = vadd.f32 %v2939_v15, %v2851_v56  ;;  %v2779_v1 = vpop.f32.mrf.mxu0 }
 0x506   : > { %v2675_v52 = vpop.f32.mrf.mxu3 }
 0x507   : > { %2994 = vst [vmem:[%s5377_s29 + $0x88] sm:$0xff] %v2940_v46  ;;  %v2676_v32 = vadd.f32 %v5361_v9, %v2675_v52 }
 0x509   : > { %v2765_v60 = vadd.f32 %v2764_v33, %v2676_v32  ;;  %v2868_v59 = vpop.f32.mrf.mxu1  ;;  %v2957_v49 = vpop.f32.mrf.mxu2 }
 0x50b   : > { %v2854_v2 = vadd.f32 %v2853_v30, %v2765_v60 }
 0x50d   : > { %v2943_v39 = vadd.f32 %v2942_v28, %v2854_v2  ;;  %v2781_v29 = vpop.f32.mrf.mxu0 }
 0x50e   : > { %v2677_v58 = vpop.f32.mrf.mxu3 }
 0x50f   : > { %2995 = vst [vmem:[%s5377_s29 + $0x90] sm:$0xff] %v2943_v39  ;;  %v2678_v63 = vadd.f32 %v5361_v9, %v2677_v58 }
 0x511   : > { %v2767_v55 = vadd.f32 %v2766_v8, %v2678_v63  ;;  %v2870_v20 = vpop.f32.mrf.mxu1  ;;  %v2959_v34 = vpop.f32.mrf.mxu2 }
 0x513   : > { %v2856_v61 = vadd.f32 %v2855_v43, %v2767_v55 }
 0x515   : > { %v2945_v10 = vadd.f32 %v2944_v21, %v2856_v61  ;;  %v2784_v22 = vpop.f32.mrf.mxu0 }
 0x516   : > { %v2680_v48 = vpop.f32.mrf.mxu3 }
 0x517   : > { %2996 = vst [vmem:[%s5377_s29 + $0x98] sm:$0xff] %v2945_v10  ;;  %v2681_v7 = vadd.f32 %v5361_v9, %v2680_v48 }
 0x519   : > { %v2770_v16 = vadd.f32 %v2769_v42, %v2681_v7  ;;  %v2873_v21 = vpop.f32.mrf.mxu1  ;;  %v2962_v19 = vpop.f32.mrf.mxu2 }
 0x51b   : > { %v2859_v41 = vadd.f32 %v2858_v24, %v2770_v16 }
 0x51d   : > { %v2948_v50 = vadd.f32 %v2947_v13, %v2859_v41  ;;  %v2786_v24 = vpop.f32.mrf.mxu0 }
 0x51e   : > { %v2682_v47 = vpop.f32.mrf.mxu3 }
 0x51f   : > { %2997 = vst [vmem:[%s5377_s29 + $0xa0] sm:$0xff] %v2948_v50  ;;  %v2683_v57 = vadd.f32 %v5361_v9, %v2682_v47 }
 0x521   : > { %v2772_v14 = vadd.f32 %v2771_v40, %v2683_v57  ;;  %v2875_v13 = vpop.f32.mrf.mxu1  ;;  %v2964_v32 = vpop.f32.mrf.mxu2 }
 0x523   : > { %v2861_v31 = vadd.f32 %v2860_v53, %v2772_v14 }
 0x525   : > { %v2950_v6 = vadd.f32 %v2949_v17, %v2861_v31  ;;  %v2789_v53 = vpop.f32.mrf.mxu0 }
 0x526   : > { %v2685_v12 = vpop.f32.mrf.mxu3 }
 0x527   : > { %2998 = vst [vmem:[%s5377_s29 + $0xa8] sm:$0xff] %v2950_v6  ;;  %v2686_v51 = vadd.f32 %v5361_v9, %v2685_v12 }
 0x529   : > { %v2775_v37 = vadd.f32 %v2774_v36, %v2686_v51  ;;  %v2878_v63 = vpop.f32.mrf.mxu1  ;;  %v2967_v55 = vpop.f32.mrf.mxu2 }
 0x52b   : > { %v2864_v44 = vadd.f32 %v2863_v18, %v2775_v37 }
 0x52d   : > { %v2953_v15 = vadd.f32 %v2952_v38, %v2864_v44  ;;  %v2791_v7 = vpop.f32.mrf.mxu0 }
 0x52e   : > { %v2687_v35 = vpop.f32.mrf.mxu3 }
 0x52f   : > { %2999 = vst [vmem:[%s5377_s29 + $0xb0] sm:$0xff] %v2953_v15  ;;  %v2688_v5 = vadd.f32 %v5361_v9, %v2687_v35 }
 0x531   : > { %v2777_v33 = vadd.f32 %v2776_v54, %v2688_v5  ;;  %v2880_v16 = vpop.f32.mrf.mxu1  ;;  %v2969_v50 = vpop.f32.mrf.mxu2 }
 0x533   : > { %v2866_v23 = vadd.f32 %v2865_v62, %v2777_v33 }
 0x535   : > { %v2955_v30 = vadd.f32 %v2954_v45, %v2866_v23  ;;  %v2794_v14 = vpop.f32.mrf.mxu0 }
 0x536   : > { %v2690_v28 = vpop.f32.mrf.mxu3 }
 0x537   : > { %3000 = vst [vmem:[%s5377_s29 + $0xb8] sm:$0xff] %v2955_v30  ;;  %v2691_v4 = vadd.f32 %v5361_v9, %v2690_v28 }
 0x539   : > { %v2780_v27 = vadd.f32 %v2779_v1, %v2691_v4  ;;  %v2883_v45 = vpop.f32.mrf.mxu1  ;;  %v2972_v12 = vpop.f32.mrf.mxu2 }
 0x53b   : > { %v2869_v11 = vadd.f32 %v2868_v59, %v2780_v27 }
 0x53d   : > { %v2958_v8 = vadd.f32 %v2957_v49, %v2869_v11  ;;  %v2796_v59 = vpop.f32.mrf.mxu0 }
 0x53e   : > { %v2692_v43 = vpop.f32.mrf.mxu3 }
 0x53f   : > { %3001 = vst [vmem:[%s5377_s29 + $0xc0] sm:$0xff] %v2958_v8  ;;  %v2693_v25 = vadd.f32 %v5361_v9, %v2692_v43 }
 0x541   : > { %v2782_v26 = vadd.f32 %v2781_v29, %v2693_v25  ;;  %v2885_v49 = vpop.f32.mrf.mxu1  ;;  %v2974_v5 = vpop.f32.mrf.mxu2 }
 0x543   : > { %v2871_v0 = vadd.f32 %v2870_v20, %v2782_v26 }
 0x545   : > { %v2960_v3 = vadd.f32 %v2959_v34, %v2871_v0 }
 0x546   : > { %v2695_v42 = vpop.f32.mrf.mxu3 }
 0x547   : > { %3002 = vst [vmem:[%s5377_s29 + $0xc8] sm:$0xff] %v2960_v3  ;;  %v2696_v56 = vadd.f32 %v5361_v9, %v2695_v42 }
 0x549   : > { %v2785_v46 = vadd.f32 %v2784_v22, %v2696_v56 }
 0x54b   : > { %v2874_v52 = vadd.f32 %v2873_v21, %v2785_v46 }
 0x54d   : > { %v2963_v60 = vadd.f32 %v2962_v19, %v2874_v52 }
 0x54e   : > { %v2697_v2 = vpop.f32.mrf.mxu3 }
 0x54f   : > { %3003 = vst [vmem:[%s5377_s29 + $0xd0] sm:$0xff] %v2963_v60  ;;  %v2698_v40 = vadd.f32 %v5361_v9, %v2697_v2 }
 0x551   : > { %v2787_v39 = vadd.f32 %v2786_v24, %v2698_v40 }
 0x553   : > { %v2876_v58 = vadd.f32 %v2875_v13, %v2787_v39 }
 0x555   : > { %v2965_v17 = vadd.f32 %v2964_v32, %v2876_v58 }
 0x556   : > { %v2700_v61 = vpop.f32.mrf.mxu3 }
 0x557   : > { %3004 = vst [vmem:[%s5377_s29 + $0xd8] sm:$0xff] %v2965_v17  ;;  %v2701_v10 = vadd.f32 %v5361_v9, %v2700_v61 }
 0x559   : > { %v2790_v36 = vadd.f32 %v2789_v53, %v2701_v10 }
 0x55b   : > { %v2879_v48 = vadd.f32 %v2878_v63, %v2790_v36 }
 0x55d   : > { %v2968_v18 = vadd.f32 %v2967_v55, %v2879_v48 }
 0x55e   : > { %v2702_v38 = vpop.f32.mrf.mxu3 }
 0x55f   : > { %3005 = vst [vmem:[%s5377_s29 + $0xe0] sm:$0xff] %v2968_v18  ;;  %v2703_v41 = vadd.f32 %v5361_v9, %v2702_v38 }
 0x561   : > { %v2792_v47 = vadd.f32 %v2791_v7, %v2703_v41 }
 0x563   : > { %v2881_v57 = vadd.f32 %v2880_v16, %v2792_v47 }
 0x565   : > { %v2970_v54 = vadd.f32 %v2969_v50, %v2881_v57 }
 0x566   : > { %v2705_v62 = vpop.f32.mrf.mxu3 }
 0x567   : > { %3006 = vst [vmem:[%s5377_s29 + $0xe8] sm:$0xff] %v2970_v54  ;;  %v2706_v31 = vadd.f32 %v5361_v9, %v2705_v62 }
 0x569   : > { %v2795_v6 = vadd.f32 %v2794_v14, %v2706_v31 }
 0x56b   : > { %v2884_v51 = vadd.f32 %v2883_v45, %v2795_v6 }
 0x56d   : > { %v2973_v37 = vadd.f32 %v2972_v12, %v2884_v51 }
 0x56e   : > { %v2707_v1 = vpop.f32.mrf.mxu3 }
 0x56f   : > { %3007 = vst [vmem:[%s5377_s29 + $0xf0] sm:$0xff] %v2973_v37  ;;  %v2708_v44 = vadd.f32 %v5361_v9, %v2707_v1 }
 0x571   : > { %v2797_v15 = vadd.f32 %v2796_v59, %v2708_v44 }
 0x573   : > { %v2886_v35 = vadd.f32 %v2885_v49, %v2797_v15 }
 0x575   : > { %v2975_v33 = vadd.f32 %v2974_v5, %v2886_v35 }
 0x577   : > { %3008 = vst [vmem:[%s5377_s29 + $0xf8] sm:$0xff] %v2975_v33 }
 0x578   : > { %3966 = shalt.err (!%p3963_p8)
}
 0x579   : > { %s4017_s27 = smov 128   ;;  %s4018_s29 = smov 8  }
 0x57a   : > { %3818 = dma.vmem_to_hbm [thread:$0]  (%p4107_p5), %s3023_s23, 4096, %s3025_s24, %s3010_s13, %s4017_s27, %s4017_s27, %s4018_s29  }
 0x57b PF: > { %p3835_p9 = scmp.ge.s32.totalorder %s4009_s12, 2  ;;  %s3039_s17 = sand.u32 1, %s3997_s30  }
 0x57c   : > { %s3040_s22 = scalar_lea.sflag [#allocation4], %s3039_s17 }
 0x57d   : > { %p3828_p10 = pnand %p3835_p9, %p4111_p6 }
 0x57f   : > { %p3829_p11 = pneg %p3828_p10 }
 0x581   : > { %3992 = dma.done.wait (%p3829_p11), %s3040_s22, 4096  }
 0x582   : > { %3994 = vsyncadd (%p3829_p11), %s3040_s22, 4294963200  ;;  %p21_p12 = scmp.ge.s32.totalorder %s4094_s15, 4   ;;  %s5593_s30 = smov %s4001_s10 }
 0x583   : > { %s5594_s10 = smov %s4005_s11  ;;  %s5595_s11 = smov %s4105_s18 }
 0x584   : > { %s5596_s12 = smov %s4094_s15  ;;  %23 = sbr.rel (!%p21_p12) target bundleno = 7 (0x7), region = 100 }
 0x589   :  { %3046 = vsyncpa [#allocation3], 1 }
 0x58a   :  { %3048 = vsyncpa [#allocation3 + $0x1], 1 }
 0x58b   :  { %3049 = vsyncpa [#allocation6], 1 }
 0x58c   :  { %3050 = vsyncpa [#allocation4], 1 }
 0x58d   :  { %3052 = vsyncpa [#allocation4 + $0x1], 1 }

</bundles_post_ra>
